<compile_context>
chip_gen: v7x
topology: tpu7x:2x2x1
jax: 0.10.0
libtpu: 0.0.40
codegen_flags: <defaults>
</compile_context>

<pallas_src>
import functools

import jax
import jax.numpy as jnp
from jax import lax
from jax.experimental import pallas as pl
from jax.experimental.pallas import tpu as pltpu

BN_EPS = 1e-5


# ----------------------------------------------------------------------------
# Fused Pallas kernel: one block of `bsz` samples per grid step.
# ----------------------------------------------------------------------------
def dueldqn_kernel(p_ref, w1_ref, w2_ref, w3_ref, wh1_ref, wh2_ref, epi_ref,
                   o_ref, *, n_actions, oh1, oh2):
    f32 = jnp.float32
    bsz = o_ref.shape[0]
    oc1 = w1_ref.shape[1]
    oc2 = w2_ref.shape[2]
    oc3 = w3_ref.shape[2]
    npos2 = oh2 * oh2

    # ---- conv1 (8x8 stride 4, as pre-built im2col) + bias + ReLU + foldedBN ----
    # p_ref rows are (position-major, batch-minor): position p -> rows [p*bsz, (p+1)*bsz)
    y1 = jnp.dot(p_ref[...], w1_ref[...], preferred_element_type=f32)   # (P1*bsz, 32)
    a1 = (jnp.maximum(y1 + epi_ref[0:1, :oc1], 0.0)
          * epi_ref[1:2, :oc1] + epi_ref[2:3, :oc1]).astype(jnp.bfloat16)

    # ---- conv2 (4x4 stride 2): 16-tap accumulation, gathers are whole row slabs ----
    y2 = None
    for kh in range(4):
        for kw in range(4):
            slabs = []
            for i in range(oh2):
                for j in range(oh2):
                    p = (2 * i + kh) * oh1 + (2 * j + kw)
                    slabs.append(a1[p * bsz:(p + 1) * bsz, :])
            lhs = jnp.concatenate(slabs, axis=0)                 # (npos2*bsz, oc1)
            z = jnp.dot(lhs, w2_ref[4 * kh + kw], preferred_element_type=f32)
            y2 = z if y2 is None else y2 + z
    a2 = (jnp.maximum(y2 + epi_ref[3:4, :oc2], 0.0)
          * epi_ref[4:5, :oc2] + epi_ref[5:6, :oc2]).astype(jnp.bfloat16)

    # ---- conv3 (3x3 stride 1 -> 1x1 output): 9-tap accumulation -----------------
    y3 = None
    for t in range(npos2):
        z = jnp.dot(a2[t * bsz:(t + 1) * bsz, :], w3_ref[t],
                    preferred_element_type=f32)
        y3 = z if y3 is None else y3 + z
    feat = (jnp.maximum(y3 + epi_ref[6:7, :oc3], 0.0)
            * epi_ref[7:8, :oc3] + epi_ref[8:9, :oc3]).astype(jnp.bfloat16)

    # ---- dueling head: 2 fused matmuls, lane-dense (bsz, 128) output ------------
    h = jnp.maximum(jnp.dot(feat, wh1_ref[...], preferred_element_type=f32)
                    + epi_ref[9:10, :wh1_ref.shape[1]], 0.0)
    z = (jnp.dot(h.astype(jnp.bfloat16), wh2_ref[...], preferred_element_type=f32)
         + epi_ref[10:11, :wh2_ref.shape[1]])                    # (bsz, 128)
    lane = lax.broadcasted_iota(jnp.int32, z.shape, 1)
    adv_mean = jnp.sum(jnp.where(lane < n_actions, z, 0.0),
                       axis=-1, keepdims=True) * (1.0 / n_actions)
    val = jnp.sum(jnp.where(lane == n_actions, z, 0.0), axis=-1, keepdims=True)
    o_ref[...] = z + (val - adv_mean)    # cols >= n_actions are garbage; sliced off


# ----------------------------------------------------------------------------
# Wrapper glue: block sizing, input im2col (layout plumbing), weight re-layout.
# ----------------------------------------------------------------------------
def _round_up(v, m):
    return -(-v // m) * m


def _pick_batch_block(n):
    """Samples per grid step: cap at 128 (VMEM), keep >=2 steps for v7x's 2 TCs."""
    n8 = _round_up(max(n, 1), 8)
    bsz = min(128, n8)
    if n8 > 8 and n8 // bsz < 2:
        bsz = _round_up(-(-n8 // 2), 8)
    return bsz, _round_up(n8, bsz)


def _prep_input(x, u, oh1, bsz):
    """Padded NCHW input -> 2D conv1 patch matrix, rows (block, position, sample)."""
    n, c, _, _ = x.shape                                  # n is a multiple of bsz
    xs = (x.reshape(n, c, u, 4, u, 4)
           .transpose(0, 2, 4, 3, 5, 1)                   # (n, U, V, su, sv, c)
           .reshape(n, u, u, 16 * c)
           .astype(jnp.bfloat16))
    taps = [xs[:, a:a + oh1, b:b + oh1, :] for a in range(2) for b in range(2)]
    p = jnp.concatenate(taps, axis=-1)                    # (n, oh1, oh1, 64*c)
    npos, k1 = oh1 * oh1, p.shape[-1]
    p = (p.reshape(n // bsz, bsz, npos, k1)
          .transpose(0, 2, 1, 3)                          # (nblk, pos, sample, K1)
          .reshape(n // bsz * npos * bsz, k1))
    return p, npos, k1


def _prep_params(params, n_actions):
    cp = params["conv"]
    fc = params["fc"]
    hid = fc["wa1"].shape[1]
    head_w = max(2 * hid, 128)
    assert n_actions + 1 <= 128

    def bn_fold(p):
        scale = p["gamma"] / jnp.sqrt(p["var"] + BN_EPS)
        shift = p["beta"] - p["mean"] * scale
        return p["b"], scale, shift

    # conv1: fold 4x4 space-to-depth + 2x2 taps + x/256 prescale; K = (kh2,kw2,su,sv,ic)
    w = cp[0]["w"]
    oc1, ic1 = w.shape[0], w.shape[1]
    w1 = (w.reshape(oc1, ic1, 2, 4, 2, 4)                 # (oc, ic, kh2, su, kw2, sv)
           .transpose(2, 4, 3, 5, 1, 0)                   # (kh2, kw2, su, sv, ic, oc)
           .reshape(4 * 16 * ic1, oc1)) * (1.0 / 256.0)

    def conv_taps(wc):                                    # (OC,IC,KH,KW) -> (KH*KW,IC,OC)
        oc, ic, kh, kw = wc.shape
        return wc.transpose(2, 3, 1, 0).reshape(kh * kw, ic, oc)

    w2 = conv_taps(cp[1]["w"])                            # (16, 32, 64)
    w3 = conv_taps(cp[2]["w"])                            # (9, 64, 64)

    wh1 = jnp.concatenate([fc["wa1"], fc["wv1"]], axis=1)             # (feat, 2*hid)
    wh2 = jnp.zeros((2 * hid, 128), jnp.float32)
    wh2 = wh2.at[:hid, :n_actions].set(fc["wa2"])
    wh2 = wh2.at[hid:, n_actions].set(fc["wv2"][:, 0])

    b1, s1, t1 = bn_fold(cp[0])
    b2, s2, t2 = bn_fold(cp[1])
    b3, s3, t3 = bn_fold(cp[2])
    bh1 = jnp.concatenate([fc["ba1"], fc["bv1"]])
    bh2 = (jnp.zeros((128,), jnp.float32)
           .at[:n_actions].set(fc["ba2"]).at[n_actions].set(fc["bv2"][0]))

    epi = jnp.zeros((16, head_w), jnp.float32)            # packed epilogue params
    for r, v in enumerate([b1, s1, t1, b2, s2, t2, b3, s3, t3, bh1, bh2]):
        epi = epi.at[r, :v.shape[0]].set(v)

    bf = lambda a: a.astype(jnp.bfloat16)
    return [bf(w1), bf(w2), bf(w3), bf(wh1), bf(wh2), epi]


def forward_pallas(x, params):
    n, c, hgt, wid = x.shape
    assert hgt == wid and hgt % 4 == 0, "spatial size must be square and divisible by 4"
    u = hgt // 4
    oh1 = u - 1                         # conv1 output spatial (8 for 36x36)
    oh2 = (oh1 - 4) // 2 + 1            # conv2 output spatial (3)
    # TODO(synk): conv3 outputs > 1x1 (other f_shapes) would need torch's (C,H,W)
    # flatten order before the FC head; only the 1x1 case (e.g. 36x36) is wired here.
    assert oh2 - 2 == 1, "head expects a 1x1 conv3 output (use a 36x36 input)"
    n_actions = params["fc"]["wa2"].shape[1]

    bsz, n_pad = _pick_batch_block(n)
    if n_pad != n:
        x = jnp.pad(x, ((0, n_pad - n), (0, 0), (0, 0), (0, 0)))

    patches, npos, k1 = _prep_input(x.astype(jnp.float32), u, oh1, bsz)
    weights = _prep_params(params, n_actions)

    kern = functools.partial(dueldqn_kernel, n_actions=n_actions, oh1=oh1, oh2=oh2)
    in_specs = [pl.BlockSpec((npos * bsz, k1), lambda i: (i, 0))]
    for w in weights:
        in_specs.append(pl.BlockSpec(w.shape, lambda i, _nd=w.ndim: (0,) * _nd))

    out = pl.pallas_call(
        kern,
        out_shape=jax.ShapeDtypeStruct((n_pad, 128), jnp.float32),
        grid=(n_pad // bsz,),
        in_specs=in_specs,
        out_specs=pl.BlockSpec((bsz, 128), lambda i: (i, 0)),
        compiler_params=pltpu.CompilerParams(
            dimension_semantics=("parallel",),
            vmem_limit_bytes=48 * 1024 * 1024),
    )(patches, *weights)
    return out[:n, :n_actions]


# ----------------------------------------------------------------------------
# Pure-JAX f32 reference (faithful to the PyTorch module) for correctness.
# ----------------------------------------------------------------------------
def forward_ref(x, params):
    y = x.astype(jnp.float32) / 256.0
    for p in params["conv"]:
        y = lax.conv_general_dilated(
            y, p["w"], (p["stride"], p["stride"]), "VALID",
            dimension_numbers=("NCHW", "OIHW", "NCHW"))
        y = y + p["b"][None, :, None, None]
        y = jnp.maximum(y, 0.0)
        y = (y - p["mean"][None, :, None, None]) / jnp.sqrt(p["var"] + BN_EPS)[None, :, None, None]
        y = y * p["gamma"][None, :, None, None] + p["beta"][None, :, None, None]
    y = y.reshape(y.shape[0], -1)
    fc = params["fc"]
    ha = jnp.maximum(y @ fc["wa1"] + fc["ba1"], 0.0)
    adv = ha @ fc["wa2"] + fc["ba2"]
    hv = jnp.maximum(y @ fc["wv1"] + fc["bv1"], 0.0)
    val = hv @ fc["wv2"] + fc["bv2"]
    return val + (adv - adv.mean(axis=1, keepdims=True))


# ----------------------------------------------------------------------------
# Deterministic parameter init (PyTorch-like uniform fan-in bounds).
# ----------------------------------------------------------------------------
def init_params(key, f_shape, n_actions):
    in_c, h, w = f_shape
    conv_defs = [(in_c, 32, 8, 4), (32, 64, 4, 2), (64, 64, 3, 1)]
    params = {"conv": []}
    spatial = h
    for (ic, oc, ks, st) in conv_defs:
        key, k1, k2, k3, k4, k5, k6 = jax.random.split(key, 7)
        bound = 1.0 / (ic * ks * ks) ** 0.5
        params["conv"].append(dict(
            w=jax.random.uniform(k1, (oc, ic, ks, ks), jnp.float32, -bound, bound),
            b=jax.random.uniform(k2, (oc,), jnp.float32, -bound, bound),
            gamma=jax.random.uniform(k3, (oc,), jnp.float32, 0.5, 1.5),
            beta=0.1 * jax.random.normal(k4, (oc,), jnp.float32),
            mean=0.1 * jax.random.normal(k5, (oc,), jnp.float32),
            var=jax.random.uniform(k6, (oc,), jnp.float32, 0.5, 1.5),
            stride=st,
        ))
        spatial = (spatial - ks) // st + 1
    feat = 64 * spatial * spatial

    def linear(key, fan_in, fan_out):
        k1, k2 = jax.random.split(key)
        bound = 1.0 / fan_in ** 0.5
        return (jax.random.uniform(k1, (fan_in, fan_out), jnp.float32, -bound, bound),
                jax.random.uniform(k2, (fan_out,), jnp.float32, -bound, bound))

    key, ka1, ka2, kv1, kv2 = jax.random.split(key, 5)
    wa1, ba1 = linear(ka1, feat, 256)
    wa2, ba2 = linear(ka2, 256, n_actions)
    wv1, bv1 = linear(kv1, feat, 256)
    wv2, bv2 = linear(kv2, 256, 1)
    params["fc"] = dict(wa1=wa1, ba1=ba1, wa2=wa2, ba2=ba2,
                        wv1=wv1, bv1=bv1, wv2=wv2, bv2=bv2)
    return params


# ----------------------------------------------------------------------------
if __name__ == "__main__":
    # 16 samples, 4 stacked frames, 36x36 (36 -> 8 -> 3 -> 1 through the conv stack),
    # 6 actions (Bowling). 16 samples -> 2 "parallel" grid steps of 8 samples each.
    f_shape = (4, 36, 36)
    n_actions = 6
    batch = 16

    root = jax.random.PRNGKey(0)
    kp, kx = jax.random.split(root)
    params = init_params(kp, f_shape, n_actions)
    x = jax.random.uniform(kx, (batch,) + f_shape, jnp.float32, 0.0, 256.0)

    fwd = jax.jit(forward_pallas)
    out = jax.block_until_ready(fwd(x, params))

    ref = forward_ref(x, params)
    assert out.shape == (batch, n_actions), out.shape
    assert jnp.allclose(out, ref, rtol=5e-2, atol=5e-2), (
        f"max abs diff {jnp.max(jnp.abs(out - ref))}")

    print("KERNEL_OK")
</pallas_src>

<mosaic_0001>
module attributes {stable_mosaic.version = 11 : i64} {
  func.func @dueldqn_kernel(%arg0: i32, %arg1: memref<512x256xbf16, #tpu.memory_space<vmem>>, %arg2: memref<256x32xbf16, #tpu.memory_space<vmem>>, %arg3: memref<16x32x64xbf16, #tpu.memory_space<vmem>>, %arg4: memref<9x64x64xbf16, #tpu.memory_space<vmem>>, %arg5: memref<64x512xbf16, #tpu.memory_space<vmem>>, %arg6: memref<512x128xbf16, #tpu.memory_space<vmem>>, %arg7: memref<16x512xf32, #tpu.memory_space<vmem>>, %arg8: memref<8x128xf32, #tpu.memory_space<vmem>>) attributes {dimension_semantics = [#tpu.dimension_semantics<parallel>], iteration_bounds = array<i64: 2>, scalar_prefetch = 0 : i64, scratch_operands = 0 : i64, tpu.core_type = #tpu.core_type<tc>, window_params = [{transform_indices = @transform_0, window_bounds = array<i64: 512, 256>}, {pipeline_mode = #tpu.pipeline_mode<synchronous>, transform_indices = @transform_1, window_bounds = array<i64: 256, 32>}, {pipeline_mode = #tpu.pipeline_mode<synchronous>, transform_indices = @transform_2, window_bounds = array<i64: 16, 32, 64>}, {pipeline_mode = #tpu.pipeline_mode<synchronous>, transform_indices = @transform_3, window_bounds = array<i64: 9, 64, 64>}, {pipeline_mode = #tpu.pipeline_mode<synchronous>, transform_indices = @transform_4, window_bounds = array<i64: 64, 512>}, {pipeline_mode = #tpu.pipeline_mode<synchronous>, transform_indices = @transform_5, window_bounds = array<i64: 512, 128>}, {pipeline_mode = #tpu.pipeline_mode<synchronous>, transform_indices = @transform_6, window_bounds = array<i64: 16, 512>}, {transform_indices = @transform_7, window_bounds = array<i64: 8, 128>}]} {
    %c0 = arith.constant 0 : index
    %c0_0 = arith.constant 0 : index
    %0 = vector.load %arg1[%c0, %c0_0] : memref<512x256xbf16, #tpu.memory_space<vmem>>, vector<512x256xbf16>
    %c0_1 = arith.constant 0 : index
    %c0_2 = arith.constant 0 : index
    %1 = vector.load %arg2[%c0_1, %c0_2] : memref<256x32xbf16, #tpu.memory_space<vmem>>, vector<256x32xbf16>
    %cst = arith.constant dense<0.000000e+00> : vector<512x32xf32>
    %2 = tpu.matmul %0, %1, %cst {dimension_numbers = #tpu.dot_dimension_numbers<[1], [0], [0], [1], [0, 0, 1, 1], [], []>} : vector<512x256xbf16>, vector<256x32xbf16>, vector<512x32xf32> -> vector<512x32xf32>
    %c0_3 = arith.constant 0 : index
    %c0_4 = arith.constant 0 : index
    %3 = vector.load %arg7[%c0_3, %c0_4] : memref<16x512xf32, #tpu.memory_space<vmem>>, vector<1x32xf32>
    %4 = vector.broadcast %3 : vector<1x32xf32> to vector<512x32xf32>
    %5 = arith.addf %2, %4 : vector<512x32xf32>
    %cst_5 = arith.constant 0.000000e+00 : f32
    %6 = vector.broadcast %cst_5 : f32 to vector<512x32xf32>
    %7 = arith.maximumf %5, %6 : vector<512x32xf32>
    %c1 = arith.constant 1 : index
    %c0_6 = arith.constant 0 : index
    %8 = vector.load %arg7[%c1, %c0_6] : memref<16x512xf32, #tpu.memory_space<vmem>>, vector<1x32xf32>
    %9 = vector.broadcast %8 : vector<1x32xf32> to vector<512x32xf32>
    %10 = arith.mulf %7, %9 : vector<512x32xf32>
    %c2 = arith.constant 2 : index
    %c0_7 = arith.constant 0 : index
    %11 = vector.load %arg7[%c2, %c0_7] : memref<16x512xf32, #tpu.memory_space<vmem>>, vector<1x32xf32>
    %12 = vector.broadcast %11 : vector<1x32xf32> to vector<512x32xf32>
    %13 = arith.addf %10, %12 : vector<512x32xf32>
    %14 = arith.truncf %13 : vector<512x32xf32> to vector<512x32xbf16>
    %15 = vector.extract_strided_slice %14 {offsets = [0, 0], sizes = [8, 32], strides = [1, 1]} : vector<512x32xbf16> to vector<8x32xbf16>
    %16 = vector.extract_strided_slice %14 {offsets = [16, 0], sizes = [8, 32], strides = [1, 1]} : vector<512x32xbf16> to vector<8x32xbf16>
    %17 = vector.extract_strided_slice %14 {offsets = [32, 0], sizes = [8, 32], strides = [1, 1]} : vector<512x32xbf16> to vector<8x32xbf16>
    %18 = vector.extract_strided_slice %14 {offsets = [128, 0], sizes = [8, 32], strides = [1, 1]} : vector<512x32xbf16> to vector<8x32xbf16>
    %19 = vector.extract_strided_slice %14 {offsets = [144, 0], sizes = [8, 32], strides = [1, 1]} : vector<512x32xbf16> to vector<8x32xbf16>
    %20 = vector.extract_strided_slice %14 {offsets = [160, 0], sizes = [8, 32], strides = [1, 1]} : vector<512x32xbf16> to vector<8x32xbf16>
    %21 = vector.extract_strided_slice %14 {offsets = [256, 0], sizes = [8, 32], strides = [1, 1]} : vector<512x32xbf16> to vector<8x32xbf16>
    %22 = vector.extract_strided_slice %14 {offsets = [272, 0], sizes = [8, 32], strides = [1, 1]} : vector<512x32xbf16> to vector<8x32xbf16>
    %23 = vector.extract_strided_slice %14 {offsets = [288, 0], sizes = [8, 32], strides = [1, 1]} : vector<512x32xbf16> to vector<8x32xbf16>
    %24 = tpu.concatenate %15, %16, %17, %18, %19, %20, %21, %22, %23 in 0 : vector<8x32xbf16>, vector<8x32xbf16>, vector<8x32xbf16>, vector<8x32xbf16>, vector<8x32xbf16>, vector<8x32xbf16>, vector<8x32xbf16>, vector<8x32xbf16>, vector<8x32xbf16> -> vector<72x32xbf16>
    %c0_8 = arith.constant 0 : index
    %c0_9 = arith.constant 0 : index
    %c0_10 = arith.constant 0 : index
    %25 = vector.load %arg3[%c0_8, %c0_9, %c0_10] : memref<16x32x64xbf16, #tpu.memory_space<vmem>>, vector<1x32x64xbf16>
    %26 = vector.shape_cast %25 : vector<1x32x64xbf16> to vector<32x64xbf16>
    %cst_11 = arith.constant dense<0.000000e+00> : vector<72x64xf32>
    %27 = tpu.matmul %24, %26, %cst_11 {dimension_numbers = #tpu.dot_dimension_numbers<[1], [0], [0], [1], [0, 0, 1, 1], [], []>} : vector<72x32xbf16>, vector<32x64xbf16>, vector<72x64xf32> -> vector<72x64xf32>
    %28 = vector.extract_strided_slice %14 {offsets = [8, 0], sizes = [8, 32], strides = [1, 1]} : vector<512x32xbf16> to vector<8x32xbf16>
    %29 = vector.extract_strided_slice %14 {offsets = [24, 0], sizes = [8, 32], strides = [1, 1]} : vector<512x32xbf16> to vector<8x32xbf16>
    %30 = vector.extract_strided_slice %14 {offsets = [40, 0], sizes = [8, 32], strides = [1, 1]} : vector<512x32xbf16> to vector<8x32xbf16>
    %31 = vector.extract_strided_slice %14 {offsets = [136, 0], sizes = [8, 32], strides = [1, 1]} : vector<512x32xbf16> to vector<8x32xbf16>
    %32 = vector.extract_strided_slice %14 {offsets = [152, 0], sizes = [8, 32], strides = [1, 1]} : vector<512x32xbf16> to vector<8x32xbf16>
    %33 = vector.extract_strided_slice %14 {offsets = [168, 0], sizes = [8, 32], strides = [1, 1]} : vector<512x32xbf16> to vector<8x32xbf16>
    %34 = vector.extract_strided_slice %14 {offsets = [264, 0], sizes = [8, 32], strides = [1, 1]} : vector<512x32xbf16> to vector<8x32xbf16>
    %35 = vector.extract_strided_slice %14 {offsets = [280, 0], sizes = [8, 32], strides = [1, 1]} : vector<512x32xbf16> to vector<8x32xbf16>
    %36 = vector.extract_strided_slice %14 {offsets = [296, 0], sizes = [8, 32], strides = [1, 1]} : vector<512x32xbf16> to vector<8x32xbf16>
    %37 = tpu.concatenate %28, %29, %30, %31, %32, %33, %34, %35, %36 in 0 : vector<8x32xbf16>, vector<8x32xbf16>, vector<8x32xbf16>, vector<8x32xbf16>, vector<8x32xbf16>, vector<8x32xbf16>, vector<8x32xbf16>, vector<8x32xbf16>, vector<8x32xbf16> -> vector<72x32xbf16>
    %c1_12 = arith.constant 1 : index
    %c0_13 = arith.constant 0 : index
    %c0_14 = arith.constant 0 : index
    %38 = vector.load %arg3[%c1_12, %c0_13, %c0_14] : memref<16x32x64xbf16, #tpu.memory_space<vmem>>, vector<1x32x64xbf16>
    %39 = vector.shape_cast %38 : vector<1x32x64xbf16> to vector<32x64xbf16>
    %cst_15 = arith.constant dense<0.000000e+00> : vector<72x64xf32>
    %40 = tpu.matmul %37, %39, %cst_15 {dimension_numbers = #tpu.dot_dimension_numbers<[1], [0], [0], [1], [0, 0, 1, 1], [], []>} : vector<72x32xbf16>, vector<32x64xbf16>, vector<72x64xf32> -> vector<72x64xf32>
    %41 = arith.addf %27, %40 : vector<72x64xf32>
    %42 = vector.extract_strided_slice %14 {offsets = [16, 0], sizes = [8, 32], strides = [1, 1]} : vector<512x32xbf16> to vector<8x32xbf16>
    %43 = vector.extract_strided_slice %14 {offsets = [32, 0], sizes = [8, 32], strides = [1, 1]} : vector<512x32xbf16> to vector<8x32xbf16>
    %44 = vector.extract_strided_slice %14 {offsets = [48, 0], sizes = [8, 32], strides = [1, 1]} : vector<512x32xbf16> to vector<8x32xbf16>
    %45 = vector.extract_strided_slice %14 {offsets = [144, 0], sizes = [8, 32], strides = [1, 1]} : vector<512x32xbf16> to vector<8x32xbf16>
    %46 = vector.extract_strided_slice %14 {offsets = [160, 0], sizes = [8, 32], strides = [1, 1]} : vector<512x32xbf16> to vector<8x32xbf16>
    %47 = vector.extract_strided_slice %14 {offsets = [176, 0], sizes = [8, 32], strides = [1, 1]} : vector<512x32xbf16> to vector<8x32xbf16>
    %48 = vector.extract_strided_slice %14 {offsets = [272, 0], sizes = [8, 32], strides = [1, 1]} : vector<512x32xbf16> to vector<8x32xbf16>
    %49 = vector.extract_strided_slice %14 {offsets = [288, 0], sizes = [8, 32], strides = [1, 1]} : vector<512x32xbf16> to vector<8x32xbf16>
    %50 = vector.extract_strided_slice %14 {offsets = [304, 0], sizes = [8, 32], strides = [1, 1]} : vector<512x32xbf16> to vector<8x32xbf16>
    %51 = tpu.concatenate %42, %43, %44, %45, %46, %47, %48, %49, %50 in 0 : vector<8x32xbf16>, vector<8x32xbf16>, vector<8x32xbf16>, vector<8x32xbf16>, vector<8x32xbf16>, vector<8x32xbf16>, vector<8x32xbf16>, vector<8x32xbf16>, vector<8x32xbf16> -> vector<72x32xbf16>
    %c2_16 = arith.constant 2 : index
    %c0_17 = arith.constant 0 : index
    %c0_18 = arith.constant 0 : index
    %52 = vector.load %arg3[%c2_16, %c0_17, %c0_18] : memref<16x32x64xbf16, #tpu.memory_space<vmem>>, vector<1x32x64xbf16>
    %53 = vector.shape_cast %52 : vector<1x32x64xbf16> to vector<32x64xbf16>
    %cst_19 = arith.constant dense<0.000000e+00> : vector<72x64xf32>
    %54 = tpu.matmul %51, %53, %cst_19 {dimension_numbers = #tpu.dot_dimension_numbers<[1], [0], [0], [1], [0, 0, 1, 1], [], []>} : vector<72x32xbf16>, vector<32x64xbf16>, vector<72x64xf32> -> vector<72x64xf32>
    %55 = arith.addf %41, %54 : vector<72x64xf32>
    %56 = vector.extract_strided_slice %14 {offsets = [24, 0], sizes = [8, 32], strides = [1, 1]} : vector<512x32xbf16> to vector<8x32xbf16>
    %57 = vector.extract_strided_slice %14 {offsets = [40, 0], sizes = [8, 32], strides = [1, 1]} : vector<512x32xbf16> to vector<8x32xbf16>
    %58 = vector.extract_strided_slice %14 {offsets = [56, 0], sizes = [8, 32], strides = [1, 1]} : vector<512x32xbf16> to vector<8x32xbf16>
    %59 = vector.extract_strided_slice %14 {offsets = [152, 0], sizes = [8, 32], strides = [1, 1]} : vector<512x32xbf16> to vector<8x32xbf16>
    %60 = vector.extract_strided_slice %14 {offsets = [168, 0], sizes = [8, 32], strides = [1, 1]} : vector<512x32xbf16> to vector<8x32xbf16>
    %61 = vector.extract_strided_slice %14 {offsets = [184, 0], sizes = [8, 32], strides = [1, 1]} : vector<512x32xbf16> to vector<8x32xbf16>
    %62 = vector.extract_strided_slice %14 {offsets = [280, 0], sizes = [8, 32], strides = [1, 1]} : vector<512x32xbf16> to vector<8x32xbf16>
    %63 = vector.extract_strided_slice %14 {offsets = [296, 0], sizes = [8, 32], strides = [1, 1]} : vector<512x32xbf16> to vector<8x32xbf16>
    %64 = vector.extract_strided_slice %14 {offsets = [312, 0], sizes = [8, 32], strides = [1, 1]} : vector<512x32xbf16> to vector<8x32xbf16>
    %65 = tpu.concatenate %56, %57, %58, %59, %60, %61, %62, %63, %64 in 0 : vector<8x32xbf16>, vector<8x32xbf16>, vector<8x32xbf16>, vector<8x32xbf16>, vector<8x32xbf16>, vector<8x32xbf16>, vector<8x32xbf16>, vector<8x32xbf16>, vector<8x32xbf16> -> vector<72x32xbf16>
    %c3 = arith.constant 3 : index
    %c0_20 = arith.constant 0 : index
    %c0_21 = arith.constant 0 : index
    %66 = vector.load %arg3[%c3, %c0_20, %c0_21] : memref<16x32x64xbf16, #tpu.memory_space<vmem>>, vector<1x32x64xbf16>
    %67 = vector.shape_cast %66 : vector<1x32x64xbf16> to vector<32x64xbf16>
    %cst_22 = arith.constant dense<0.000000e+00> : vector<72x64xf32>
    %68 = tpu.matmul %65, %67, %cst_22 {dimension_numbers = #tpu.dot_dimension_numbers<[1], [0], [0], [1], [0, 0, 1, 1], [], []>} : vector<72x32xbf16>, vector<32x64xbf16>, vector<72x64xf32> -> vector<72x64xf32>
    %69 = arith.addf %55, %68 : vector<72x64xf32>
    %70 = vector.extract_strided_slice %14 {offsets = [64, 0], sizes = [8, 32], strides = [1, 1]} : vector<512x32xbf16> to vector<8x32xbf16>
    %71 = vector.extract_strided_slice %14 {offsets = [80, 0], sizes = [8, 32], strides = [1, 1]} : vector<512x32xbf16> to vector<8x32xbf16>
    %72 = vector.extract_strided_slice %14 {offsets = [96, 0], sizes = [8, 32], strides = [1, 1]} : vector<512x32xbf16> to vector<8x32xbf16>
    %73 = vector.extract_strided_slice %14 {offsets = [192, 0], sizes = [8, 32], strides = [1, 1]} : vector<512x32xbf16> to vector<8x32xbf16>
    %74 = vector.extract_strided_slice %14 {offsets = [208, 0], sizes = [8, 32], strides = [1, 1]} : vector<512x32xbf16> to vector<8x32xbf16>
    %75 = vector.extract_strided_slice %14 {offsets = [224, 0], sizes = [8, 32], strides = [1, 1]} : vector<512x32xbf16> to vector<8x32xbf16>
    %76 = vector.extract_strided_slice %14 {offsets = [320, 0], sizes = [8, 32], strides = [1, 1]} : vector<512x32xbf16> to vector<8x32xbf16>
    %77 = vector.extract_strided_slice %14 {offsets = [336, 0], sizes = [8, 32], strides = [1, 1]} : vector<512x32xbf16> to vector<8x32xbf16>
    %78 = vector.extract_strided_slice %14 {offsets = [352, 0], sizes = [8, 32], strides = [1, 1]} : vector<512x32xbf16> to vector<8x32xbf16>
    %79 = tpu.concatenate %70, %71, %72, %73, %74, %75, %76, %77, %78 in 0 : vector<8x32xbf16>, vector<8x32xbf16>, vector<8x32xbf16>, vector<8x32xbf16>, vector<8x32xbf16>, vector<8x32xbf16>, vector<8x32xbf16>, vector<8x32xbf16>, vector<8x32xbf16> -> vector<72x32xbf16>
    %c4 = arith.constant 4 : index
    %c0_23 = arith.constant 0 : index
    %c0_24 = arith.constant 0 : index
    %80 = vector.load %arg3[%c4, %c0_23, %c0_24] : memref<16x32x64xbf16, #tpu.memory_space<vmem>>, vector<1x32x64xbf16>
    %81 = vector.shape_cast %80 : vector<1x32x64xbf16> to vector<32x64xbf16>
    %cst_25 = arith.constant dense<0.000000e+00> : vector<72x64xf32>
    %82 = tpu.matmul %79, %81, %cst_25 {dimension_numbers = #tpu.dot_dimension_numbers<[1], [0], [0], [1], [0, 0, 1, 1], [], []>} : vector<72x32xbf16>, vector<32x64xbf16>, vector<72x64xf32> -> vector<72x64xf32>
    %83 = arith.addf %69, %82 : vector<72x64xf32>
    %84 = vector.extract_strided_slice %14 {offsets = [72, 0], sizes = [8, 32], strides = [1, 1]} : vector<512x32xbf16> to vector<8x32xbf16>
    %85 = vector.extract_strided_slice %14 {offsets = [88, 0], sizes = [8, 32], strides = [1, 1]} : vector<512x32xbf16> to vector<8x32xbf16>
    %86 = vector.extract_strided_slice %14 {offsets = [104, 0], sizes = [8, 32], strides = [1, 1]} : vector<512x32xbf16> to vector<8x32xbf16>
    %87 = vector.extract_strided_slice %14 {offsets = [200, 0], sizes = [8, 32], strides = [1, 1]} : vector<512x32xbf16> to vector<8x32xbf16>
    %88 = vector.extract_strided_slice %14 {offsets = [216, 0], sizes = [8, 32], strides = [1, 1]} : vector<512x32xbf16> to vector<8x32xbf16>
    %89 = vector.extract_strided_slice %14 {offsets = [232, 0], sizes = [8, 32], strides = [1, 1]} : vector<512x32xbf16> to vector<8x32xbf16>
    %90 = vector.extract_strided_slice %14 {offsets = [328, 0], sizes = [8, 32], strides = [1, 1]} : vector<512x32xbf16> to vector<8x32xbf16>
    %91 = vector.extract_strided_slice %14 {offsets = [344, 0], sizes = [8, 32], strides = [1, 1]} : vector<512x32xbf16> to vector<8x32xbf16>
    %92 = vector.extract_strided_slice %14 {offsets = [360, 0], sizes = [8, 32], strides = [1, 1]} : vector<512x32xbf16> to vector<8x32xbf16>
    %93 = tpu.concatenate %84, %85, %86, %87, %88, %89, %90, %91, %92 in 0 : vector<8x32xbf16>, vector<8x32xbf16>, vector<8x32xbf16>, vector<8x32xbf16>, vector<8x32xbf16>, vector<8x32xbf16>, vector<8x32xbf16>, vector<8x32xbf16>, vector<8x32xbf16> -> vector<72x32xbf16>
    %c5 = arith.constant 5 : index
    %c0_26 = arith.constant 0 : index
    %c0_27 = arith.constant 0 : index
    %94 = vector.load %arg3[%c5, %c0_26, %c0_27] : memref<16x32x64xbf16, #tpu.memory_space<vmem>>, vector<1x32x64xbf16>
    %95 = vector.shape_cast %94 : vector<1x32x64xbf16> to vector<32x64xbf16>
    %cst_28 = arith.constant dense<0.000000e+00> : vector<72x64xf32>
    %96 = tpu.matmul %93, %95, %cst_28 {dimension_numbers = #tpu.dot_dimension_numbers<[1], [0], [0], [1], [0, 0, 1, 1], [], []>} : vector<72x32xbf16>, vector<32x64xbf16>, vector<72x64xf32> -> vector<72x64xf32>
    %97 = arith.addf %83, %96 : vector<72x64xf32>
    %98 = vector.extract_strided_slice %14 {offsets = [80, 0], sizes = [8, 32], strides = [1, 1]} : vector<512x32xbf16> to vector<8x32xbf16>
    %99 = vector.extract_strided_slice %14 {offsets = [96, 0], sizes = [8, 32], strides = [1, 1]} : vector<512x32xbf16> to vector<8x32xbf16>
    %100 = vector.extract_strided_slice %14 {offsets = [112, 0], sizes = [8, 32], strides = [1, 1]} : vector<512x32xbf16> to vector<8x32xbf16>
    %101 = vector.extract_strided_slice %14 {offsets = [208, 0], sizes = [8, 32], strides = [1, 1]} : vector<512x32xbf16> to vector<8x32xbf16>
    %102 = vector.extract_strided_slice %14 {offsets = [224, 0], sizes = [8, 32], strides = [1, 1]} : vector<512x32xbf16> to vector<8x32xbf16>
    %103 = vector.extract_strided_slice %14 {offsets = [240, 0], sizes = [8, 32], strides = [1, 1]} : vector<512x32xbf16> to vector<8x32xbf16>
    %104 = vector.extract_strided_slice %14 {offsets = [336, 0], sizes = [8, 32], strides = [1, 1]} : vector<512x32xbf16> to vector<8x32xbf16>
    %105 = vector.extract_strided_slice %14 {offsets = [352, 0], sizes = [8, 32], strides = [1, 1]} : vector<512x32xbf16> to vector<8x32xbf16>
    %106 = vector.extract_strided_slice %14 {offsets = [368, 0], sizes = [8, 32], strides = [1, 1]} : vector<512x32xbf16> to vector<8x32xbf16>
    %107 = tpu.concatenate %98, %99, %100, %101, %102, %103, %104, %105, %106 in 0 : vector<8x32xbf16>, vector<8x32xbf16>, vector<8x32xbf16>, vector<8x32xbf16>, vector<8x32xbf16>, vector<8x32xbf16>, vector<8x32xbf16>, vector<8x32xbf16>, vector<8x32xbf16> -> vector<72x32xbf16>
    %c6 = arith.constant 6 : index
    %c0_29 = arith.constant 0 : index
    %c0_30 = arith.constant 0 : index
    %108 = vector.load %arg3[%c6, %c0_29, %c0_30] : memref<16x32x64xbf16, #tpu.memory_space<vmem>>, vector<1x32x64xbf16>
    %109 = vector.shape_cast %108 : vector<1x32x64xbf16> to vector<32x64xbf16>
    %cst_31 = arith.constant dense<0.000000e+00> : vector<72x64xf32>
    %110 = tpu.matmul %107, %109, %cst_31 {dimension_numbers = #tpu.dot_dimension_numbers<[1], [0], [0], [1], [0, 0, 1, 1], [], []>} : vector<72x32xbf16>, vector<32x64xbf16>, vector<72x64xf32> -> vector<72x64xf32>
    %111 = arith.addf %97, %110 : vector<72x64xf32>
    %112 = vector.extract_strided_slice %14 {offsets = [88, 0], sizes = [8, 32], strides = [1, 1]} : vector<512x32xbf16> to vector<8x32xbf16>
    %113 = vector.extract_strided_slice %14 {offsets = [104, 0], sizes = [8, 32], strides = [1, 1]} : vector<512x32xbf16> to vector<8x32xbf16>
    %114 = vector.extract_strided_slice %14 {offsets = [120, 0], sizes = [8, 32], strides = [1, 1]} : vector<512x32xbf16> to vector<8x32xbf16>
    %115 = vector.extract_strided_slice %14 {offsets = [216, 0], sizes = [8, 32], strides = [1, 1]} : vector<512x32xbf16> to vector<8x32xbf16>
    %116 = vector.extract_strided_slice %14 {offsets = [232, 0], sizes = [8, 32], strides = [1, 1]} : vector<512x32xbf16> to vector<8x32xbf16>
    %117 = vector.extract_strided_slice %14 {offsets = [248, 0], sizes = [8, 32], strides = [1, 1]} : vector<512x32xbf16> to vector<8x32xbf16>
    %118 = vector.extract_strided_slice %14 {offsets = [344, 0], sizes = [8, 32], strides = [1, 1]} : vector<512x32xbf16> to vector<8x32xbf16>
    %119 = vector.extract_strided_slice %14 {offsets = [360, 0], sizes = [8, 32], strides = [1, 1]} : vector<512x32xbf16> to vector<8x32xbf16>
    %120 = vector.extract_strided_slice %14 {offsets = [376, 0], sizes = [8, 32], strides = [1, 1]} : vector<512x32xbf16> to vector<8x32xbf16>
    %121 = tpu.concatenate %112, %113, %114, %115, %116, %117, %118, %119, %120 in 0 : vector<8x32xbf16>, vector<8x32xbf16>, vector<8x32xbf16>, vector<8x32xbf16>, vector<8x32xbf16>, vector<8x32xbf16>, vector<8x32xbf16>, vector<8x32xbf16>, vector<8x32xbf16> -> vector<72x32xbf16>
    %c7 = arith.constant 7 : index
    %c0_32 = arith.constant 0 : index
    %c0_33 = arith.constant 0 : index
    %122 = vector.load %arg3[%c7, %c0_32, %c0_33] : memref<16x32x64xbf16, #tpu.memory_space<vmem>>, vector<1x32x64xbf16>
    %123 = vector.shape_cast %122 : vector<1x32x64xbf16> to vector<32x64xbf16>
    %cst_34 = arith.constant dense<0.000000e+00> : vector<72x64xf32>
    %124 = tpu.matmul %121, %123, %cst_34 {dimension_numbers = #tpu.dot_dimension_numbers<[1], [0], [0], [1], [0, 0, 1, 1], [], []>} : vector<72x32xbf16>, vector<32x64xbf16>, vector<72x64xf32> -> vector<72x64xf32>
    %125 = arith.addf %111, %124 : vector<72x64xf32>
    %126 = vector.extract_strided_slice %14 {offsets = [128, 0], sizes = [8, 32], strides = [1, 1]} : vector<512x32xbf16> to vector<8x32xbf16>
    %127 = vector.extract_strided_slice %14 {offsets = [144, 0], sizes = [8, 32], strides = [1, 1]} : vector<512x32xbf16> to vector<8x32xbf16>
    %128 = vector.extract_strided_slice %14 {offsets = [160, 0], sizes = [8, 32], strides = [1, 1]} : vector<512x32xbf16> to vector<8x32xbf16>
    %129 = vector.extract_strided_slice %14 {offsets = [256, 0], sizes = [8, 32], strides = [1, 1]} : vector<512x32xbf16> to vector<8x32xbf16>
    %130 = vector.extract_strided_slice %14 {offsets = [272, 0], sizes = [8, 32], strides = [1, 1]} : vector<512x32xbf16> to vector<8x32xbf16>
    %131 = vector.extract_strided_slice %14 {offsets = [288, 0], sizes = [8, 32], strides = [1, 1]} : vector<512x32xbf16> to vector<8x32xbf16>
    %132 = vector.extract_strided_slice %14 {offsets = [384, 0], sizes = [8, 32], strides = [1, 1]} : vector<512x32xbf16> to vector<8x32xbf16>
    %133 = vector.extract_strided_slice %14 {offsets = [400, 0], sizes = [8, 32], strides = [1, 1]} : vector<512x32xbf16> to vector<8x32xbf16>
    %134 = vector.extract_strided_slice %14 {offsets = [416, 0], sizes = [8, 32], strides = [1, 1]} : vector<512x32xbf16> to vector<8x32xbf16>
    %135 = tpu.concatenate %126, %127, %128, %129, %130, %131, %132, %133, %134 in 0 : vector<8x32xbf16>, vector<8x32xbf16>, vector<8x32xbf16>, vector<8x32xbf16>, vector<8x32xbf16>, vector<8x32xbf16>, vector<8x32xbf16>, vector<8x32xbf16>, vector<8x32xbf16> -> vector<72x32xbf16>
    %c8 = arith.constant 8 : index
    %c0_35 = arith.constant 0 : index
    %c0_36 = arith.constant 0 : index
    %136 = vector.load %arg3[%c8, %c0_35, %c0_36] : memref<16x32x64xbf16, #tpu.memory_space<vmem>>, vector<1x32x64xbf16>
    %137 = vector.shape_cast %136 : vector<1x32x64xbf16> to vector<32x64xbf16>
    %cst_37 = arith.constant dense<0.000000e+00> : vector<72x64xf32>
    %138 = tpu.matmul %135, %137, %cst_37 {dimension_numbers = #tpu.dot_dimension_numbers<[1], [0], [0], [1], [0, 0, 1, 1], [], []>} : vector<72x32xbf16>, vector<32x64xbf16>, vector<72x64xf32> -> vector<72x64xf32>
    %139 = arith.addf %125, %138 : vector<72x64xf32>
    %140 = vector.extract_strided_slice %14 {offsets = [136, 0], sizes = [8, 32], strides = [1, 1]} : vector<512x32xbf16> to vector<8x32xbf16>
    %141 = vector.extract_strided_slice %14 {offsets = [152, 0], sizes = [8, 32], strides = [1, 1]} : vector<512x32xbf16> to vector<8x32xbf16>
    %142 = vector.extract_strided_slice %14 {offsets = [168, 0], sizes = [8, 32], strides = [1, 1]} : vector<512x32xbf16> to vector<8x32xbf16>
    %143 = vector.extract_strided_slice %14 {offsets = [264, 0], sizes = [8, 32], strides = [1, 1]} : vector<512x32xbf16> to vector<8x32xbf16>
    %144 = vector.extract_strided_slice %14 {offsets = [280, 0], sizes = [8, 32], strides = [1, 1]} : vector<512x32xbf16> to vector<8x32xbf16>
    %145 = vector.extract_strided_slice %14 {offsets = [296, 0], sizes = [8, 32], strides = [1, 1]} : vector<512x32xbf16> to vector<8x32xbf16>
    %146 = vector.extract_strided_slice %14 {offsets = [392, 0], sizes = [8, 32], strides = [1, 1]} : vector<512x32xbf16> to vector<8x32xbf16>
    %147 = vector.extract_strided_slice %14 {offsets = [408, 0], sizes = [8, 32], strides = [1, 1]} : vector<512x32xbf16> to vector<8x32xbf16>
    %148 = vector.extract_strided_slice %14 {offsets = [424, 0], sizes = [8, 32], strides = [1, 1]} : vector<512x32xbf16> to vector<8x32xbf16>
    %149 = tpu.concatenate %140, %141, %142, %143, %144, %145, %146, %147, %148 in 0 : vector<8x32xbf16>, vector<8x32xbf16>, vector<8x32xbf16>, vector<8x32xbf16>, vector<8x32xbf16>, vector<8x32xbf16>, vector<8x32xbf16>, vector<8x32xbf16>, vector<8x32xbf16> -> vector<72x32xbf16>
    %c9 = arith.constant 9 : index
    %c0_38 = arith.constant 0 : index
    %c0_39 = arith.constant 0 : index
    %150 = vector.load %arg3[%c9, %c0_38, %c0_39] : memref<16x32x64xbf16, #tpu.memory_space<vmem>>, vector<1x32x64xbf16>
    %151 = vector.shape_cast %150 : vector<1x32x64xbf16> to vector<32x64xbf16>
    %cst_40 = arith.constant dense<0.000000e+00> : vector<72x64xf32>
    %152 = tpu.matmul %149, %151, %cst_40 {dimension_numbers = #tpu.dot_dimension_numbers<[1], [0], [0], [1], [0, 0, 1, 1], [], []>} : vector<72x32xbf16>, vector<32x64xbf16>, vector<72x64xf32> -> vector<72x64xf32>
    %153 = arith.addf %139, %152 : vector<72x64xf32>
    %154 = vector.extract_strided_slice %14 {offsets = [144, 0], sizes = [8, 32], strides = [1, 1]} : vector<512x32xbf16> to vector<8x32xbf16>
    %155 = vector.extract_strided_slice %14 {offsets = [160, 0], sizes = [8, 32], strides = [1, 1]} : vector<512x32xbf16> to vector<8x32xbf16>
    %156 = vector.extract_strided_slice %14 {offsets = [176, 0], sizes = [8, 32], strides = [1, 1]} : vector<512x32xbf16> to vector<8x32xbf16>
    %157 = vector.extract_strided_slice %14 {offsets = [272, 0], sizes = [8, 32], strides = [1, 1]} : vector<512x32xbf16> to vector<8x32xbf16>
    %158 = vector.extract_strided_slice %14 {offsets = [288, 0], sizes = [8, 32], strides = [1, 1]} : vector<512x32xbf16> to vector<8x32xbf16>
    %159 = vector.extract_strided_slice %14 {offsets = [304, 0], sizes = [8, 32], strides = [1, 1]} : vector<512x32xbf16> to vector<8x32xbf16>
    %160 = vector.extract_strided_slice %14 {offsets = [400, 0], sizes = [8, 32], strides = [1, 1]} : vector<512x32xbf16> to vector<8x32xbf16>
    %161 = vector.extract_strided_slice %14 {offsets = [416, 0], sizes = [8, 32], strides = [1, 1]} : vector<512x32xbf16> to vector<8x32xbf16>
    %162 = vector.extract_strided_slice %14 {offsets = [432, 0], sizes = [8, 32], strides = [1, 1]} : vector<512x32xbf16> to vector<8x32xbf16>
    %163 = tpu.concatenate %154, %155, %156, %157, %158, %159, %160, %161, %162 in 0 : vector<8x32xbf16>, vector<8x32xbf16>, vector<8x32xbf16>, vector<8x32xbf16>, vector<8x32xbf16>, vector<8x32xbf16>, vector<8x32xbf16>, vector<8x32xbf16>, vector<8x32xbf16> -> vector<72x32xbf16>
    %c10 = arith.constant 10 : index
    %c0_41 = arith.constant 0 : index
    %c0_42 = arith.constant 0 : index
    %164 = vector.load %arg3[%c10, %c0_41, %c0_42] : memref<16x32x64xbf16, #tpu.memory_space<vmem>>, vector<1x32x64xbf16>
    %165 = vector.shape_cast %164 : vector<1x32x64xbf16> to vector<32x64xbf16>
    %cst_43 = arith.constant dense<0.000000e+00> : vector<72x64xf32>
    %166 = tpu.matmul %163, %165, %cst_43 {dimension_numbers = #tpu.dot_dimension_numbers<[1], [0], [0], [1], [0, 0, 1, 1], [], []>} : vector<72x32xbf16>, vector<32x64xbf16>, vector<72x64xf32> -> vector<72x64xf32>
    %167 = arith.addf %153, %166 : vector<72x64xf32>
    %168 = vector.extract_strided_slice %14 {offsets = [152, 0], sizes = [8, 32], strides = [1, 1]} : vector<512x32xbf16> to vector<8x32xbf16>
    %169 = vector.extract_strided_slice %14 {offsets = [168, 0], sizes = [8, 32], strides = [1, 1]} : vector<512x32xbf16> to vector<8x32xbf16>
    %170 = vector.extract_strided_slice %14 {offsets = [184, 0], sizes = [8, 32], strides = [1, 1]} : vector<512x32xbf16> to vector<8x32xbf16>
    %171 = vector.extract_strided_slice %14 {offsets = [280, 0], sizes = [8, 32], strides = [1, 1]} : vector<512x32xbf16> to vector<8x32xbf16>
    %172 = vector.extract_strided_slice %14 {offsets = [296, 0], sizes = [8, 32], strides = [1, 1]} : vector<512x32xbf16> to vector<8x32xbf16>
    %173 = vector.extract_strided_slice %14 {offsets = [312, 0], sizes = [8, 32], strides = [1, 1]} : vector<512x32xbf16> to vector<8x32xbf16>
    %174 = vector.extract_strided_slice %14 {offsets = [408, 0], sizes = [8, 32], strides = [1, 1]} : vector<512x32xbf16> to vector<8x32xbf16>
    %175 = vector.extract_strided_slice %14 {offsets = [424, 0], sizes = [8, 32], strides = [1, 1]} : vector<512x32xbf16> to vector<8x32xbf16>
    %176 = vector.extract_strided_slice %14 {offsets = [440, 0], sizes = [8, 32], strides = [1, 1]} : vector<512x32xbf16> to vector<8x32xbf16>
    %177 = tpu.concatenate %168, %169, %170, %171, %172, %173, %174, %175, %176 in 0 : vector<8x32xbf16>, vector<8x32xbf16>, vector<8x32xbf16>, vector<8x32xbf16>, vector<8x32xbf16>, vector<8x32xbf16>, vector<8x32xbf16>, vector<8x32xbf16>, vector<8x32xbf16> -> vector<72x32xbf16>
    %c11 = arith.constant 11 : index
    %c0_44 = arith.constant 0 : index
    %c0_45 = arith.constant 0 : index
    %178 = vector.load %arg3[%c11, %c0_44, %c0_45] : memref<16x32x64xbf16, #tpu.memory_space<vmem>>, vector<1x32x64xbf16>
    %179 = vector.shape_cast %178 : vector<1x32x64xbf16> to vector<32x64xbf16>
    %cst_46 = arith.constant dense<0.000000e+00> : vector<72x64xf32>
    %180 = tpu.matmul %177, %179, %cst_46 {dimension_numbers = #tpu.dot_dimension_numbers<[1], [0], [0], [1], [0, 0, 1, 1], [], []>} : vector<72x32xbf16>, vector<32x64xbf16>, vector<72x64xf32> -> vector<72x64xf32>
    %181 = arith.addf %167, %180 : vector<72x64xf32>
    %182 = vector.extract_strided_slice %14 {offsets = [192, 0], sizes = [8, 32], strides = [1, 1]} : vector<512x32xbf16> to vector<8x32xbf16>
    %183 = vector.extract_strided_slice %14 {offsets = [208, 0], sizes = [8, 32], strides = [1, 1]} : vector<512x32xbf16> to vector<8x32xbf16>
    %184 = vector.extract_strided_slice %14 {offsets = [224, 0], sizes = [8, 32], strides = [1, 1]} : vector<512x32xbf16> to vector<8x32xbf16>
    %185 = vector.extract_strided_slice %14 {offsets = [320, 0], sizes = [8, 32], strides = [1, 1]} : vector<512x32xbf16> to vector<8x32xbf16>
    %186 = vector.extract_strided_slice %14 {offsets = [336, 0], sizes = [8, 32], strides = [1, 1]} : vector<512x32xbf16> to vector<8x32xbf16>
    %187 = vector.extract_strided_slice %14 {offsets = [352, 0], sizes = [8, 32], strides = [1, 1]} : vector<512x32xbf16> to vector<8x32xbf16>
    %188 = vector.extract_strided_slice %14 {offsets = [448, 0], sizes = [8, 32], strides = [1, 1]} : vector<512x32xbf16> to vector<8x32xbf16>
    %189 = vector.extract_strided_slice %14 {offsets = [464, 0], sizes = [8, 32], strides = [1, 1]} : vector<512x32xbf16> to vector<8x32xbf16>
    %190 = vector.extract_strided_slice %14 {offsets = [480, 0], sizes = [8, 32], strides = [1, 1]} : vector<512x32xbf16> to vector<8x32xbf16>
    %191 = tpu.concatenate %182, %183, %184, %185, %186, %187, %188, %189, %190 in 0 : vector<8x32xbf16>, vector<8x32xbf16>, vector<8x32xbf16>, vector<8x32xbf16>, vector<8x32xbf16>, vector<8x32xbf16>, vector<8x32xbf16>, vector<8x32xbf16>, vector<8x32xbf16> -> vector<72x32xbf16>
    %c12 = arith.constant 12 : index
    %c0_47 = arith.constant 0 : index
    %c0_48 = arith.constant 0 : index
    %192 = vector.load %arg3[%c12, %c0_47, %c0_48] : memref<16x32x64xbf16, #tpu.memory_space<vmem>>, vector<1x32x64xbf16>
    %193 = vector.shape_cast %192 : vector<1x32x64xbf16> to vector<32x64xbf16>
    %cst_49 = arith.constant dense<0.000000e+00> : vector<72x64xf32>
    %194 = tpu.matmul %191, %193, %cst_49 {dimension_numbers = #tpu.dot_dimension_numbers<[1], [0], [0], [1], [0, 0, 1, 1], [], []>} : vector<72x32xbf16>, vector<32x64xbf16>, vector<72x64xf32> -> vector<72x64xf32>
    %195 = arith.addf %181, %194 : vector<72x64xf32>
    %196 = vector.extract_strided_slice %14 {offsets = [200, 0], sizes = [8, 32], strides = [1, 1]} : vector<512x32xbf16> to vector<8x32xbf16>
    %197 = vector.extract_strided_slice %14 {offsets = [216, 0], sizes = [8, 32], strides = [1, 1]} : vector<512x32xbf16> to vector<8x32xbf16>
    %198 = vector.extract_strided_slice %14 {offsets = [232, 0], sizes = [8, 32], strides = [1, 1]} : vector<512x32xbf16> to vector<8x32xbf16>
    %199 = vector.extract_strided_slice %14 {offsets = [328, 0], sizes = [8, 32], strides = [1, 1]} : vector<512x32xbf16> to vector<8x32xbf16>
    %200 = vector.extract_strided_slice %14 {offsets = [344, 0], sizes = [8, 32], strides = [1, 1]} : vector<512x32xbf16> to vector<8x32xbf16>
    %201 = vector.extract_strided_slice %14 {offsets = [360, 0], sizes = [8, 32], strides = [1, 1]} : vector<512x32xbf16> to vector<8x32xbf16>
    %202 = vector.extract_strided_slice %14 {offsets = [456, 0], sizes = [8, 32], strides = [1, 1]} : vector<512x32xbf16> to vector<8x32xbf16>
    %203 = vector.extract_strided_slice %14 {offsets = [472, 0], sizes = [8, 32], strides = [1, 1]} : vector<512x32xbf16> to vector<8x32xbf16>
    %204 = vector.extract_strided_slice %14 {offsets = [488, 0], sizes = [8, 32], strides = [1, 1]} : vector<512x32xbf16> to vector<8x32xbf16>
    %205 = tpu.concatenate %196, %197, %198, %199, %200, %201, %202, %203, %204 in 0 : vector<8x32xbf16>, vector<8x32xbf16>, vector<8x32xbf16>, vector<8x32xbf16>, vector<8x32xbf16>, vector<8x32xbf16>, vector<8x32xbf16>, vector<8x32xbf16>, vector<8x32xbf16> -> vector<72x32xbf16>
    %c13 = arith.constant 13 : index
    %c0_50 = arith.constant 0 : index
    %c0_51 = arith.constant 0 : index
    %206 = vector.load %arg3[%c13, %c0_50, %c0_51] : memref<16x32x64xbf16, #tpu.memory_space<vmem>>, vector<1x32x64xbf16>
    %207 = vector.shape_cast %206 : vector<1x32x64xbf16> to vector<32x64xbf16>
    %cst_52 = arith.constant dense<0.000000e+00> : vector<72x64xf32>
    %208 = tpu.matmul %205, %207, %cst_52 {dimension_numbers = #tpu.dot_dimension_numbers<[1], [0], [0], [1], [0, 0, 1, 1], [], []>} : vector<72x32xbf16>, vector<32x64xbf16>, vector<72x64xf32> -> vector<72x64xf32>
    %209 = arith.addf %195, %208 : vector<72x64xf32>
    %210 = vector.extract_strided_slice %14 {offsets = [208, 0], sizes = [8, 32], strides = [1, 1]} : vector<512x32xbf16> to vector<8x32xbf16>
    %211 = vector.extract_strided_slice %14 {offsets = [224, 0], sizes = [8, 32], strides = [1, 1]} : vector<512x32xbf16> to vector<8x32xbf16>
    %212 = vector.extract_strided_slice %14 {offsets = [240, 0], sizes = [8, 32], strides = [1, 1]} : vector<512x32xbf16> to vector<8x32xbf16>
    %213 = vector.extract_strided_slice %14 {offsets = [336, 0], sizes = [8, 32], strides = [1, 1]} : vector<512x32xbf16> to vector<8x32xbf16>
    %214 = vector.extract_strided_slice %14 {offsets = [352, 0], sizes = [8, 32], strides = [1, 1]} : vector<512x32xbf16> to vector<8x32xbf16>
    %215 = vector.extract_strided_slice %14 {offsets = [368, 0], sizes = [8, 32], strides = [1, 1]} : vector<512x32xbf16> to vector<8x32xbf16>
    %216 = vector.extract_strided_slice %14 {offsets = [464, 0], sizes = [8, 32], strides = [1, 1]} : vector<512x32xbf16> to vector<8x32xbf16>
    %217 = vector.extract_strided_slice %14 {offsets = [480, 0], sizes = [8, 32], strides = [1, 1]} : vector<512x32xbf16> to vector<8x32xbf16>
    %218 = vector.extract_strided_slice %14 {offsets = [496, 0], sizes = [8, 32], strides = [1, 1]} : vector<512x32xbf16> to vector<8x32xbf16>
    %219 = tpu.concatenate %210, %211, %212, %213, %214, %215, %216, %217, %218 in 0 : vector<8x32xbf16>, vector<8x32xbf16>, vector<8x32xbf16>, vector<8x32xbf16>, vector<8x32xbf16>, vector<8x32xbf16>, vector<8x32xbf16>, vector<8x32xbf16>, vector<8x32xbf16> -> vector<72x32xbf16>
    %c14 = arith.constant 14 : index
    %c0_53 = arith.constant 0 : index
    %c0_54 = arith.constant 0 : index
    %220 = vector.load %arg3[%c14, %c0_53, %c0_54] : memref<16x32x64xbf16, #tpu.memory_space<vmem>>, vector<1x32x64xbf16>
    %221 = vector.shape_cast %220 : vector<1x32x64xbf16> to vector<32x64xbf16>
    %cst_55 = arith.constant dense<0.000000e+00> : vector<72x64xf32>
    %222 = tpu.matmul %219, %221, %cst_55 {dimension_numbers = #tpu.dot_dimension_numbers<[1], [0], [0], [1], [0, 0, 1, 1], [], []>} : vector<72x32xbf16>, vector<32x64xbf16>, vector<72x64xf32> -> vector<72x64xf32>
    %223 = arith.addf %209, %222 : vector<72x64xf32>
    %224 = vector.extract_strided_slice %14 {offsets = [216, 0], sizes = [8, 32], strides = [1, 1]} : vector<512x32xbf16> to vector<8x32xbf16>
    %225 = vector.extract_strided_slice %14 {offsets = [232, 0], sizes = [8, 32], strides = [1, 1]} : vector<512x32xbf16> to vector<8x32xbf16>
    %226 = vector.extract_strided_slice %14 {offsets = [248, 0], sizes = [8, 32], strides = [1, 1]} : vector<512x32xbf16> to vector<8x32xbf16>
    %227 = vector.extract_strided_slice %14 {offsets = [344, 0], sizes = [8, 32], strides = [1, 1]} : vector<512x32xbf16> to vector<8x32xbf16>
    %228 = vector.extract_strided_slice %14 {offsets = [360, 0], sizes = [8, 32], strides = [1, 1]} : vector<512x32xbf16> to vector<8x32xbf16>
    %229 = vector.extract_strided_slice %14 {offsets = [376, 0], sizes = [8, 32], strides = [1, 1]} : vector<512x32xbf16> to vector<8x32xbf16>
    %230 = vector.extract_strided_slice %14 {offsets = [472, 0], sizes = [8, 32], strides = [1, 1]} : vector<512x32xbf16> to vector<8x32xbf16>
    %231 = vector.extract_strided_slice %14 {offsets = [488, 0], sizes = [8, 32], strides = [1, 1]} : vector<512x32xbf16> to vector<8x32xbf16>
    %232 = vector.extract_strided_slice %14 {offsets = [504, 0], sizes = [8, 32], strides = [1, 1]} : vector<512x32xbf16> to vector<8x32xbf16>
    %233 = tpu.concatenate %224, %225, %226, %227, %228, %229, %230, %231, %232 in 0 : vector<8x32xbf16>, vector<8x32xbf16>, vector<8x32xbf16>, vector<8x32xbf16>, vector<8x32xbf16>, vector<8x32xbf16>, vector<8x32xbf16>, vector<8x32xbf16>, vector<8x32xbf16> -> vector<72x32xbf16>
    %c15 = arith.constant 15 : index
    %c0_56 = arith.constant 0 : index
    %c0_57 = arith.constant 0 : index
    %234 = vector.load %arg3[%c15, %c0_56, %c0_57] : memref<16x32x64xbf16, #tpu.memory_space<vmem>>, vector<1x32x64xbf16>
    %235 = vector.shape_cast %234 : vector<1x32x64xbf16> to vector<32x64xbf16>
    %cst_58 = arith.constant dense<0.000000e+00> : vector<72x64xf32>
    %236 = tpu.matmul %233, %235, %cst_58 {dimension_numbers = #tpu.dot_dimension_numbers<[1], [0], [0], [1], [0, 0, 1, 1], [], []>} : vector<72x32xbf16>, vector<32x64xbf16>, vector<72x64xf32> -> vector<72x64xf32>
    %237 = arith.addf %223, %236 : vector<72x64xf32>
    %c3_59 = arith.constant 3 : index
    %c0_60 = arith.constant 0 : index
    %238 = vector.load %arg7[%c3_59, %c0_60] : memref<16x512xf32, #tpu.memory_space<vmem>>, vector<1x64xf32>
    %239 = vector.broadcast %238 : vector<1x64xf32> to vector<72x64xf32>
    %240 = arith.addf %237, %239 : vector<72x64xf32>
    %cst_61 = arith.constant 0.000000e+00 : f32
    %241 = vector.broadcast %cst_61 : f32 to vector<72x64xf32>
    %242 = arith.maximumf %240, %241 : vector<72x64xf32>
    %c4_62 = arith.constant 4 : index
    %c0_63 = arith.constant 0 : index
    %243 = vector.load %arg7[%c4_62, %c0_63] : memref<16x512xf32, #tpu.memory_space<vmem>>, vector<1x64xf32>
    %244 = vector.broadcast %243 : vector<1x64xf32> to vector<72x64xf32>
    %245 = arith.mulf %242, %244 : vector<72x64xf32>
    %c5_64 = arith.constant 5 : index
    %c0_65 = arith.constant 0 : index
    %246 = vector.load %arg7[%c5_64, %c0_65] : memref<16x512xf32, #tpu.memory_space<vmem>>, vector<1x64xf32>
    %247 = vector.broadcast %246 : vector<1x64xf32> to vector<72x64xf32>
    %248 = arith.addf %245, %247 : vector<72x64xf32>
    %249 = arith.truncf %248 : vector<72x64xf32> to vector<72x64xbf16>
    %250 = vector.extract_strided_slice %249 {offsets = [0, 0], sizes = [8, 64], strides = [1, 1]} : vector<72x64xbf16> to vector<8x64xbf16>
    %c0_66 = arith.constant 0 : index
    %c0_67 = arith.constant 0 : index
    %c0_68 = arith.constant 0 : index
    %251 = vector.load %arg4[%c0_66, %c0_67, %c0_68] : memref<9x64x64xbf16, #tpu.memory_space<vmem>>, vector<1x64x64xbf16>
    %252 = vector.shape_cast %251 : vector<1x64x64xbf16> to vector<64x64xbf16>
    %cst_69 = arith.constant dense<0.000000e+00> : vector<8x64xf32>
    %253 = tpu.matmul %250, %252, %cst_69 {dimension_numbers = #tpu.dot_dimension_numbers<[1], [0], [0], [1], [0, 0, 1, 1], [], []>} : vector<8x64xbf16>, vector<64x64xbf16>, vector<8x64xf32> -> vector<8x64xf32>
    %254 = vector.extract_strided_slice %249 {offsets = [8, 0], sizes = [8, 64], strides = [1, 1]} : vector<72x64xbf16> to vector<8x64xbf16>
    %c1_70 = arith.constant 1 : index
    %c0_71 = arith.constant 0 : index
    %c0_72 = arith.constant 0 : index
    %255 = vector.load %arg4[%c1_70, %c0_71, %c0_72] : memref<9x64x64xbf16, #tpu.memory_space<vmem>>, vector<1x64x64xbf16>
    %256 = vector.shape_cast %255 : vector<1x64x64xbf16> to vector<64x64xbf16>
    %cst_73 = arith.constant dense<0.000000e+00> : vector<8x64xf32>
    %257 = tpu.matmul %254, %256, %cst_73 {dimension_numbers = #tpu.dot_dimension_numbers<[1], [0], [0], [1], [0, 0, 1, 1], [], []>} : vector<8x64xbf16>, vector<64x64xbf16>, vector<8x64xf32> -> vector<8x64xf32>
    %258 = arith.addf %253, %257 : vector<8x64xf32>
    %259 = vector.extract_strided_slice %249 {offsets = [16, 0], sizes = [8, 64], strides = [1, 1]} : vector<72x64xbf16> to vector<8x64xbf16>
    %c2_74 = arith.constant 2 : index
    %c0_75 = arith.constant 0 : index
    %c0_76 = arith.constant 0 : index
    %260 = vector.load %arg4[%c2_74, %c0_75, %c0_76] : memref<9x64x64xbf16, #tpu.memory_space<vmem>>, vector<1x64x64xbf16>
    %261 = vector.shape_cast %260 : vector<1x64x64xbf16> to vector<64x64xbf16>
    %cst_77 = arith.constant dense<0.000000e+00> : vector<8x64xf32>
    %262 = tpu.matmul %259, %261, %cst_77 {dimension_numbers = #tpu.dot_dimension_numbers<[1], [0], [0], [1], [0, 0, 1, 1], [], []>} : vector<8x64xbf16>, vector<64x64xbf16>, vector<8x64xf32> -> vector<8x64xf32>
    %263 = arith.addf %258, %262 : vector<8x64xf32>
    %264 = vector.extract_strided_slice %249 {offsets = [24, 0], sizes = [8, 64], strides = [1, 1]} : vector<72x64xbf16> to vector<8x64xbf16>
    %c3_78 = arith.constant 3 : index
    %c0_79 = arith.constant 0 : index
    %c0_80 = arith.constant 0 : index
    %265 = vector.load %arg4[%c3_78, %c0_79, %c0_80] : memref<9x64x64xbf16, #tpu.memory_space<vmem>>, vector<1x64x64xbf16>
    %266 = vector.shape_cast %265 : vector<1x64x64xbf16> to vector<64x64xbf16>
    %cst_81 = arith.constant dense<0.000000e+00> : vector<8x64xf32>
    %267 = tpu.matmul %264, %266, %cst_81 {dimension_numbers = #tpu.dot_dimension_numbers<[1], [0], [0], [1], [0, 0, 1, 1], [], []>} : vector<8x64xbf16>, vector<64x64xbf16>, vector<8x64xf32> -> vector<8x64xf32>
    %268 = arith.addf %263, %267 : vector<8x64xf32>
    %269 = vector.extract_strided_slice %249 {offsets = [32, 0], sizes = [8, 64], strides = [1, 1]} : vector<72x64xbf16> to vector<8x64xbf16>
    %c4_82 = arith.constant 4 : index
    %c0_83 = arith.constant 0 : index
    %c0_84 = arith.constant 0 : index
    %270 = vector.load %arg4[%c4_82, %c0_83, %c0_84] : memref<9x64x64xbf16, #tpu.memory_space<vmem>>, vector<1x64x64xbf16>
    %271 = vector.shape_cast %270 : vector<1x64x64xbf16> to vector<64x64xbf16>
    %cst_85 = arith.constant dense<0.000000e+00> : vector<8x64xf32>
    %272 = tpu.matmul %269, %271, %cst_85 {dimension_numbers = #tpu.dot_dimension_numbers<[1], [0], [0], [1], [0, 0, 1, 1], [], []>} : vector<8x64xbf16>, vector<64x64xbf16>, vector<8x64xf32> -> vector<8x64xf32>
    %273 = arith.addf %268, %272 : vector<8x64xf32>
    %274 = vector.extract_strided_slice %249 {offsets = [40, 0], sizes = [8, 64], strides = [1, 1]} : vector<72x64xbf16> to vector<8x64xbf16>
    %c5_86 = arith.constant 5 : index
    %c0_87 = arith.constant 0 : index
    %c0_88 = arith.constant 0 : index
    %275 = vector.load %arg4[%c5_86, %c0_87, %c0_88] : memref<9x64x64xbf16, #tpu.memory_space<vmem>>, vector<1x64x64xbf16>
    %276 = vector.shape_cast %275 : vector<1x64x64xbf16> to vector<64x64xbf16>
    %cst_89 = arith.constant dense<0.000000e+00> : vector<8x64xf32>
    %277 = tpu.matmul %274, %276, %cst_89 {dimension_numbers = #tpu.dot_dimension_numbers<[1], [0], [0], [1], [0, 0, 1, 1], [], []>} : vector<8x64xbf16>, vector<64x64xbf16>, vector<8x64xf32> -> vector<8x64xf32>
    %278 = arith.addf %273, %277 : vector<8x64xf32>
    %279 = vector.extract_strided_slice %249 {offsets = [48, 0], sizes = [8, 64], strides = [1, 1]} : vector<72x64xbf16> to vector<8x64xbf16>
    %c6_90 = arith.constant 6 : index
    %c0_91 = arith.constant 0 : index
    %c0_92 = arith.constant 0 : index
    %280 = vector.load %arg4[%c6_90, %c0_91, %c0_92] : memref<9x64x64xbf16, #tpu.memory_space<vmem>>, vector<1x64x64xbf16>
    %281 = vector.shape_cast %280 : vector<1x64x64xbf16> to vector<64x64xbf16>
    %cst_93 = arith.constant dense<0.000000e+00> : vector<8x64xf32>
    %282 = tpu.matmul %279, %281, %cst_93 {dimension_numbers = #tpu.dot_dimension_numbers<[1], [0], [0], [1], [0, 0, 1, 1], [], []>} : vector<8x64xbf16>, vector<64x64xbf16>, vector<8x64xf32> -> vector<8x64xf32>
    %283 = arith.addf %278, %282 : vector<8x64xf32>
    %284 = vector.extract_strided_slice %249 {offsets = [56, 0], sizes = [8, 64], strides = [1, 1]} : vector<72x64xbf16> to vector<8x64xbf16>
    %c7_94 = arith.constant 7 : index
    %c0_95 = arith.constant 0 : index
    %c0_96 = arith.constant 0 : index
    %285 = vector.load %arg4[%c7_94, %c0_95, %c0_96] : memref<9x64x64xbf16, #tpu.memory_space<vmem>>, vector<1x64x64xbf16>
    %286 = vector.shape_cast %285 : vector<1x64x64xbf16> to vector<64x64xbf16>
    %cst_97 = arith.constant dense<0.000000e+00> : vector<8x64xf32>
    %287 = tpu.matmul %284, %286, %cst_97 {dimension_numbers = #tpu.dot_dimension_numbers<[1], [0], [0], [1], [0, 0, 1, 1], [], []>} : vector<8x64xbf16>, vector<64x64xbf16>, vector<8x64xf32> -> vector<8x64xf32>
    %288 = arith.addf %283, %287 : vector<8x64xf32>
    %289 = vector.extract_strided_slice %249 {offsets = [64, 0], sizes = [8, 64], strides = [1, 1]} : vector<72x64xbf16> to vector<8x64xbf16>
    %c8_98 = arith.constant 8 : index
    %c0_99 = arith.constant 0 : index
    %c0_100 = arith.constant 0 : index
    %290 = vector.load %arg4[%c8_98, %c0_99, %c0_100] : memref<9x64x64xbf16, #tpu.memory_space<vmem>>, vector<1x64x64xbf16>
    %291 = vector.shape_cast %290 : vector<1x64x64xbf16> to vector<64x64xbf16>
    %cst_101 = arith.constant dense<0.000000e+00> : vector<8x64xf32>
    %292 = tpu.matmul %289, %291, %cst_101 {dimension_numbers = #tpu.dot_dimension_numbers<[1], [0], [0], [1], [0, 0, 1, 1], [], []>} : vector<8x64xbf16>, vector<64x64xbf16>, vector<8x64xf32> -> vector<8x64xf32>
    %293 = arith.addf %288, %292 : vector<8x64xf32>
    %c6_102 = arith.constant 6 : index
    %c0_103 = arith.constant 0 : index
    %294 = vector.load %arg7[%c6_102, %c0_103] : memref<16x512xf32, #tpu.memory_space<vmem>>, vector<1x64xf32>
    %295 = vector.broadcast %294 : vector<1x64xf32> to vector<8x64xf32>
    %296 = arith.addf %293, %295 : vector<8x64xf32>
    %cst_104 = arith.constant 0.000000e+00 : f32
    %297 = vector.broadcast %cst_104 : f32 to vector<8x64xf32>
    %298 = arith.maximumf %296, %297 : vector<8x64xf32>
    %c7_105 = arith.constant 7 : index
    %c0_106 = arith.constant 0 : index
    %299 = vector.load %arg7[%c7_105, %c0_106] : memref<16x512xf32, #tpu.memory_space<vmem>>, vector<1x64xf32>
    %300 = vector.broadcast %299 : vector<1x64xf32> to vector<8x64xf32>
    %301 = arith.mulf %298, %300 : vector<8x64xf32>
    %c8_107 = arith.constant 8 : index
    %c0_108 = arith.constant 0 : index
    %302 = vector.load %arg7[%c8_107, %c0_108] : memref<16x512xf32, #tpu.memory_space<vmem>>, vector<1x64xf32>
    %303 = vector.broadcast %302 : vector<1x64xf32> to vector<8x64xf32>
    %304 = arith.addf %301, %303 : vector<8x64xf32>
    %305 = arith.truncf %304 : vector<8x64xf32> to vector<8x64xbf16>
    %c0_109 = arith.constant 0 : index
    %c0_110 = arith.constant 0 : index
    %306 = vector.load %arg5[%c0_109, %c0_110] : memref<64x512xbf16, #tpu.memory_space<vmem>>, vector<64x512xbf16>
    %cst_111 = arith.constant dense<0.000000e+00> : vector<8x512xf32>
    %307 = tpu.matmul %305, %306, %cst_111 {dimension_numbers = #tpu.dot_dimension_numbers<[1], [0], [0], [1], [0, 0, 1, 1], [], []>} : vector<8x64xbf16>, vector<64x512xbf16>, vector<8x512xf32> -> vector<8x512xf32>
    %c9_112 = arith.constant 9 : index
    %c0_113 = arith.constant 0 : index
    %308 = vector.load %arg7[%c9_112, %c0_113] : memref<16x512xf32, #tpu.memory_space<vmem>>, vector<1x512xf32>
    %309 = vector.broadcast %308 : vector<1x512xf32> to vector<8x512xf32>
    %310 = arith.addf %307, %309 : vector<8x512xf32>
    %cst_114 = arith.constant 0.000000e+00 : f32
    %311 = vector.broadcast %cst_114 : f32 to vector<8x512xf32>
    %312 = arith.maximumf %310, %311 : vector<8x512xf32>
    %313 = arith.truncf %312 : vector<8x512xf32> to vector<8x512xbf16>
    %c0_115 = arith.constant 0 : index
    %c0_116 = arith.constant 0 : index
    %314 = vector.load %arg6[%c0_115, %c0_116] : memref<512x128xbf16, #tpu.memory_space<vmem>>, vector<512x128xbf16>
    %cst_117 = arith.constant dense<0.000000e+00> : vector<8x128xf32>
    %315 = tpu.matmul %313, %314, %cst_117 {dimension_numbers = #tpu.dot_dimension_numbers<[1], [0], [0], [1], [0, 0, 1, 1], [], []>} : vector<8x512xbf16>, vector<512x128xbf16>, vector<8x128xf32> -> vector<8x128xf32>
    %c10_118 = arith.constant 10 : index
    %c0_119 = arith.constant 0 : index
    %316 = vector.load %arg7[%c10_118, %c0_119] : memref<16x512xf32, #tpu.memory_space<vmem>>, vector<1x128xf32>
    %317 = vector.broadcast %316 : vector<1x128xf32> to vector<8x128xf32>
    %318 = arith.addf %315, %317 : vector<8x128xf32>
    %319 = tpu.iota {dimensions = array<i32: 1>} : vector<8x128xi32>
    %c6_i32 = arith.constant 6 : i32
    %320 = vector.broadcast %c6_i32 : i32 to vector<8x128xi32>
    %321 = arith.cmpi slt, %319, %320 : vector<8x128xi32>
    %cst_120 = arith.constant 0.000000e+00 : f32
    %322 = vector.broadcast %cst_120 : f32 to vector<8x128xf32>
    %323 = arith.select %321, %318, %322 : vector<8x128xi1>, vector<8x128xf32>
    %cst_121 = arith.constant dense<0.000000e+00> : vector<8xf32>
    %324 = vector.multi_reduction <add>, %323, %cst_121 [1] : vector<8x128xf32> to vector<8xf32>
    %325 = vector.shape_cast %324 : vector<8xf32> to vector<8x1xf32>
    %cst_122 = arith.constant 0.166666672 : f32
    %326 = vector.broadcast %cst_122 : f32 to vector<8x1xf32>
    %327 = arith.mulf %325, %326 : vector<8x1xf32>
    %c6_i32_123 = arith.constant 6 : i32
    %328 = vector.broadcast %c6_i32_123 : i32 to vector<8x128xi32>
    %329 = arith.cmpi eq, %319, %328 : vector<8x128xi32>
    %cst_124 = arith.constant 0.000000e+00 : f32
    %330 = vector.broadcast %cst_124 : f32 to vector<8x128xf32>
    %331 = arith.select %329, %318, %330 : vector<8x128xi1>, vector<8x128xf32>
    %cst_125 = arith.constant dense<0.000000e+00> : vector<8xf32>
    %332 = vector.multi_reduction <add>, %331, %cst_125 [1] : vector<8x128xf32> to vector<8xf32>
    %333 = vector.shape_cast %332 : vector<8xf32> to vector<8x1xf32>
    %334 = arith.subf %333, %327 : vector<8x1xf32>
    %335 = vector.broadcast %334 : vector<8x1xf32> to vector<8x128xf32>
    %336 = arith.addf %318, %335 : vector<8x128xf32>
    %c0_126 = arith.constant 0 : index
    %c0_127 = arith.constant 0 : index
    %337 = vector.load %arg8[%c0_126, %c0_127] : memref<8x128xf32, #tpu.memory_space<vmem>>, vector<8x128xf32>
    tpu.vector_store %arg8[%c0_126, %c0_127], %336 {strides = array<i32>} : memref<8x128xf32, #tpu.memory_space<vmem>>, vector<8x128xf32>,
    return
  }
  func.func @transform_0(%arg0: i32) -> (i32, i32) {
    %c0_i32 = arith.constant 0 : i32
    %c0_i32_0 = arith.constant 0 : i32
    return %arg0, %c0_i32 : i32, i32
  }
  func.func @transform_1(%arg0: i32) -> (i32, i32) {
    %c0_i32 = arith.constant 0 : i32
    %c0_i32_0 = arith.constant 0 : i32
    %c0_i32_1 = arith.constant 0 : i32
    return %c0_i32, %c0_i32_0 : i32, i32
  }
  func.func @transform_2(%arg0: i32) -> (i32, i32, i32) {
    %c0_i32 = arith.constant 0 : i32
    %c0_i32_0 = arith.constant 0 : i32
    %c0_i32_1 = arith.constant 0 : i32
    %c0_i32_2 = arith.constant 0 : i32
    return %c0_i32, %c0_i32_0, %c0_i32_1 : i32, i32, i32
  }
  func.func @transform_3(%arg0: i32) -> (i32, i32, i32) {
    %c0_i32 = arith.constant 0 : i32
    %c0_i32_0 = arith.constant 0 : i32
    %c0_i32_1 = arith.constant 0 : i32
    %c0_i32_2 = arith.constant 0 : i32
    return %c0_i32, %c0_i32_0, %c0_i32_1 : i32, i32, i32
  }
  func.func @transform_4(%arg0: i32) -> (i32, i32) {
    %c0_i32 = arith.constant 0 : i32
    %c0_i32_0 = arith.constant 0 : i32
    %c0_i32_1 = arith.constant 0 : i32
    return %c0_i32, %c0_i32_0 : i32, i32
  }
  func.func @transform_5(%arg0: i32) -> (i32, i32) {
    %c0_i32 = arith.constant 0 : i32
    %c0_i32_0 = arith.constant 0 : i32
    %c0_i32_1 = arith.constant 0 : i32
    return %c0_i32, %c0_i32_0 : i32, i32
  }
  func.func @transform_6(%arg0: i32) -> (i32, i32) {
    %c0_i32 = arith.constant 0 : i32
    %c0_i32_0 = arith.constant 0 : i32
    %c0_i32_1 = arith.constant 0 : i32
    return %c0_i32, %c0_i32_0 : i32, i32
  }
  func.func @transform_7(%arg0: i32) -> (i32, i32) {
    %c0_i32 = arith.constant 0 : i32
    %c0_i32_0 = arith.constant 0 : i32
    return %arg0, %c0_i32 : i32, i32
  }
}

</mosaic_0001>

<bundles_post_ra>
// kernel: forward_pallas.1
= control target key start
LH: loop header
LB: loop body
LE: loop exit
PB: predicated region body
PF: predicated region fallthrough
CT: control target
= control target key end

     0   :  { %s5975_s24 = smov 0   ;;  %s7649_s0 = inlined_call_operand.vmem [shape: bf16[1024,256], index: 0, kind: input, shape index: {}]   ;;  %s7650_s1 = inlined_call_operand.vmem [shape: bf16[256,32], index: 1, kind: input, shape index: {}]   ;;  %s7651_s2 = inlined_call_operand.vmem [shape: bf16[16,32,64], index: 2, kind: input, shape index: {}]   ;;  %s7652_s3 = inlined_call_operand.vmem [shape: bf16[9,64,64], index: 3, kind: input, shape index: {}]   ;;  %s7653_s4 = inlined_call_operand.vmem [shape: bf16[64,512], index: 4, kind: input, shape index: {}]   ;;  %s7654_s5 = inlined_call_operand.vmem [shape: bf16[512,128], index: 5, kind: input, shape index: {}]   ;;  %s7655_s6 = inlined_call_operand.vmem [shape: f32[16,512], index: 6, kind: input, shape index: {}]   ;;  %s7656_s7 = inlined_call_operand.vmem [shape: f32[16,128], index: 7, kind: output, shape index: {}]  }
   0x1 LB: > { %s5981_s25 = sadd.s32 4294967295, %s5930_s24   ;;  %p4561_p0 = scmp.ge.s32.totalorder %s5930_s24, 1  ;;  %s5930_s24 = sphi %s5975_s24, %s17_s24  }
   0x2   : > { %p239_p1 = scmp.lt.s32.totalorder %s5930_s24, 3 }
   0x4   : > { %p240_p2 = pnand %p4561_p0, %p239_p1 }
   0x5   : > { %v5685_v0 = vld [vmem:[%s7650_s1] sm:$0xff] (!%p240_p2)   ;;  %v7657_v1 = vmov (!%p240_p2), 0   ;;  %s4562_s28 = sshll.u32 (!%p240_p2), %s5981_s25, 6  ;;  %v5686_v2 = vld [vmem:[%s7650_s1 + $0x8] sm:$0xff] (!%p240_p2)   ;;  %v5687_v3 = vld [vmem:[%s7650_s1 + $0x10] sm:$0xff] (!%p240_p2)   ;;  %v5933_v45 = vmov (!%p240_p2), 0.0  }
   0x6   : > { %243 = sbr.rel (%p240_p2) target bundleno = 1955 (0x7a3), region = 48  ;;  %796 = vmatprep.subr.bf16.mxu0 (!%p240_p2), %v7657_v1  ;;  %p272_p3 = scmp.lt.s32.totalorder (!%p240_p2), %s4562_s28, 127  ;;  %v5688_v4 = vld [vmem:[%s7650_s1 + $0x18] sm:$0xff] (!%p240_p2)   ;;  %v5689_v5 = vld [vmem:[%s7650_s1 + $0x20] sm:$0xff] (!%p240_p2)   ;;  %v5690_v7 = vld [vmem:[%s7650_s1 + $0x28] sm:$0xff] (!%p240_p2)   ;;  %5182 = vmatprep.subr.bf16.mxu1 (!%p240_p2), %v5933_v45  ;;  %vm5934_vm0 = vmmov (!%p240_p2), 0  }
   0x7   : > { %797 = vmatpush1.bf16.msra.mxu0 (!%p240_p2), %v5685_v0  ;;  %v5691_v8 = vld [vmem:[%s7650_s1 + $0x30] sm:$0xff] (!%p240_p2)   ;;  %v5692_v9 = vld [vmem:[%s7650_s1 + $0x38] sm:$0xff] (!%p240_p2)   ;;  %v5693_v10 = vld [vmem:[%s7650_s1 + $0x40] sm:$0xff] (!%p240_p2)   ;;  %5186 = vmatprep.mubr.msk.bf16.mxu1 (!%p240_p2), %vm5934_vm0, %v5933_v45  ;;  %vm1319_vm1 = vcmask (!%p240_p2), 1043456   ;;  %vm1375_vm2 = vcmask (!%p240_p2), 261120   ;;  %vm3277_vm3 = vcmask (!%p240_p2), 523264  }
   0x8   : > { %798 = vmatprep.subr.bf16.mxu0 (!%p240_p2), %v7657_v1  ;;  %v5694_v11 = vld [vmem:[%s7650_s1 + $0x48] sm:$0xff] (!%p240_p2)   ;;  %v5695_v12 = vld [vmem:[%s7650_s1 + $0x50] sm:$0xff] (!%p240_p2)   ;;  %v5696_v13 = vld [vmem:[%s7650_s1 + $0x58] sm:$0xff] (!%p240_p2)   ;;  %p278_p4 = scmp.lt.s32.totalorder (!%p240_p2), %s5981_s25, 1 }
   0x9   : > { %v5697_v14 = vld [vmem:[%s7650_s1 + $0x60] sm:$0xff] (!%p240_p2)   ;;  %v5698_v15 = vld [vmem:[%s7650_s1 + $0x68] sm:$0xff] (!%p240_p2)   ;;  %v5699_v16 = vld [vmem:[%s7650_s1 + $0x70] sm:$0xff] (!%p240_p2)  }
   0xa   : > { %v5700_v17 = vld [vmem:[%s7650_s1 + $0x78] sm:$0xff] (!%p240_p2)   ;;  %v5782_v44 = vld [vmem:[%s7651_s2 + $0x10] sm:$0xff] (!%p240_p2)   ;;  %v5799_v63 = vld [vmem:[%s7651_s2 + $0x80] sm:$0xff] (!%p240_p2)  }
   0xb   : > { %799 = vmatpush1.bf16.msra.mxu0 (!%p240_p2), %v5686_v2  ;;  %5183 = vmatpush3.bf16.msra.mxu1 (!%p240_p2), %v5782_v44  ;;  %v5783_v47 = vld [vmem:[%s7651_s2 + $0x18] sm:$0xff] (!%p240_p2)  }
   0xc   : > { %800 = vmatprep.subr.bf16.mxu0 (!%p240_p2), %v7657_v1  ;;  %5184 = vmatprep.subr.bf16.mxu1 (!%p240_p2), %v5933_v45 }
   0xd   : > { %s7663_s28 = smov (!%p272_p3, %s4562_s28), 127  ;;  %s7665_s25 = smov (!%p278_p4, %s5981_s25), 1 }
   0xe   : > { %s4980_s12 = sshll.u32 %s7663_s28, 3  ;;  %s4565_s30 = sshll.u32 %s7665_s25, 3 }
   0xf   : > { %801 = vmatpush1.bf16.msra.mxu0 %v5687_v3  ;;  %s6008_s17 = scalar_lea.vmem %s7649_s0, %s4980_s12  ;;  %5185 = vmatpush3.bf16.msra.mxu1 %v5783_v47  ;;  %v5800_v3 = vld [vmem:[%s7651_s2 + $0x88] sm:$0xff]   ;;  %s281_s10 = scalar_lea.vmem %s7656_s7, %s4565_s30 }
  0x10   : > { %802 = vmatprep.subr.bf16.mxu0 %v7657_v1  ;;  %v5703_v6 = vld [vmem:[%s6008_s17 + $0x4] ss:$8 sps:$4 sm:$0xff]   ;;  %v5701_v18 = vld [vmem:[%s6008_s17] ss:$8 sps:$4 sm:$0xff]   ;;  %v5704_v19 = vld [vmem:[%s6008_s17 + $0x14] ss:$8 sps:$4 sm:$0xff]   ;;  %5206 = vmatprep.subr.bf16.mxu1 %v5933_v45 }
  0x11   : > { %828 = vmatprep.mubr.bf16.mxu0 %v5703_v6  ;;  %v5706_v20 = vld [vmem:[%s6008_s17 + $0x10] ss:$8 sps:$4 sm:$0xff]   ;;  %v5707_v21 = vld [vmem:[%s6008_s17 + $0x24] ss:$8 sps:$4 sm:$0xff]   ;;  %v5709_v22 = vld [vmem:[%s6008_s17 + $0x20] ss:$8 sps:$4 sm:$0xff]  }
  0x12   : > { %v5710_v23 = vld [vmem:[%s6008_s17 + $0x34] ss:$8 sps:$4 sm:$0xff]   ;;  %v5712_v24 = vld [vmem:[%s6008_s17 + $0x30] ss:$8 sps:$4 sm:$0xff]   ;;  %v5713_v25 = vld [vmem:[%s6008_s17 + $0x44] ss:$8 sps:$4 sm:$0xff]  }
  0x13   : > { %803 = vmatpush1.bf16.msra.mxu0 %v5688_v4  ;;  %v5715_v26 = vld [vmem:[%s6008_s17 + $0x40] ss:$8 sps:$4 sm:$0xff]   ;;  %v5716_v27 = vld [vmem:[%s6008_s17 + $0x54] ss:$8 sps:$4 sm:$0xff]   ;;  %v5718_v28 = vld [vmem:[%s6008_s17 + $0x50] ss:$8 sps:$4 sm:$0xff]  }
  0x14   : > { %804 = vmatprep.subr.bf16.mxu0 %v7657_v1  ;;  %v5719_v29 = vld [vmem:[%s6008_s17 + $0x64] ss:$8 sps:$4 sm:$0xff]   ;;  %v5721_v30 = vld [vmem:[%s6008_s17 + $0x60] ss:$8 sps:$4 sm:$0xff]   ;;  %v5722_v31 = vld [vmem:[%s6008_s17 + $0x74] ss:$8 sps:$4 sm:$0xff]  }
  0x15   : > { %v5724_v32 = vld [vmem:[%s6008_s17 + $0x70] ss:$8 sps:$4 sm:$0xff]   ;;  %v5725_v33 = vld [vmem:[%s6008_s17 + $0x84] ss:$8 sps:$4 sm:$0xff]   ;;  %v5727_v34 = vld [vmem:[%s6008_s17 + $0x80] ss:$8 sps:$4 sm:$0xff]  }
  0x16   : > { %v5728_v35 = vld [vmem:[%s6008_s17 + $0x94] ss:$8 sps:$4 sm:$0xff]   ;;  %v5730_v36 = vld [vmem:[%s6008_s17 + $0x90] ss:$8 sps:$4 sm:$0xff]   ;;  %v5731_v37 = vld [vmem:[%s6008_s17 + $0xa4] ss:$8 sps:$4 sm:$0xff]  }
  0x17   : > { %805 = vmatpush1.bf16.msra.mxu0 %v5689_v5  ;;  %v5733_v38 = vld [vmem:[%s6008_s17 + $0xa0] ss:$8 sps:$4 sm:$0xff]   ;;  %v5734_v39 = vld [vmem:[%s6008_s17 + $0xb4] ss:$8 sps:$4 sm:$0xff]   ;;  %v5736_v40 = vld [vmem:[%s6008_s17 + $0xb0] ss:$8 sps:$4 sm:$0xff]  }
  0x18   : > { %806 = vmatprep.subr.bf16.mxu0 %v7657_v1  ;;  %v5737_v41 = vld [vmem:[%s6008_s17 + $0xc4] ss:$8 sps:$4 sm:$0xff]   ;;  %v5739_v42 = vld [vmem:[%s6008_s17 + $0xc0] ss:$8 sps:$4 sm:$0xff]   ;;  %v5740_v43 = vld [vmem:[%s6008_s17 + $0xd4] ss:$8 sps:$4 sm:$0xff]  }
  0x19   : > { %v5742_v46 = vld [vmem:[%s6008_s17 + $0xd0] ss:$8 sps:$4 sm:$0xff]   ;;  %v5743_v48 = vld [vmem:[%s6008_s17 + $0xe4] ss:$8 sps:$4 sm:$0xff]   ;;  %v5745_v49 = vld [vmem:[%s6008_s17 + $0xe0] ss:$8 sps:$4 sm:$0xff]  }
  0x1a   : > { %v5746_v50 = vld [vmem:[%s6008_s17 + $0xf4] ss:$8 sps:$4 sm:$0xff]   ;;  %v5748_v51 = vld [vmem:[%s6008_s17 + $0xf0] ss:$8 sps:$4 sm:$0xff]   ;;  %v5749_v52 = vld [vmem:[%s6008_s17 + $0x104] ss:$8 sps:$4 sm:$0xff]  }
  0x1b   : > { %807 = vmatpush1.bf16.msra.mxu0 %v5690_v7  ;;  %v5751_v53 = vld [vmem:[%s6008_s17 + $0x100] ss:$8 sps:$4 sm:$0xff]   ;;  %v5752_v54 = vld [vmem:[%s6008_s17 + $0x114] ss:$8 sps:$4 sm:$0xff]   ;;  %v5754_v55 = vld [vmem:[%s6008_s17 + $0x110] ss:$8 sps:$4 sm:$0xff]  }
  0x1c   : > { %808 = vmatprep.subr.bf16.mxu0 %v7657_v1  ;;  %v5755_v56 = vld [vmem:[%s6008_s17 + $0x124] ss:$8 sps:$4 sm:$0xff]   ;;  %v5757_v57 = vld [vmem:[%s6008_s17 + $0x120] ss:$8 sps:$4 sm:$0xff]   ;;  %v5758_v58 = vld [vmem:[%s6008_s17 + $0x134] ss:$8 sps:$4 sm:$0xff]  }
  0x1d   : > { %v5760_v59 = vld [vmem:[%s6008_s17 + $0x130] ss:$8 sps:$4 sm:$0xff]   ;;  %v5761_v60 = vld [vmem:[%s6008_s17 + $0x144] ss:$8 sps:$4 sm:$0xff]   ;;  %v5763_v61 = vld [vmem:[%s6008_s17 + $0x140] ss:$8 sps:$4 sm:$0xff]  }
  0x1e   : > { %v5764_v62 = vld [vmem:[%s6008_s17 + $0x154] ss:$8 sps:$4 sm:$0xff]   ;;  %v5766_v0 = vld [vmem:[%s6008_s17 + $0x150] ss:$8 sps:$4 sm:$0xff]   ;;  %v5767_v2 = vld [vmem:[%s6008_s17 + $0x164] ss:$8 sps:$4 sm:$0xff]  }
  0x1f   : > { %809 = vmatpush1.bf16.msra.mxu0 %v5691_v8  ;;  %v5769_v4 = vld [vmem:[%s6008_s17 + $0x160] ss:$8 sps:$4 sm:$0xff]   ;;  %v5770_v5 = vld [vmem:[%s6008_s17 + $0x174] ss:$8 sps:$4 sm:$0xff]   ;;  %v5772_v6 = vld [vmem:[%s6008_s17 + $0x170] ss:$8 sps:$4 sm:$0xff]  }
  0x20   : > { %810 = vmatprep.subr.bf16.mxu0 %v7657_v1  ;;  %v5773_v7 = vld [vmem:[%s6008_s17 + $0x184] ss:$8 sps:$4 sm:$0xff]   ;;  %v5775_v8 = vld [vmem:[%s6008_s17 + $0x180] ss:$8 sps:$4 sm:$0xff]  }
  0x23   : > { %811 = vmatpush1.bf16.msra.mxu0 %v5692_v9  ;;  %v5776_v9 = vld [vmem:[%s6008_s17 + $0x194] ss:$8 sps:$4 sm:$0xff]  }
  0x24   : > { %812 = vmatprep.subr.bf16.mxu0 %v7657_v1 }
  0x27   : > { %813 = vmatpush1.bf16.msra.mxu0 %v5693_v10  ;;  %v5778_v10 = vld [vmem:[%s6008_s17 + $0x190] ss:$8 sps:$4 sm:$0xff]  }
  0x28   : > { %814 = vmatprep.subr.bf16.mxu0 %v7657_v1 }
  0x2b   : > { %815 = vmatpush1.bf16.msra.mxu0 %v5694_v11  ;;  %v5779_v11 = vld [vmem:[%s6008_s17 + $0x1a4] ss:$8 sps:$4 sm:$0xff]  }
  0x2c   : > { %816 = vmatprep.subr.bf16.mxu0 %v7657_v1 }
  0x2f   : > { %817 = vmatpush1.bf16.msra.mxu0 %v5695_v12  ;;  %v5781_v12 = vld [vmem:[%s6008_s17 + $0x1a0] ss:$8 sps:$4 sm:$0xff]  }
  0x30   : > { %818 = vmatprep.subr.bf16.mxu0 %v7657_v1 }
  0x33   : > { %819 = vmatpush1.bf16.msra.mxu0 %v5696_v13  ;;  %v5784_v13 = vld [vmem:[%s6008_s17 + $0x1b4] ss:$8 sps:$4 sm:$0xff]  }
  0x34   : > { %820 = vmatprep.subr.bf16.mxu0 %v7657_v1 }
  0x37   : > { %821 = vmatpush1.bf16.msra.mxu0 %v5697_v14  ;;  %v6133_v14 = vld [vmem:[%s7655_s6] ss:$0 sm:$0xff] }
  0x38   : > { %822 = vmatprep.subr.bf16.mxu0 %v7657_v1 }
  0x3b   : > { %823 = vmatpush1.bf16.msra.mxu0 %v5698_v15 }
  0x3c   : > { %824 = vmatprep.subr.bf16.mxu0 %v7657_v1 }
  0x3f   : > { %825 = vmatpush1.bf16.msra.mxu0 %v5699_v16 }
  0x40   : > { %826 = vmatprep.subr.bf16.mxu0 %v7657_v1 }
  0x43   : > { %827 = vmatpush1.bf16.msra.mxu0 %v5700_v17 }
  0x44   : > { %5374 = vmatprep.subr.bf16.mxu0 %v5933_v45 }
  0x46   : > { %829 = vmatmul.mubr.bf16.vlgmr.msra.gmra.mrb[0].mxu0 %v5701_v18  ;;  %v5786_v18 = vld [vmem:[%s6008_s17 + $0x1b0] ss:$8 sps:$4 sm:$0xff]  }
  0x47   : > { %836 = vmatprep.mubr.bf16.mxu0 %v5704_v19  ;;  %5375 = vmatpush3.bf16.msra.mxu0 %v5799_v63  ;;  %v6140_v19 = vld [vmem:[%s7655_s6 + $0x1] ss:$0 sm:$0xff] }
  0x48   : > { %5376 = vmatprep.subr.bf16.mxu0 %v5933_v45 }
  0x4b   : > { %5377 = vmatpush3.bf16.msra.mxu0 %v5800_v3 }
  0x4c   : > { %5422 = vmatprep.subr.bf16.mxu0 %v5933_v45 }
  0x4e   : > { %837 = vmatmul.mubr.bf16.gmra.mrb[4].mxu0 %v5706_v20 }
  0x4f   : > { %844 = vmatprep.mubr.bf16.mxu0 %v5707_v21  ;;  %v5787_v21 = vld [vmem:[%s6008_s17 + $0x1c4] ss:$8 sps:$4 sm:$0xff]  }
  0x56   : > { %845 = vmatmul.mubr.bf16.gmra.mrb[8].mxu0 %v5709_v22 }
  0x57   : > { %852 = vmatprep.mubr.bf16.mxu0 %v5710_v23 }
  0x5e   : > { %853 = vmatmul.mubr.bf16.gmra.mrb[12].mxu0 %v5712_v24 }
  0x5f   : > { %860 = vmatprep.mubr.bf16.mxu0 %v5713_v25 }
  0x66   : > { %861 = vmatmul.mubr.bf16.gmra.mrb[16].mxu0 %v5715_v26 }
  0x67   : > { %868 = vmatprep.mubr.bf16.mxu0 %v5716_v27  ;;  %v6148_v27 = vld [vmem:[%s7655_s6 + $0x2] ss:$0 sm:$0xff] }
  0x6e   : > { %869 = vmatmul.mubr.bf16.gmra.mrb[20].mxu0 %v5718_v28 }
  0x6f   : > { %876 = vmatprep.mubr.bf16.mxu0 %v5719_v29 }
  0x76   : > { %877 = vmatmul.mubr.bf16.gmra.mrb[24].mxu0 %v5721_v30 }
  0x77   : > { %884 = vmatprep.mubr.bf16.mxu0 %v5722_v31 }
  0x7e   : > { %885 = vmatmul.mubr.bf16.gmra.mrb[28].mxu0 %v5724_v32 }
  0x7f   : > { %892 = vmatprep.mubr.bf16.mxu0 %v5725_v33 }
  0x86   : > { %893 = vmatmul.mubr.bf16.gmra.mrb[32].mxu0 %v5727_v34  ;;  %v5789_v34 = vld [vmem:[%s6008_s17 + $0x1c0] ss:$8 sps:$4 sm:$0xff]  }
  0x87   : > { %900 = vmatprep.mubr.bf16.mxu0 %v5728_v35 }
  0x8e   : > { %901 = vmatmul.mubr.bf16.gmra.mrb[36].mxu0 %v5730_v36  ;;  %v5790_v36 = vld [vmem:[%s6008_s17 + $0x1d4] ss:$8 sps:$4 sm:$0xff]  }
  0x8f   : > { %908 = vmatprep.mubr.bf16.mxu0 %v5731_v37 }
  0x96   : > { %909 = vmatmul.mubr.bf16.gmra.mrb[40].mxu0 %v5733_v38 }
  0x97   : > { %916 = vmatprep.mubr.bf16.mxu0 %v5734_v39 }
  0x9e   : > { %917 = vmatmul.mubr.bf16.gmra.mrb[44].mxu0 %v5736_v40 }
  0x9f   : > { %924 = vmatprep.mubr.bf16.mxu0 %v5737_v41 }
  0xa6   : > { %925 = vmatmul.mubr.bf16.gmra.mrb[48].mxu0 %v5739_v42 }
  0xa7   : > { %932 = vmatprep.mubr.bf16.mxu0 %v5740_v43 }
  0xae   : > { %933 = vmatmul.mubr.bf16.gmra.mrb[52].mxu0 %v5742_v46 }
  0xaf   : > { %940 = vmatprep.mubr.bf16.mxu0 %v5743_v48 }
  0xb6   : > { %941 = vmatmul.mubr.bf16.gmra.mrb[56].mxu0 %v5745_v49 }
  0xb7   : > { %948 = vmatprep.mubr.bf16.mxu0 %v5746_v50  ;;  %v5792_v50 = vld [vmem:[%s6008_s17 + $0x1d0] ss:$8 sps:$4 sm:$0xff]  }
  0xbe   : > { %949 = vmatmul.mubr.bf16.gmra.mrb[60].mxu0 %v5748_v51 }
  0xbf   : > { %956 = vmatprep.mubr.bf16.mxu0 %v5749_v52  ;;  %v5793_v52 = vld [vmem:[%s6008_s17 + $0x1e4] ss:$8 sps:$4 sm:$0xff]  }
  0xc6   : > { %957 = vmatmul.mubr.bf16.gmra.mrb[64].mxu0 %v5751_v53 }
  0xc7   : > { %964 = vmatprep.mubr.bf16.mxu0 %v5752_v54 }
  0xce   : > { %965 = vmatmul.mubr.bf16.gmra.mrb[68].mxu0 %v5754_v55 }
  0xcf   : > { %972 = vmatprep.mubr.bf16.mxu0 %v5755_v56 }
  0xd6   : > { %973 = vmatmul.mubr.bf16.gmra.mrb[72].mxu0 %v5757_v57 }
  0xd7   : > { %980 = vmatprep.mubr.bf16.mxu0 %v5758_v58  ;;  %v5801_v58 = vld [vmem:[%s7651_s2] sm:$0xff]  }
  0xde   : > { %981 = vmatmul.mubr.bf16.gmra.mrb[76].mxu0 %v5760_v59 }
  0xdf   : > { %988 = vmatprep.mubr.bf16.mxu0 %v5761_v60 }
  0xe6   : > { %989 = vmatmul.mubr.bf16.gmra.mrb[80].mxu0 %v5763_v61 }
  0xe7   : > { %996 = vmatprep.mubr.bf16.mxu0 %v5764_v62 }
  0xee   : > { %997 = vmatmul.mubr.bf16.gmra.mrb[84].mxu0 %v5766_v0 }
  0xef   : > { %1004 = vmatprep.mubr.bf16.mxu0 %v5767_v2 }
  0xf6   : > { %1005 = vmatmul.mubr.bf16.gmra.mrb[88].mxu0 %v5769_v4 }
  0xf7   : > { %1012 = vmatprep.mubr.bf16.mxu0 %v5770_v5 }
  0xfe   : > { %1013 = vmatmul.mubr.bf16.gmra.mrb[92].mxu0 %v5772_v6 }
  0xff   : > { %1020 = vmatprep.mubr.bf16.mxu0 %v5773_v7  ;;  %v5795_v7 = vld [vmem:[%s6008_s17 + $0x1e0] ss:$8 sps:$4 sm:$0xff]  }
 0x106   : > { %1021 = vmatmul.mubr.bf16.gmra.mrb[96].mxu0 %v5775_v8 }
 0x107   : > { %1028 = vmatprep.mubr.bf16.mxu0 %v5776_v9  ;;  %v5796_v9 = vld [vmem:[%s6008_s17 + $0x1f4] ss:$8 sps:$4 sm:$0xff]  }
 0x10e   : > { %1029 = vmatmul.mubr.bf16.gmra.mrb[100].mxu0 %v5778_v10 }
 0x10f   : > { %1036 = vmatprep.mubr.bf16.mxu0 %v5779_v11 }
 0x116   : > { %1037 = vmatmul.mubr.bf16.gmra.mrb[104].mxu0 %v5781_v12 }
 0x117   : > { %1044 = vmatprep.mubr.bf16.mxu0 %v5784_v13 }
 0x119   : > { %v830_v15 = vpop.f32.mrb[0].mxu0 }
 0x11a   : > { %v831_v16 = vadd.f32 %v830_v15, %v6133_v14  ;;  %v832_v17 = vpop.f32.mrb[1].mxu0  ;;  %v5802_v15 = vld [vmem:[%s7651_s2 + $0x8] sm:$0xff]  }
 0x11b   : > { %v833_v20 = vpop.f32.mrb[2].mxu0 }
 0x11c   : > { %v1085_v22 = vmax.f32 %v831_v16, 0.0  ;;  %v834_v23 = vadd.f32 %v833_v20, %v6133_v14  ;;  %v835_v24 = vpop.f32.mrb[3].mxu0 }
 0x11e   : > { %v1150_v25 = vmul.f32 %v6140_v19, %v1085_v22  ;;  %v1086_v26 = vmax.f32 %v834_v23, 0.0  ;;  %1045 = vmatmul.mubr.bf16.gmra.mrb[108].mxu0 %v5786_v18 }
 0x11f   : > { %1052 = vmatprep.mubr.bf16.mxu0 %v5787_v21 }
 0x120   : > { %v1151_v28 = vmul.f32 %v6140_v19, %v1086_v26  ;;  %v1215_v30 = vadd.f32 %v6148_v27, %v1150_v25 }
 0x121   : > { %v838_v29 = vpop.f32.mrb[4].mxu0 }
 0x122   : > { %v1216_v31 = vadd.f32 %v6148_v27, %v1151_v28  ;;  %v839_v32 = vadd.f32 %v838_v29, %v6133_v14  ;;  %v840_v33 = vpop.f32.mrb[5].mxu0  ;;  %v5798_v29 = vld [vmem:[%s6008_s17 + $0x1f0] ss:$8 sps:$4 sm:$0xff]  }
 0x123   : > { %v841_v35 = vpop.f32.mrb[6].mxu0 }
 0x124   : > { %v1279_v37 = vpack.c.bf16 %v1216_v31, %v1215_v30  ;;  %v1087_v38 = vmax.f32 %v839_v32, 0.0  ;;  %v842_v39 = vadd.f32 %v841_v35, %v6133_v14  ;;  %v843_v40 = vpop.f32.mrb[7].mxu0 }
 0x126   : > { %v1152_v41 = vmul.f32 %v6140_v19, %v1087_v38  ;;  %v1088_v42 = vmax.f32 %v842_v39, 0.0  ;;  %1053 = vmatmul.mubr.bf16.gmra.mrb[112].mxu0 %v5789_v34  ;;  %v1337_v57 = vrot.slane %v1279_v37, 4 }
 0x127   : > { %1060 = vmatprep.mubr.bf16.mxu0 %v5790_v36 }
 0x128   : > { %v1153_v43 = vmul.f32 %v6140_v19, %v1088_v42  ;;  %v1217_v46 = vadd.f32 %v6148_v27, %v1152_v41 }
 0x129   : > { %v846_v44 = vpop.f32.mrb[8].mxu0 }
 0x12a   : > { %v1218_v47 = vadd.f32 %v6148_v27, %v1153_v43  ;;  %v847_v48 = vadd.f32 %v846_v44, %v6133_v14  ;;  %v848_v49 = vpop.f32.mrb[9].mxu0 }
 0x12b   : > { %v849_v51 = vpop.f32.mrb[10].mxu0 }
 0x12c   : > { %v1280_v53 = vpack.c.bf16 %v1218_v47, %v1217_v46  ;;  %v1089_v54 = vmax.f32 %v847_v48, 0.0  ;;  %v850_v55 = vadd.f32 %v849_v51, %v6133_v14  ;;  %v851_v56 = vpop.f32.mrb[11].mxu0 }
 0x12e   : > { %v1312_v59 = vrot.slane %v1280_v53, 4  ;;  %v1154_v60 = vmul.f32 %v6140_v19, %v1089_v54  ;;  %v1090_v61 = vmax.f32 %v850_v55, 0.0  ;;  %v1348_v62 = vsel %vm1319_vm1, %v1337_v57, %v1280_v53  ;;  %1061 = vmatmul.mubr.bf16.gmra.mrb[116].mxu0 %v5792_v50 }
 0x12f   : > { %5187 = vmatmul.mubr.msk.bf16.vlgmr.msra.gmra.mrb[0].mxu1 %vm1375_vm2, %v1348_v62  ;;  %1068 = vmatprep.mubr.bf16.mxu0 %v5793_v52 }
 0x130   : > { %v1155_v63 = vmul.f32 %v6140_v19, %v1090_v61  ;;  %5190 = vmatprep.mubr.msk.bf16.mxu1 %vm5934_vm0, %v5933_v45  ;;  %5207 = vmatpush3.bf16.msra.mxu1 %v5801_v58  ;;  %v6175_v0 = vsel %vm1319_vm1, %v1279_v37, %v1312_v59  ;;  %v1219_v3 = vadd.f32 %v6148_v27, %v1154_v60 }
 0x131   : > { %v854_v2 = vpop.f32.mrb[12].mxu0  ;;  %5208 = vmatprep.subr.bf16.mxu1 %v5933_v45 }
 0x132   : > { %v1220_v4 = vadd.f32 %v6148_v27, %v1155_v63  ;;  %v855_v5 = vadd.f32 %v854_v2, %v6133_v14  ;;  %v856_v6 = vpop.f32.mrb[13].mxu0 }
 0x133   : > { %v857_v8 = vpop.f32.mrb[14].mxu0 }
 0x134   : > { %v6183_v10 = vpack.c.bf16 %v1220_v4, %v1219_v3  ;;  %v1091_v11 = vmax.f32 %v855_v5, 0.0  ;;  %v858_v12 = vadd.f32 %v857_v8, %v6133_v14  ;;  %v859_v13 = vpop.f32.mrb[15].mxu0  ;;  %5209 = vmatpush3.bf16.msra.mxu1 %v5802_v15 }
 0x135   : > { %5230 = vmatprep.subr.bf16.mxu1 %v5933_v45 }
 0x136   : > { %v1156_v16 = vmul.f32 %v6140_v19, %v1091_v11  ;;  %v1092_v17 = vmax.f32 %v858_v12, 0.0  ;;  %1069 = vmatmul.mubr.bf16.gmra.mrb[120].mxu0 %v5795_v7  ;;  %v1339_v18 = vrot.slane %v6183_v10, 4  ;;  %v6193_v20 = vsel %vm1319_vm1, %v1312_v59, %v6183_v10 }
 0x137   : > { %1076 = vmatprep.mubr.bf16.mxu0 %v5796_v9 }
 0x138   : > { %v1157_v21 = vmul.f32 %v6140_v19, %v1092_v17  ;;  %v6200_v22 = vsel %vm1319_vm1, %v1280_v53, %v1339_v18  ;;  %v1221_v24 = vadd.f32 %v6148_v27, %v1156_v16 }
 0x139   : > { %v862_v23 = vpop.f32.mrb[16].mxu0 }
 0x13a   : > { %v1222_v25 = vadd.f32 %v6148_v27, %v1157_v21  ;;  %v863_v26 = vadd.f32 %v862_v23, %v6133_v14  ;;  %v864_v28 = vpop.f32.mrb[17].mxu0 }
 0x13b   : > { %v865_v30 = vpop.f32.mrb[18].mxu0 }
 0x13c   : > { %v6206_v31 = vpack.c.bf16 %v1222_v25, %v1221_v24  ;;  %v1093_v32 = vmax.f32 %v863_v26, 0.0  ;;  %v866_v33 = vadd.f32 %v865_v30, %v6133_v14  ;;  %v867_v34 = vpop.f32.mrb[19].mxu0 }
 0x13e   : > { %v1158_v35 = vmul.f32 %v6140_v19, %v1093_v32  ;;  %v1094_v36 = vmax.f32 %v866_v33, 0.0  ;;  %1077 = vmatmul.mubr.bf16.gmra.mrb[124].mxu0 %v5798_v29 }
 0x13f   : > { %5378 = vmatprep.mubr.msk.bf16.mxu0 %vm5934_vm0, %v5933_v45 }
 0x140   : > { %v1159_v37 = vmul.f32 %v6140_v19, %v1094_v36  ;;  %v1223_v39 = vadd.f32 %v6148_v27, %v1158_v35 }
 0x141   : > { %v870_v38 = vpop.f32.mrb[20].mxu0 }
 0x142   : > { %v1224_v40 = vadd.f32 %v6148_v27, %v1159_v37  ;;  %v871_v41 = vadd.f32 %v870_v38, %v6133_v14  ;;  %v872_v42 = vpop.f32.mrb[21].mxu0 }
 0x143   : > { %v873_v43 = vpop.f32.mrb[22].mxu0 }
 0x144   : > { %v1283_v44 = vpack.c.bf16 %v1224_v40, %v1223_v39  ;;  %v1095_v46 = vmax.f32 %v871_v41, 0.0  ;;  %v874_v47 = vadd.f32 %v873_v43, %v6133_v14  ;;  %v875_v48 = vpop.f32.mrb[23].mxu0 }
 0x146   : > { %v1160_v49 = vmul.f32 %v6140_v19, %v1095_v46  ;;  %v1096_v50 = vmax.f32 %v874_v47, 0.0  ;;  %v1920_v58 = vrot.slane %v1283_v44, 4 }
 0x148   : > { %v1161_v51 = vmul.f32 %v6140_v19, %v1096_v50  ;;  %v1225_v53 = vadd.f32 %v6148_v27, %v1160_v49 }
 0x149   : > { %v878_v52 = vpop.f32.mrb[24].mxu0 }
 0x14a   : > { %v1226_v54 = vadd.f32 %v6148_v27, %v1161_v51  ;;  %v879_v55 = vadd.f32 %v878_v52, %v6133_v14  ;;  %v880_v56 = vpop.f32.mrb[25].mxu0 }
 0x14b   : > { %v881_v57 = vpop.f32.mrb[26].mxu0 }
 0x14c   : > { %v1284_v59 = vpack.c.bf16 %v1226_v54, %v1225_v53  ;;  %v1097_v60 = vmax.f32 %v879_v55, 0.0  ;;  %v882_v61 = vadd.f32 %v881_v57, %v6133_v14  ;;  %v883_v62 = vpop.f32.mrb[27].mxu0 }
 0x14e   : > { %v1791_v63 = vrot.slane %v1284_v59, 4  ;;  %v1162_v2 = vmul.f32 %v6140_v19, %v1097_v60  ;;  %v1098_v3 = vmax.f32 %v882_v61, 0.0  ;;  %v6225_v4 = vsel %vm1319_vm1, %v1920_v58, %v1284_v59 }
 0x150   : > { %v1163_v5 = vmul.f32 %v6140_v19, %v1098_v3  ;;  %v6229_v6 = vsel %vm1319_vm1, %v1283_v44, %v1791_v63  ;;  %v1227_v8 = vadd.f32 %v6148_v27, %v1162_v2 }
 0x151   : > { %v886_v7 = vpop.f32.mrb[28].mxu0 }
 0x152   : > { %v1228_v9 = vadd.f32 %v6148_v27, %v1163_v5  ;;  %v887_v11 = vadd.f32 %v886_v7, %v6133_v14  ;;  %v888_v12 = vpop.f32.mrb[29].mxu0 }
 0x153   : > { %v889_v13 = vpop.f32.mrb[30].mxu0 }
 0x154   : > { %v6234_v15 = vpack.c.bf16 %v1228_v9, %v1227_v8  ;;  %v1099_v16 = vmax.f32 %v887_v11, 0.0  ;;  %v890_v17 = vadd.f32 %v889_v13, %v6133_v14  ;;  %v891_v21 = vpop.f32.mrb[31].mxu0  ;;  %v1672_v11 = vrot.slane %v6206_v31, 4 }
 0x156   : > { %v1164_v23 = vmul.f32 %v6140_v19, %v1099_v16  ;;  %v1100_v24 = vmax.f32 %v890_v17, 0.0  ;;  %v1922_v25 = vrot.slane %v6234_v15, 4  ;;  %v6241_v26 = vsel %vm1319_vm1, %v1791_v63, %v6234_v15 }
 0x158   : > { %v1165_v28 = vmul.f32 %v6140_v19, %v1100_v24  ;;  %v6247_v29 = vsel %vm1319_vm1, %v1284_v59, %v1922_v25  ;;  %v1229_v32 = vadd.f32 %v6148_v27, %v1164_v23 }
 0x159   : > { %v894_v30 = vpop.f32.mrb[32].mxu0 }
 0x15a   : > { %v1230_v33 = vadd.f32 %v6148_v27, %v1165_v28  ;;  %v895_v34 = vadd.f32 %v894_v30, %v6133_v14  ;;  %v896_v35 = vpop.f32.mrb[33].mxu0 }
 0x15b   : > { %v897_v36 = vpop.f32.mrb[34].mxu0 }
 0x15c   : > { %v6252_v37 = vpack.c.bf16 %v1230_v33, %v1229_v32  ;;  %v1101_v38 = vmax.f32 %v895_v34, 0.0  ;;  %v898_v39 = vadd.f32 %v897_v36, %v6133_v14  ;;  %v899_v40 = vpop.f32.mrb[35].mxu0 }
 0x15e   : > { %v1166_v41 = vmul.f32 %v6140_v19, %v1101_v38  ;;  %v1102_v42 = vmax.f32 %v898_v39, 0.0 }
 0x160   : > { %v1167_v43 = vmul.f32 %v6140_v19, %v1102_v42  ;;  %v1231_v46 = vadd.f32 %v6148_v27, %v1166_v41 }
 0x161   : > { %v902_v44 = vpop.f32.mrb[36].mxu0 }
 0x162   : > { %v1232_v47 = vadd.f32 %v6148_v27, %v1167_v43  ;;  %v903_v48 = vadd.f32 %v902_v44, %v6133_v14  ;;  %v904_v49 = vpop.f32.mrb[37].mxu0 }
 0x163   : > { %v905_v50 = vpop.f32.mrb[38].mxu0 }
 0x164   : > { %v1287_v51 = vpack.c.bf16 %v1232_v47, %v1231_v46  ;;  %v1103_v52 = vmax.f32 %v903_v48, 0.0  ;;  %v906_v53 = vadd.f32 %v905_v50, %v6133_v14  ;;  %v907_v54 = vpop.f32.mrb[39].mxu0  ;;  %v5806_v47 = vld [vmem:[%s7651_s2 + $0xa0] sm:$0xff]  }
 0x166   : > { %v1168_v55 = vmul.f32 %v6140_v19, %v1103_v52  ;;  %v1104_v56 = vmax.f32 %v906_v53, 0.0  ;;  %v1351_v57 = vsel %vm1319_vm1, %v1339_v18, %v1287_v51  ;;  %v1314_v58 = vrot.slane %v1287_v51, 4  ;;  %v5808_v53 = vld [vmem:[%s7651_s2 + $0xa8] sm:$0xff]  }
 0x167   : > { %5191 = vmatmul.mubr.msk.bf16.gmra.mrb[4].mxu1 %vm1375_vm2, %v1351_v57 }
 0x168   : > { %v1169_v59 = vmul.f32 %v6140_v19, %v1104_v56  ;;  %5194 = vmatprep.mubr.msk.bf16.mxu1 %vm5934_vm0, %v5933_v45  ;;  %v6271_v60 = vsel %vm1319_vm1, %v6183_v10, %v1314_v58  ;;  %v1233_v62 = vadd.f32 %v6148_v27, %v1168_v55 }
 0x169   : > { %v910_v61 = vpop.f32.mrb[40].mxu0 }
 0x16a   : > { %v1234_v63 = vadd.f32 %v6148_v27, %v1169_v59  ;;  %v911_v2 = vadd.f32 %v910_v61, %v6133_v14  ;;  %v912_v18 = vpop.f32.mrb[41].mxu0 }
 0x16b   : > { %v913_v3 = vpop.f32.mrb[42].mxu0 }
 0x16c   : > { %v1288_v5 = vpack.c.bf16 %v1234_v63, %v1233_v62  ;;  %v1105_v7 = vmax.f32 %v911_v2, 0.0  ;;  %v914_v8 = vadd.f32 %v913_v3, %v6133_v14  ;;  %v915_v9 = vpop.f32.mrb[43].mxu0 }
 0x16e   : > { %v1170_v12 = vmul.f32 %v6140_v19, %v1105_v7  ;;  %v1106_v10 = vmax.f32 %v914_v8, 0.0  ;;  %v1341_v13 = vrot.slane %v1288_v5, 4  ;;  %v6280_v16 = vsel %vm1319_vm1, %v1672_v11, %v1288_v5 }
 0x16f   : > { %v6283_v17 = vsel %vm1319_vm1, %v1314_v58, %v1288_v5 }
 0x170   : > { %v1171_v21 = vmul.f32 %v6140_v19, %v1106_v10  ;;  %v2288_v23 = vsel %vm1319_vm1, %v1287_v51, %v1341_v13  ;;  %v6289_v24 = vsel %vm1319_vm1, %v6206_v31, %v1341_v13  ;;  %v1235_v30 = vadd.f32 %v6148_v27, %v1170_v12 }
 0x171   : > { %v918_v28 = vpop.f32.mrb[44].mxu0  ;;  %5379 = vmatmul.mubr.msk.bf16.vlgmr.msra.gmra.mrb[128].mxu0 %vm1375_vm2, %v2288_v23 }
 0x172   : > { %v1236_v32 = vadd.f32 %v6148_v27, %v1171_v21  ;;  %v919_v33 = vadd.f32 %v918_v28, %v6133_v14  ;;  %v920_v34 = vpop.f32.mrb[45].mxu0  ;;  %5382 = vmatprep.mubr.msk.bf16.mxu0 %vm5934_vm0, %v5933_v45  ;;  %5423 = vmatpush3.bf16.msra.mxu0 %v5806_v47 }
 0x173   : > { %v921_v35 = vpop.f32.mrb[46].mxu0  ;;  %5424 = vmatprep.subr.bf16.mxu0 %v5933_v45 }
 0x174   : > { %v6297_v36 = vpack.c.bf16 %v1236_v32, %v1235_v30  ;;  %v1107_v38 = vmax.f32 %v919_v33, 0.0  ;;  %v922_v31 = vadd.f32 %v921_v35, %v6133_v14  ;;  %v923_v39 = vpop.f32.mrb[47].mxu0 }
 0x176   : > { %v1172_v40 = vmul.f32 %v6140_v19, %v1107_v38  ;;  %v1108_v41 = vmax.f32 %v922_v31, 0.0  ;;  %v6303_v42 = vsel %vm1319_vm1, %v1341_v13, %v6297_v36  ;;  %v6306_v43 = vrot.slane %v6297_v36, 4  ;;  %5425 = vmatpush3.bf16.msra.mxu0 %v5808_v53 }
 0x177   : > { %5195 = vmatmul.mubr.msk.bf16.gmra.mrb[8].mxu1 %vm1375_vm2, %v6303_v42  ;;  %5470 = vmatprep.subr.bf16.mxu0 %v5933_v45 }
 0x178   : > { %v1173_v44 = vmul.f32 %v6140_v19, %v1108_v41  ;;  %5198 = vmatprep.mubr.msk.bf16.mxu1 %vm5934_vm0, %v5933_v45  ;;  %v6315_v46 = vsel %vm1319_vm1, %v1288_v5, %v6306_v43  ;;  %v1237_v49 = vadd.f32 %v6148_v27, %v1172_v40 }
 0x179   : > { %v926_v48 = vpop.f32.mrb[48].mxu0 }
 0x17a   : > { %v1238_v50 = vadd.f32 %v6148_v27, %v1173_v44  ;;  %v927_v51 = vadd.f32 %v926_v48, %v6133_v14  ;;  %v928_v52 = vpop.f32.mrb[49].mxu0 }
 0x17b   : > { %v929_v54 = vpop.f32.mrb[50].mxu0 }
 0x17c   : > { %v6327_v55 = vpack.c.bf16 %v1238_v50, %v1237_v49  ;;  %v1109_v56 = vmax.f32 %v927_v51, 0.0  ;;  %v930_v57 = vadd.f32 %v929_v54, %v6133_v14  ;;  %v931_v58 = vpop.f32.mrb[51].mxu0  ;;  %v2168_v49 = vrot.slane %v6252_v37, 4 }
 0x17e   : > { %v1174_v59 = vmul.f32 %v6140_v19, %v1109_v56  ;;  %v1110_v61 = vmax.f32 %v930_v57, 0.0  ;;  %v1555_v62 = vrot.slane %v6327_v55, 4  ;;  %v6335_v63 = vsel %vm1319_vm1, %v6306_v43, %v6327_v55 }
 0x180   : > { %v1175_v2 = vmul.f32 %v6140_v19, %v1110_v61  ;;  %v6343_v18 = vsel %vm1319_vm1, %v6297_v36, %v1555_v62  ;;  %v1239_v5 = vadd.f32 %v6148_v27, %v1174_v59 }
 0x181   : > { %v934_v3 = vpop.f32.mrb[52].mxu0 }
 0x182   : > { %v1240_v7 = vadd.f32 %v6148_v27, %v1175_v2  ;;  %v935_v8 = vadd.f32 %v934_v3, %v6133_v14  ;;  %v936_v9 = vpop.f32.mrb[53].mxu0 }
 0x183   : > { %v937_v11 = vpop.f32.mrb[54].mxu0 }
 0x184   : > { %v1291_v12 = vpack.c.bf16 %v1240_v7, %v1239_v5  ;;  %v1111_v10 = vmax.f32 %v935_v8, 0.0  ;;  %v938_v13 = vadd.f32 %v937_v11, %v6133_v14  ;;  %v939_v21 = vpop.f32.mrb[55].mxu0 }
 0x186   : > { %v1176_v23 = vmul.f32 %v6140_v19, %v1111_v10  ;;  %v1112_v28 = vmax.f32 %v938_v13, 0.0  ;;  %v1793_v30 = vrot.slane %v1291_v12, 4  ;;  %v6353_v32 = vsel %vm1319_vm1, %v1922_v25, %v1291_v12 }
 0x188   : > { %v1177_v33 = vmul.f32 %v6140_v19, %v1112_v28  ;;  %v6358_v34 = vsel %vm1319_vm1, %v6234_v15, %v1793_v30  ;;  %v1241_v38 = vadd.f32 %v6148_v27, %v1176_v23 }
 0x189   : > { %v942_v35 = vpop.f32.mrb[56].mxu0 }
 0x18a   : > { %v1242_v31 = vadd.f32 %v6148_v27, %v1177_v33  ;;  %v943_v39 = vadd.f32 %v942_v35, %v6133_v14  ;;  %v944_v40 = vpop.f32.mrb[57].mxu0 }
 0x18b   : > { %v945_v41 = vpop.f32.mrb[58].mxu0 }
 0x18c   : > { %v1292_v44 = vpack.c.bf16 %v1242_v31, %v1241_v38  ;;  %v1113_v47 = vmax.f32 %v943_v39, 0.0  ;;  %v946_v25 = vadd.f32 %v945_v41, %v6133_v14  ;;  %v947_v48 = vpop.f32.mrb[59].mxu0 }
 0x18e   : > { %v1178_v50 = vmul.f32 %v6140_v19, %v1113_v47  ;;  %v1114_v15 = vmax.f32 %v946_v25, 0.0  ;;  %v1924_v51 = vrot.slane %v1292_v44, 4  ;;  %v6367_v52 = vsel %vm1319_vm1, %v2168_v49, %v1292_v44 }
 0x18f   : > { %v6370_v53 = vsel %vm1319_vm1, %v1793_v30, %v1292_v44 }
 0x190   : > { %v1179_v54 = vmul.f32 %v6140_v19, %v1114_v15  ;;  %v6374_v56 = vsel %vm1319_vm1, %v1291_v12, %v1924_v51  ;;  %v6378_v57 = vsel %vm1319_vm1, %v6252_v37, %v1924_v51  ;;  %v1243_v59 = vadd.f32 %v6148_v27, %v1178_v50 }
 0x191   : > { %v950_v58 = vpop.f32.mrb[60].mxu0 }
 0x192   : > { %v1244_v61 = vadd.f32 %v6148_v27, %v1179_v54  ;;  %v951_v2 = vadd.f32 %v950_v58, %v6133_v14  ;;  %v952_v3 = vpop.f32.mrb[61].mxu0 }
 0x193   : > { %v953_v5 = vpop.f32.mrb[62].mxu0 }
 0x194   : > { %v6383_v7 = vpack.c.bf16 %v1244_v61, %v1243_v59  ;;  %v1115_v8 = vmax.f32 %v951_v2, 0.0  ;;  %v954_v9 = vadd.f32 %v953_v5, %v6133_v14  ;;  %v955_v11 = vpop.f32.mrb[63].mxu0 }
 0x196   : > { %v1180_v12 = vmul.f32 %v6140_v19, %v1115_v8  ;;  %v1116_v10 = vmax.f32 %v954_v9, 0.0  ;;  %v6388_v37 = vrot.slane %v6383_v7, 4  ;;  %v6392_v13 = vsel %vm1319_vm1, %v1924_v51, %v6383_v7 }
 0x198   : > { %v1181_v21 = vmul.f32 %v6140_v19, %v1116_v10  ;;  %v6397_v23 = vsel %vm1319_vm1, %v1292_v44, %v6388_v37  ;;  %v1245_v30 = vadd.f32 %v6148_v27, %v1180_v12 }
 0x199   : > { %v958_v28 = vpop.f32.mrb[64].mxu0 }
 0x19a   : > { %v1246_v33 = vadd.f32 %v6148_v27, %v1181_v21  ;;  %v959_v35 = vadd.f32 %v958_v28, %v6133_v14  ;;  %v960_v38 = vpop.f32.mrb[65].mxu0 }
 0x19b   : > { %v961_v31 = vpop.f32.mrb[66].mxu0 }
 0x19c   : > { %v6402_v39 = vpack.c.bf16 %v1246_v33, %v1245_v30  ;;  %v1117_v40 = vmax.f32 %v959_v35, 0.0  ;;  %v962_v41 = vadd.f32 %v961_v31, %v6133_v14  ;;  %v963_v47 = vpop.f32.mrb[67].mxu0 }
 0x19e   : > { %v1182_v25 = vmul.f32 %v6140_v19, %v1117_v40  ;;  %v1118_v48 = vmax.f32 %v962_v41, 0.0  ;;  %v2051_v44 = vrot.slane %v6402_v39, 4  ;;  %v6410_v49 = vsel %vm1319_vm1, %v6388_v37, %v6402_v39 }
 0x1a0   : > { %v1183_v50 = vmul.f32 %v6140_v19, %v1118_v48  ;;  %v6417_v15 = vsel %vm1319_vm1, %v6383_v7, %v2051_v44  ;;  %v1247_v54 = vadd.f32 %v6148_v27, %v1182_v25 }
 0x1a1   : > { %v966_v51 = vpop.f32.mrb[68].mxu0 }
 0x1a2   : > { %v1248_v58 = vadd.f32 %v6148_v27, %v1183_v50  ;;  %v967_v59 = vadd.f32 %v966_v51, %v6133_v14  ;;  %v968_v61 = vpop.f32.mrb[69].mxu0 }
 0x1a3   : > { %v969_v2 = vpop.f32.mrb[70].mxu0 }
 0x1a4   : > { %v1295_v3 = vpack.c.bf16 %v1248_v58, %v1247_v54  ;;  %v1119_v5 = vmax.f32 %v967_v59, 0.0  ;;  %v970_v8 = vadd.f32 %v969_v2, %v6133_v14  ;;  %v971_v9 = vpop.f32.mrb[71].mxu0 }
 0x1a6   : > { %v1184_v11 = vmul.f32 %v6140_v19, %v1119_v5  ;;  %v1120_v12 = vmax.f32 %v970_v8, 0.0  ;;  %v1343_v10 = vrot.slane %v1295_v3, 4  ;;  %v6426_v21 = vsel %vm1319_vm1, %v6306_v43, %v1295_v3 }
 0x1a8   : > { %v1185_v28 = vmul.f32 %v6140_v19, %v1120_v12  ;;  %v2289_v30 = vsel %vm1319_vm1, %v6297_v36, %v1343_v10  ;;  %v1249_v35 = vadd.f32 %v6148_v27, %v1184_v11 }
 0x1a9   : > { %v974_v33 = vpop.f32.mrb[72].mxu0  ;;  %5383 = vmatmul.mubr.msk.bf16.gmra.mrb[132].mxu0 %vm1375_vm2, %v2289_v30 }
 0x1aa   : > { %v1250_v38 = vadd.f32 %v6148_v27, %v1185_v28  ;;  %v975_v31 = vadd.f32 %v974_v33, %v6133_v14  ;;  %v976_v40 = vpop.f32.mrb[73].mxu0  ;;  %5386 = vmatprep.mubr.msk.bf16.mxu0 %vm5934_vm0, %v5933_v45 }
 0x1ab   : > { %v977_v43 = vpop.f32.mrb[74].mxu0 }
 0x1ac   : > { %v1296_v41 = vpack.c.bf16 %v1250_v38, %v1249_v35  ;;  %v1121_v47 = vmax.f32 %v975_v31, 0.0  ;;  %v978_v25 = vadd.f32 %v977_v43, %v6133_v14  ;;  %v979_v48 = vpop.f32.mrb[75].mxu0 }
 0x1ae   : > { %v1186_v36 = vmul.f32 %v6140_v19, %v1121_v47  ;;  %v1122_v50 = vmax.f32 %v978_v25, 0.0  ;;  %v1357_v51 = vsel %vm1319_vm1, %v1343_v10, %v1296_v41  ;;  %v1318_v54 = vrot.slane %v1296_v41, 4 }
 0x1af   : > { %5199 = vmatmul.mubr.msk.bf16.gmra.mrb[12].mxu1 %vm1375_vm2, %v1357_v51  ;;  %v6444_v58 = vsel %vm1319_vm1, %v1555_v62, %v1296_v41 }
 0x1b0   : > { %v1187_v59 = vmul.f32 %v6140_v19, %v1122_v50  ;;  %5202 = vmatprep.mubr.msk.bf16.mxu1 %vm5934_vm0, %v5933_v45  ;;  %v6450_v61 = vsel %vm1319_vm1, %v1295_v3, %v1318_v54  ;;  %v6454_v2 = vsel %vm1319_vm1, %v6327_v55, %v1318_v54  ;;  %v1251_v8 = vadd.f32 %v6148_v27, %v1186_v36 }
 0x1b1   : > { %v982_v5 = vpop.f32.mrb[76].mxu0 }
 0x1b2   : > { %v1252_v9 = vadd.f32 %v6148_v27, %v1187_v59  ;;  %v983_v62 = vadd.f32 %v982_v5, %v6133_v14  ;;  %v984_v11 = vpop.f32.mrb[77].mxu0  ;;  %v5803_v5 = vld [vmem:[%s7651_s2 + $0x20] sm:$0xff]  }
 0x1b3   : > { %v985_v12 = vpop.f32.mrb[78].mxu0 }
 0x1b4   : > { %v6459_v10 = vpack.c.bf16 %v1252_v9, %v1251_v8  ;;  %v1123_v28 = vmax.f32 %v983_v62, 0.0  ;;  %v986_v30 = vadd.f32 %v985_v12, %v6133_v14  ;;  %v987_v3 = vpop.f32.mrb[79].mxu0 }
 0x1b6   : > { %v1188_v33 = vmul.f32 %v6140_v19, %v1123_v28  ;;  %v1124_v35 = vmax.f32 %v986_v30, 0.0  ;;  %v6464_v55 = vrot.slane %v6459_v10, 4  ;;  %v6468_v38 = vsel %vm1319_vm1, %v1318_v54, %v6459_v10  ;;  %v5804_v28 = vld [vmem:[%s7651_s2 + $0x28] sm:$0xff]  }
 0x1b8   : > { %v1253_v31 = vadd.f32 %v6148_v27, %v1188_v33  ;;  %v1189_v40 = vmul.f32 %v6140_v19, %v1124_v35  ;;  %5203 = vmatmul.mubr.msk.bf16.gmra.mrb[16].mxu1 %vm1375_vm2, %v6464_v55  ;;  %v6476_v43 = vsel %vm1319_vm1, %v1296_v41, %v6464_v55 }
 0x1b9   : > { %v990_v47 = vpop.f32.mrb[80].mxu0  ;;  %5387 = vmatmul.mubr.msk.bf16.gmra.mrb[136].mxu0 %vm1375_vm2, %v6476_v43  ;;  %5210 = vmatprep.mubr.msk.bf16.mxu1 %vm5934_vm0, %v5933_v45 }
 0x1ba   : > { %v1254_v25 = vadd.f32 %v6148_v27, %v1189_v40  ;;  %v991_v48 = vadd.f32 %v990_v47, %v6133_v14  ;;  %v992_v36 = vpop.f32.mrb[81].mxu0  ;;  %5390 = vmatprep.mubr.msk.bf16.mxu0 %vm5934_vm0, %v5933_v45 }
 0x1bb   : > { %v993_v50 = vpop.f32.mrb[82].mxu0 }
 0x1bc   : > { %v6486_v51 = vpack.c.bf16 %v1254_v25, %v1253_v31  ;;  %v1125_v41 = vmax.f32 %v991_v48, 0.0  ;;  %v994_v54 = vadd.f32 %v993_v50, %v6133_v14  ;;  %v995_v59 = vpop.f32.mrb[83].mxu0 }
 0x1be   : > { %v1190_v8 = vmul.f32 %v6140_v19, %v1125_v41  ;;  %v1126_v9 = vmax.f32 %v994_v54, 0.0 }
 0x1c0   : > { %v1255_v62 = vadd.f32 %v6148_v27, %v1190_v8  ;;  %v1191_v11 = vmul.f32 %v6140_v19, %v1126_v9  ;;  %5211 = vmatmul.mubr.msk.bf16.vlgmr.msra.gmra.mrb[20].mxu1 %vm1375_vm2, %v6175_v0 }
 0x1c1   : > { %5231 = vmatpush3.bf16.msra.mxu1 %v5803_v5  ;;  %v998_v12 = vpop.f32.mrb[84].mxu0  ;;  %5214 = vmatprep.mubr.msk.bf16.mxu1 %vm5934_vm0, %v5933_v45 }
 0x1c2   : > { %v1256_v30 = vadd.f32 %v6148_v27, %v1191_v11  ;;  %v999_v3 = vadd.f32 %v998_v12, %v6133_v14  ;;  %v1000_v33 = vpop.f32.mrb[85].mxu0  ;;  %5232 = vmatprep.subr.bf16.mxu1 %v5933_v45 }
 0x1c3   : > { %v1001_v35 = vpop.f32.mrb[86].mxu0 }
 0x1c4   : > { %v1299_v31 = vpack.c.bf16 %v1256_v30, %v1255_v62  ;;  %v1127_v40 = vmax.f32 %v999_v3, 0.0  ;;  %v1002_v0 = vadd.f32 %v1001_v35, %v6133_v14  ;;  %v1003_v47 = vpop.f32.mrb[87].mxu0 }
 0x1c5   : > { %5233 = vmatpush3.bf16.msra.mxu1 %v5804_v28 }
 0x1c6   : > { %v1192_v25 = vmul.f32 %v6140_v19, %v1127_v40  ;;  %v1128_v48 = vmax.f32 %v1002_v0, 0.0  ;;  %5254 = vmatprep.subr.bf16.mxu1 %v5933_v45  ;;  %v1926_v36 = vrot.slane %v1299_v31, 4  ;;  %v6510_v50 = vsel %vm1319_vm1, %v6388_v37, %v1299_v31 }
 0x1c8   : > { %v1257_v41 = vadd.f32 %v6148_v27, %v1192_v25  ;;  %v1193_v54 = vmul.f32 %v6140_v19, %v1128_v48  ;;  %5215 = vmatmul.mubr.msk.bf16.gmra.mrb[24].mxu1 %vm1375_vm2, %v6271_v60  ;;  %v6518_v59 = vsel %vm1319_vm1, %v6383_v7, %v1926_v36 }
 0x1c9   : > { %5218 = vmatprep.mubr.msk.bf16.mxu1 %vm5934_vm0, %v5933_v45  ;;  %v1006_v5 = vpop.f32.mrb[88].mxu0 }
 0x1ca   : > { %v1258_v8 = vadd.f32 %v6148_v27, %v1193_v54  ;;  %v1007_v37 = vadd.f32 %v1006_v5, %v6133_v14  ;;  %v1008_v9 = vpop.f32.mrb[89].mxu0 }
 0x1cb   : > { %v1009_v62 = vpop.f32.mrb[90].mxu0 }
 0x1cc   : > { %v6524_v11 = vpack.c.bf16 %v1258_v8, %v1257_v41  ;;  %v1129_v12 = vmax.f32 %v1007_v37, 0.0  ;;  %v1010_v28 = vadd.f32 %v1009_v62, %v6133_v14  ;;  %v1011_v60 = vpop.f32.mrb[91].mxu0 }
 0x1ce   : > { %v1194_v30 = vmul.f32 %v6140_v19, %v1129_v12  ;;  %v1130_v7 = vmax.f32 %v1010_v28, 0.0  ;;  %v6529_v3 = vrot.slane %v6524_v11, 4  ;;  %v6533_v33 = vsel %vm1319_vm1, %v1926_v36, %v6524_v11 }
 0x1cf   : > { %v6539_v35 = vsel %vm1319_vm1, %v2051_v44, %v6524_v11 }
 0x1d0   : > { %5219 = vmatmul.mubr.msk.bf16.gmra.mrb[28].mxu1 %vm1375_vm2, %v6315_v46  ;;  %v1259_v40 = vadd.f32 %v6148_v27, %v1194_v30  ;;  %v1195_v0 = vmul.f32 %v6140_v19, %v1130_v7  ;;  %v6547_v47 = vsel %vm1319_vm1, %v1299_v31, %v6529_v3  ;;  %v6552_v25 = vsel %vm1319_vm1, %v6402_v39, %v6529_v3 }
 0x1d1   : > { %5222 = vmatprep.mubr.msk.bf16.mxu1 %vm5934_vm0, %v5933_v45  ;;  %v1014_v44 = vpop.f32.mrb[92].mxu0 }
 0x1d2   : > { %v1260_v48 = vadd.f32 %v6148_v27, %v1195_v0  ;;  %v1015_v36 = vadd.f32 %v1014_v44, %v6133_v14  ;;  %v1016_v41 = vpop.f32.mrb[93].mxu0 }
 0x1d3   : > { %v1017_v54 = vpop.f32.mrb[94].mxu0 }
 0x1d4   : > { %v6558_v5 = vpack.c.bf16 %v1260_v48, %v1259_v40  ;;  %v1131_v8 = vmax.f32 %v1015_v36, 0.0  ;;  %v1018_v31 = vadd.f32 %v1017_v54, %v6133_v14  ;;  %v1019_v37 = vpop.f32.mrb[95].mxu0 }
 0x1d6   : > { %v1196_v9 = vmul.f32 %v6140_v19, %v1131_v8  ;;  %v1132_v39 = vmax.f32 %v1018_v31, 0.0 }
 0x1d8   : > { %5223 = vmatmul.mubr.msk.bf16.gmra.mrb[32].mxu1 %vm1375_vm2, %v6450_v61  ;;  %v1261_v62 = vadd.f32 %v6148_v27, %v1196_v9  ;;  %v1197_v12 = vmul.f32 %v6140_v19, %v1132_v39 }
 0x1d9   : > { %v1022_v28 = vpop.f32.mrb[96].mxu0  ;;  %5226 = vmatprep.mubr.msk.bf16.mxu1 %vm5934_vm0, %v5933_v45 }
 0x1da   : > { %v1262_v60 = vadd.f32 %v6148_v27, %v1197_v12  ;;  %v1023_v30 = vadd.f32 %v1022_v28, %v6133_v14  ;;  %v1024_v7 = vpop.f32.mrb[97].mxu0 }
 0x1db   : > { %v1025_v40 = vpop.f32.mrb[98].mxu0  ;;  %v5805_v7 = vld [vmem:[%s7651_s2 + $0x30] sm:$0xff]  }
 0x1dc   : > { %v6570_v0 = vpack.c.bf16 %v1262_v60, %v1261_v62  ;;  %v1133_v44 = vmax.f32 %v1023_v30, 0.0  ;;  %v1026_v48 = vadd.f32 %v1025_v40, %v6133_v14  ;;  %v1027_v61 = vpop.f32.mrb[99].mxu0 }
 0x1de   : > { %v1198_v36 = vmul.f32 %v6140_v19, %v1133_v44  ;;  %v1134_v41 = vmax.f32 %v1026_v48, 0.0 }
 0x1e0   : > { %v1263_v54 = vadd.f32 %v6148_v27, %v1198_v36  ;;  %v1199_v8 = vmul.f32 %v6140_v19, %v1134_v41  ;;  %5227 = vmatmul.mubr.msk.bf16.gmra.mrb[36].mxu1 %vm1375_vm2, %v6459_v10  ;;  %v5807_v41 = vld [vmem:[%s7651_s2 + $0x38] sm:$0xff]  }
 0x1e1   : > { %v1030_v31 = vpop.f32.mrb[100].mxu0  ;;  %5234 = vmatprep.mubr.msk.bf16.mxu1 %vm5934_vm0, %v5933_v45 }
 0x1e2   : > { %v1264_v37 = vadd.f32 %v6148_v27, %v1199_v8  ;;  %v1031_v9 = vadd.f32 %v1030_v31, %v6133_v14  ;;  %v1032_v39 = vpop.f32.mrb[101].mxu0 }
 0x1e3   : > { %v1033_v62 = vpop.f32.mrb[102].mxu0 }
 0x1e4   : > { %v6582_v12 = vpack.c.bf16 %v1264_v37, %v1263_v54  ;;  %v1135_v28 = vmax.f32 %v1031_v9, 0.0  ;;  %v1034_v60 = vadd.f32 %v1033_v62, %v6133_v14  ;;  %v1035_v30 = vpop.f32.mrb[103].mxu0 }
 0x1e6   : > { %v1200_v40 = vmul.f32 %v6140_v19, %v1135_v28  ;;  %v1136_v44 = vmax.f32 %v1034_v60, 0.0 }
 0x1e8   : > { %v1265_v48 = vadd.f32 %v6148_v27, %v1200_v40  ;;  %v1201_v61 = vmul.f32 %v6140_v19, %v1136_v44  ;;  %5235 = vmatmul.mubr.msk.bf16.vlgmr.msra.gmra.mrb[40].mxu1 %vm1375_vm2, %v6200_v22 }
 0x1e9   : > { %5255 = vmatpush3.bf16.msra.mxu1 %v5805_v7  ;;  %v1038_v36 = vpop.f32.mrb[104].mxu0  ;;  %5238 = vmatprep.mubr.msk.bf16.mxu1 %vm5934_vm0, %v5933_v45 }
 0x1ea   : > { %v1266_v54 = vadd.f32 %v6148_v27, %v1201_v61  ;;  %v1039_v8 = vadd.f32 %v1038_v36, %v6133_v14  ;;  %v1040_v31 = vpop.f32.mrb[105].mxu0  ;;  %5256 = vmatprep.subr.bf16.mxu1 %v5933_v45 }
 0x1eb   : > { %v1041_v37 = vpop.f32.mrb[106].mxu0 }
 0x1ec   : > { %v6601_v9 = vpack.c.bf16 %v1266_v54, %v1265_v48  ;;  %v1137_v22 = vmax.f32 %v1039_v8, 0.0  ;;  %v1042_v39 = vadd.f32 %v1041_v37, %v6133_v14  ;;  %v1043_v62 = vpop.f32.mrb[107].mxu0 }
 0x1ed   : > { %5257 = vmatpush3.bf16.msra.mxu1 %v5807_v41 }
 0x1ee   : > { %v1202_v28 = vmul.f32 %v6140_v19, %v1137_v22  ;;  %v1138_v60 = vmax.f32 %v1042_v39, 0.0  ;;  %v2287_v30 = vrot.slane %v6601_v9, 4  ;;  %5278 = vmatprep.subr.bf16.mxu1 %v5933_v45 }
 0x1f0   : > { %v1267_v7 = vadd.f32 %v6148_v27, %v1202_v28  ;;  %v1203_v40 = vmul.f32 %v6140_v19, %v1138_v60  ;;  %5239 = vmatmul.mubr.msk.bf16.gmra.mrb[44].mxu1 %vm1375_vm2, %v6289_v24  ;;  %v2292_v44 = vsel %vm1319_vm1, %v6582_v12, %v2287_v30 }
 0x1f1   : > { %5391 = vmatmul.mubr.msk.bf16.gmra.mrb[140].mxu0 %vm1375_vm2, %v2292_v44  ;;  %5242 = vmatprep.mubr.msk.bf16.mxu1 %vm5934_vm0, %v5933_v45  ;;  %v1046_v48 = vpop.f32.mrb[108].mxu0 }
 0x1f2   : > { %v1268_v61 = vadd.f32 %v6148_v27, %v1203_v40  ;;  %5394 = vmatprep.mubr.msk.bf16.mxu0 %vm5934_vm0, %v5933_v45  ;;  %v1047_v36 = vadd.f32 %v1046_v48, %v6133_v14  ;;  %v1048_v41 = vpop.f32.mrb[109].mxu0 }
 0x1f3   : > { %v1049_v24 = vpop.f32.mrb[110].mxu0  ;;  %v5810_v41 = vld [vmem:[%s7651_s2 + $0xc0] sm:$0xff]  }
 0x1f4   : > { %v6622_v54 = vpack.c.bf16 %v1268_v61, %v1267_v7  ;;  %v1139_v8 = vmax.f32 %v1047_v36, 0.0  ;;  %v1050_v31 = vadd.f32 %v1049_v24, %v6133_v14  ;;  %v1051_v37 = vpop.f32.mrb[111].mxu0  ;;  %v6652_v24 = vld [vmem:[%s7655_s6 + $0x1] ss:$0 sm:$0xff] }
 0x1f6   : > { %v1204_v22 = vmul.f32 %v6140_v19, %v1139_v8  ;;  %v1140_v39 = vmax.f32 %v1050_v31, 0.0 }
 0x1f8   : > { %5243 = vmatmul.mubr.msk.bf16.gmra.mrb[48].mxu1 %vm1375_vm2, %v6343_v18  ;;  %v1269_v62 = vadd.f32 %v6148_v27, %v1204_v22  ;;  %v1205_v28 = vmul.f32 %v6140_v19, %v1140_v39  ;;  %v6640_v18 = vld [vmem:[%s7655_s6] ss:$0 sm:$0xff] }
 0x1f9   : > { %5395 = vmatmul.mubr.msk.bf16.gmra.mrb[144].mxu0 %vm1375_vm2, %v6622_v54  ;;  %5246 = vmatprep.mubr.msk.bf16.mxu1 %vm5934_vm0, %v5933_v45  ;;  %v1054_v60 = vpop.f32.mrb[112].mxu0 }
 0x1fa   : > { %5426 = vmatprep.mubr.msk.bf16.mxu0 %vm5934_vm0, %v5933_v45  ;;  %v1270_v14 = vadd.f32 %v6148_v27, %v1205_v28  ;;  %v1055_v7 = vadd.f32 %v6640_v18, %v1054_v60  ;;  %v1056_v19 = vpop.f32.mrb[113].mxu0 }
 0x1fb   : > { %v1057_v40 = vpop.f32.mrb[114].mxu0 }
 0x1fc   : > { %v6643_v44 = vpack.c.bf16 %v1270_v14, %v1269_v62  ;;  %v1141_v48 = vmax.f32 %v1055_v7, 0.0  ;;  %v1058_v61 = vadd.f32 %v6640_v18, %v1057_v40  ;;  %v1059_v36 = vpop.f32.mrb[115].mxu0 }
 0x1fe   : > { %v1206_v8 = vmul.f32 %v6652_v24, %v1141_v48  ;;  %v1142_v31 = vmax.f32 %v1058_v61, 0.0 }
 0x200   : > { %5247 = vmatmul.mubr.msk.bf16.gmra.mrb[52].mxu1 %vm1375_vm2, %v6476_v43  ;;  %v1271_v37 = vadd.f32 %v6148_v27, %v1206_v8  ;;  %v1207_v22 = vmul.f32 %v6652_v24, %v1142_v31  ;;  %v5812_v43 = vld [vmem:[%s7651_s2 + $0xc8] sm:$0xff]   ;;  %v6673_v27 = vld [vmem:[%s7655_s6 + $0x2] ss:$0 sm:$0xff] }
 0x201   : > { %5427 = vmatmul.mubr.msk.bf16.vlgmr.msra.gmra.mrb[148].mxu0 %vm1375_vm2, %v6315_v46  ;;  %5250 = vmatprep.mubr.msk.bf16.mxu1 %vm5934_vm0, %v5933_v45  ;;  %v1062_v39 = vpop.f32.mrb[116].mxu0 }
 0x202   : > { %v6663_v62 = vpop.f32.mrb[0].mxu1  ;;  %5430 = vmatprep.mubr.msk.bf16.mxu0 %vm5934_vm0, %v5933_v45  ;;  %5471 = vmatpush3.bf16.msra.mxu0 %v5810_v41  ;;  %v1272_v46 = vadd.f32 %v6673_v27, %v1207_v22  ;;  %v1063_v28 = vadd.f32 %v6640_v18, %v1062_v39  ;;  %v1064_v60 = vpop.f32.mrb[117].mxu0 }
 0x203   : > { %v5188_v14 = vpop.f32.mrb[1].mxu1  ;;  %5472 = vmatprep.subr.bf16.mxu0 %v5933_v45  ;;  %v1065_v7 = vpop.f32.mrb[118].mxu0 }
 0x204   : > { %v6678_v19 = vpop.f32.mrb[2].mxu1  ;;  %v6680_v40 = vpack.c.bf16 %v1272_v46, %v1271_v37  ;;  %v1143_v48 = vmax.f32 %v1063_v28, 0.0  ;;  %v1066_v61 = vadd.f32 %v6640_v18, %v1065_v7  ;;  %v1067_v36 = vpop.f32.mrb[119].mxu0  ;;  %v1674_v14 = vrot.slane %v6486_v51, 4 }
 0x205   : > { %v5189_v41 = vpop.f32.mrb[3].mxu1  ;;  %v5809_v36 = vld [vmem:[%s7651_s2 + $0x40] sm:$0xff]  }
 0x206   : > { %5473 = vmatpush3.bf16.msra.mxu0 %v5812_v43  ;;  %v1208_v8 = vmul.f32 %v6652_v24, %v1143_v48  ;;  %v1144_v31 = vmax.f32 %v1066_v61, 0.0 }
 0x207   : > { %5518 = vmatprep.subr.bf16.mxu0 %v5933_v45 }
 0x208   : > { %5251 = vmatmul.mubr.msk.bf16.gmra.mrb[56].mxu1 %vm1375_vm2, %v6486_v51  ;;  %v1273_v22 = vadd.f32 %v6673_v27, %v1208_v8  ;;  %v1209_v39 = vmul.f32 %v6652_v24, %v1144_v31  ;;  %v2517_v31 = vsel %vm1319_vm1, %v6459_v10, %v1674_v14 }
 0x209   : > { %5431 = vmatmul.mubr.msk.bf16.gmra.mrb[152].mxu0 %vm1375_vm2, %v6454_v2  ;;  %5258 = vmatprep.mubr.msk.bf16.mxu1 %vm5934_vm0, %v5933_v45  ;;  %v1070_v37 = vpop.f32.mrb[120].mxu0 }
 0x20a   : > { %5434 = vmatprep.mubr.msk.bf16.mxu0 %vm5934_vm0, %v5933_v45  ;;  %v1274_v43 = vadd.f32 %v6673_v27, %v1209_v39  ;;  %v1071_v46 = vadd.f32 %v6640_v18, %v1070_v37  ;;  %v1072_v28 = vpop.f32.mrb[121].mxu0  ;;  %v5811_v37 = vld [vmem:[%s7651_s2 + $0x48] sm:$0xff]  }
 0x20b   : > { %v1073_v60 = vpop.f32.mrb[122].mxu0 }
 0x20c   : > { %v6698_v7 = vpack.c.bf16 %v1274_v43, %v1273_v22  ;;  %v1145_v48 = vmax.f32 %v1071_v46, 0.0  ;;  %v1074_v2 = vadd.f32 %v6640_v18, %v1073_v60  ;;  %v1075_v61 = vpop.f32.mrb[123].mxu0 }
 0x20e   : > { %v1210_v41 = vmul.f32 %v6652_v24, %v1145_v48  ;;  %v1146_v8 = vmax.f32 %v1074_v2, 0.0 }
 0x210   : > { %5259 = vmatmul.mubr.msk.bf16.vlgmr.msra.gmra.mrb[60].mxu1 %vm1375_vm2, %v6193_v20  ;;  %v1275_v22 = vadd.f32 %v6673_v27, %v1210_v41  ;;  %v1211_v39 = vmul.f32 %v6652_v24, %v1146_v8  ;;  %v2403_v20 = vrot.slane %v6622_v54, 4 }
 0x211   : > { %5279 = vmatpush3.bf16.msra.mxu1 %v5809_v36  ;;  %5435 = vmatmul.mubr.msk.bf16.gmra.mrb[156].mxu0 %vm1375_vm2, %v2517_v31  ;;  %v1078_v43 = vpop.f32.mrb[124].mxu0 }
 0x212   : > { %5262 = vmatprep.mubr.msk.bf16.mxu1 %vm5934_vm0, %v5933_v45  ;;  %5438 = vmatprep.mubr.msk.bf16.mxu0 %vm5934_vm0, %v5933_v45  ;;  %v1276_v10 = vadd.f32 %v6673_v27, %v1211_v39  ;;  %v1079_v46 = vadd.f32 %v6640_v18, %v1078_v43  ;;  %v1080_v28 = vpop.f32.mrb[125].mxu0  ;;  %v2518_v41 = vsel %vm1319_vm1, %v6601_v9, %v2403_v20 }
 0x213   : > { %5280 = vmatprep.subr.bf16.mxu1 %v5933_v45  ;;  %v1081_v60 = vpop.f32.mrb[126].mxu0 }
 0x214   : > { %v6723_v48 = vpack.c.bf16 %v1276_v10, %v1275_v22  ;;  %v1147_v2 = vmax.f32 %v1079_v46, 0.0  ;;  %v1082_v61 = vadd.f32 %v6640_v18, %v1081_v60  ;;  %v1083_v36 = vpop.f32.mrb[127].mxu0 }
 0x215   : > { %5281 = vmatpush3.bf16.msra.mxu1 %v5811_v37 }
 0x216   : > { %5302 = vmatprep.subr.bf16.mxu1 %v5933_v45  ;;  %v1212_v8 = vmul.f32 %v6652_v24, %v1147_v2  ;;  %v1148_v31 = vmax.f32 %v1082_v61, 0.0 }
 0x218   : > { %5263 = vmatmul.mubr.msk.bf16.gmra.mrb[64].mxu1 %vm1375_vm2, %v6280_v16  ;;  %v1277_v22 = vadd.f32 %v6673_v27, %v1212_v8  ;;  %v1213_v39 = vmul.f32 %v6652_v24, %v1148_v31  ;;  %v5814_v16 = vld [vmem:[%s7651_s2 + $0xe0] sm:$0xff]   ;;  %v5813_v24 = vld [vmem:[%s7651_s2 + $0x50] sm:$0xff]   ;;  %v5818_v31 = vld [vmem:[%s7651_s2 + $0x68] sm:$0xff]  }
 0x219   : > { %5439 = vmatmul.mubr.msk.bf16.gmra.mrb[160].mxu0 %vm1375_vm2, %v2518_v41  ;;  %5266 = vmatprep.mubr.msk.bf16.mxu1 %vm5934_vm0, %v5933_v45 }
 0x21a   : > { %5442 = vmatprep.mubr.msk.bf16.mxu0 %vm5934_vm0, %v5933_v45  ;;  %v1278_v18 = vadd.f32 %v6673_v27, %v1213_v39 }
 0x21c   : > { %v6742_v37 = vpack.c.bf16 %v1278_v18, %v1277_v22 }
 0x220   : > { %5267 = vmatmul.mubr.msk.bf16.gmra.mrb[68].mxu1 %vm1375_vm2, %v6335_v63  ;;  %v5816_v63 = vld [vmem:[%s7651_s2 + $0xe8] sm:$0xff]  }
 0x221   : > { %5443 = vmatmul.mubr.msk.bf16.gmra.mrb[164].mxu0 %vm1375_vm2, %v6643_v44  ;;  %5270 = vmatprep.mubr.msk.bf16.mxu1 %vm5934_vm0, %v5933_v45 }
 0x222   : > { %5474 = vmatprep.mubr.msk.bf16.mxu0 %vm5934_vm0, %v5933_v45 }
 0x228   : > { %5271 = vmatmul.mubr.msk.bf16.gmra.mrb[72].mxu1 %vm1375_vm2, %v6468_v38 }
 0x229   : > { %5475 = vmatmul.mubr.msk.bf16.vlgmr.msra.gmra.mrb[168].mxu0 %vm1375_vm2, %v6374_v56  ;;  %5274 = vmatprep.mubr.msk.bf16.mxu1 %vm5934_vm0, %v5933_v45  ;;  %v6776_v56 = vrot.slane %v6558_v5, 4 }
 0x22a   : > { %5478 = vmatprep.mubr.msk.bf16.mxu0 %vm5934_vm0, %v5933_v45  ;;  %5519 = vmatpush3.bf16.msra.mxu0 %v5814_v16 }
 0x22b   : > { %5520 = vmatprep.subr.bf16.mxu0 %v5933_v45  ;;  %v6784_v27 = vsel %vm1319_vm1, %v6524_v11, %v6776_v56  ;;  %v7659_v11 = vrot.slane %v6698_v7, 4 }
 0x22d   : > { %v2744_v46 = vsel %vm1319_vm1, %v6680_v40, %v7659_v11 }
 0x22e   : > { %5521 = vmatpush3.bf16.msra.mxu0 %v5816_v63 }
 0x22f   : > { %5566 = vmatprep.subr.bf16.mxu0 %v5933_v45 }
 0x230   : > { %5275 = vmatmul.mubr.msk.bf16.gmra.mrb[76].mxu1 %vm1375_vm2, %v1674_v14 }
 0x231   : > { %5479 = vmatmul.mubr.msk.bf16.gmra.mrb[172].mxu0 %vm1375_vm2, %v6518_v59  ;;  %5282 = vmatprep.mubr.msk.bf16.mxu1 %vm5934_vm0, %v5933_v45  ;;  %v5815_v59 = vld [vmem:[%s7651_s2 + $0x58] sm:$0xff]  }
 0x232   : > { %5482 = vmatprep.mubr.msk.bf16.mxu0 %vm5934_vm0, %v5933_v45 }
 0x238   : > { %5283 = vmatmul.mubr.msk.bf16.vlgmr.msra.gmra.mrb[80].mxu1 %vm1375_vm2, %v6229_v6 }
 0x239   : > { %5303 = vmatpush3.bf16.msra.mxu1 %v5813_v24  ;;  %5483 = vmatmul.mubr.msk.bf16.gmra.mrb[176].mxu0 %vm1375_vm2, %v6784_v27 }
 0x23a   : > { %v6793_v14 = vpop.f32.mrb[4].mxu1  ;;  %5286 = vmatprep.mubr.msk.bf16.mxu1 %vm5934_vm0, %v5933_v45  ;;  %5486 = vmatprep.mubr.msk.bf16.mxu0 %vm5934_vm0, %v5933_v45 }
 0x23b   : > { %v5192_v43 = vpop.f32.mrb[5].mxu1  ;;  %5304 = vmatprep.subr.bf16.mxu1 %v5933_v45 }
 0x23c   : > { %v6801_v6 = vpop.f32.mrb[6].mxu1 }
 0x23d   : > { %v5193_v10 = vpop.f32.mrb[7].mxu1  ;;  %5305 = vmatpush3.bf16.msra.mxu1 %v5815_v59  ;;  %v5820_v59 = vld [vmem:[%s7651_s2 + $0x78] sm:$0xff]  }
 0x23e   : > { %5326 = vmatprep.subr.bf16.mxu1 %v5933_v45 }
 0x240   : > { %5287 = vmatmul.mubr.msk.bf16.gmra.mrb[84].mxu1 %vm1375_vm2, %v6358_v34 }
 0x241   : > { %5487 = vmatmul.mubr.msk.bf16.gmra.mrb[180].mxu0 %vm1375_vm2, %v2744_v46  ;;  %5290 = vmatprep.mubr.msk.bf16.mxu1 %vm5934_vm0, %v5933_v45 }
 0x242   : > { %5490 = vmatprep.mubr.msk.bf16.mxu0 %vm5934_vm0, %v5933_v45 }
 0x244   : > { %v6815_v28 = vpop.f32.mrb[128].mxu0 }
 0x245   : > { %v5380_v60 = vpop.f32.mrb[129].mxu0 }
 0x246   : > { %v6817_v2 = vpop.f32.mrb[130].mxu0 }
 0x247   : > { %v5381_v61 = vpop.f32.mrb[131].mxu0 }
 0x248   : > { %5291 = vmatmul.mubr.msk.bf16.gmra.mrb[88].mxu1 %vm1375_vm2, %v6397_v23 }
 0x249   : > { %5491 = vmatmul.mubr.msk.bf16.gmra.mrb[184].mxu0 %vm1375_vm2, %v6723_v48  ;;  %5294 = vmatprep.mubr.msk.bf16.mxu1 %vm5934_vm0, %v5933_v45 }
 0x24a   : > { %v6825_v34 = vpop.f32.mrb[8].mxu1  ;;  %5522 = vmatprep.mubr.msk.bf16.mxu0 %vm5934_vm0, %v5933_v45 }
 0x24b   : > { %v5196_v36 = vpop.f32.mrb[9].mxu1 }
 0x24c   : > { %v6829_v41 = vpop.f32.mrb[10].mxu1 }
 0x24d   : > { %v5197_v8 = vpop.f32.mrb[11].mxu1 }
 0x250   : > { %5295 = vmatmul.mubr.msk.bf16.gmra.mrb[92].mxu1 %vm1375_vm2, %v6547_v47  ;;  %v5817_v47 = vld [vmem:[%s7651_s2 + $0x60] sm:$0xff]  }
 0x251   : > { %5523 = vmatmul.mubr.msk.bf16.vlgmr.msra.gmra.mrb[188].mxu0 %vm1375_vm2, %v6397_v23  ;;  %5298 = vmatprep.mubr.msk.bf16.mxu1 %vm5934_vm0, %v5933_v45  ;;  %v2170_v23 = vrot.slane %v6570_v0, 4 }
 0x252   : > { %5526 = vmatprep.mubr.msk.bf16.mxu0 %vm5934_vm0, %v5933_v45 }
 0x258   : > { %5299 = vmatmul.mubr.msk.bf16.gmra.mrb[96].mxu1 %vm1375_vm2, %v6558_v5 }
 0x259   : > { %5527 = vmatmul.mubr.msk.bf16.gmra.mrb[192].mxu0 %vm1375_vm2, %v6552_v25  ;;  %5306 = vmatprep.mubr.msk.bf16.mxu1 %vm5934_vm0, %v5933_v45  ;;  %v2969_v25 = vsel %vm1319_vm1, %v6558_v5, %v2170_v23 }
 0x25a   : > { %5530 = vmatprep.mubr.msk.bf16.mxu0 %vm5934_vm0, %v5933_v45 }
 0x260   : > { %5307 = vmatmul.mubr.msk.bf16.vlgmr.msra.gmra.mrb[100].mxu1 %vm1375_vm2, %v6225_v4 }
 0x261   : > { %5327 = vmatpush3.bf16.msra.mxu1 %v5817_v47  ;;  %5531 = vmatmul.mubr.msk.bf16.gmra.mrb[196].mxu0 %vm1375_vm2, %v2969_v25 }
 0x262   : > { %5310 = vmatprep.mubr.msk.bf16.mxu1 %vm5934_vm0, %v5933_v45  ;;  %5328 = vmatprep.subr.bf16.mxu1 %v5933_v45 }
 0x263   : > { %5534 = vmatprep.mubr.msk.bf16.mxu0 %vm5934_vm0, %v5933_v45 }
 0x265   : > { %5329 = vmatpush3.bf16.msra.mxu1 %v5818_v31 }
 0x266   : > { %5350 = vmatprep.subr.bf16.mxu1 %v5933_v45 }
 0x268   : > { %5311 = vmatmul.mubr.msk.bf16.gmra.mrb[104].mxu1 %vm1375_vm2, %v6353_v32 }
 0x269   : > { %5314 = vmatprep.mubr.msk.bf16.mxu1 %vm5934_vm0, %v5933_v45 }
 0x270   : > { %5315 = vmatmul.mubr.msk.bf16.gmra.mrb[108].mxu1 %vm1375_vm2, %v6392_v13 }
 0x271   : > { %5318 = vmatprep.mubr.msk.bf16.mxu1 %vm5934_vm0, %v5933_v45 }
 0x278   : > { %5319 = vmatmul.mubr.msk.bf16.gmra.mrb[112].mxu1 %vm1375_vm2, %v6533_v33  ;;  %v5819_v33 = vld [vmem:[%s7651_s2 + $0x70] sm:$0xff]  }
 0x279   : > { %5322 = vmatprep.mubr.msk.bf16.mxu1 %vm5934_vm0, %v5933_v45 }
 0x27c   : > { %v6879_v4 = vpop.f32.mrb[132].mxu0 }
 0x27d   : > { %v5384_v22 = vpop.f32.mrb[133].mxu0 }
 0x27e   : > { %v6881_v39 = vpop.f32.mrb[134].mxu0 }
 0x27f   : > { %v5385_v32 = vpop.f32.mrb[135].mxu0 }
 0x280   : > { %5323 = vmatmul.mubr.msk.bf16.gmra.mrb[116].mxu1 %vm1375_vm2, %v6776_v56 }
 0x281   : > { %5330 = vmatprep.mubr.msk.bf16.mxu1 %vm5934_vm0, %v5933_v45 }
 0x282   : > { %v1445_v18 = vpop.f32.mrb[12].mxu1 }
 0x283   : > { %v5200_v16 = vpop.f32.mrb[13].mxu1 }
 0x284   : > { %v1448_v63 = vpop.f32.mrb[14].mxu1 }
 0x285   : > { %v5201_v24 = vpop.f32.mrb[15].mxu1 }
 0x288   : > { %5331 = vmatmul.mubr.msk.bf16.vlgmr.msra.gmra.mrb[120].mxu1 %vm1375_vm2, %v6247_v29 }
 0x289   : > { %5351 = vmatpush3.bf16.msra.mxu1 %v5819_v33  ;;  %5334 = vmatprep.mubr.msk.bf16.mxu1 %vm5934_vm0, %v5933_v45 }
 0x28a   : > { %5352 = vmatprep.subr.bf16.mxu1 %v5933_v45 }
 0x28b   : > { %v1453_v43 = vpop.f32.mrb[16].mxu1 }
 0x28c   : > { %v5204_v10 = vpop.f32.mrb[17].mxu1  ;;  %v6898_v46 = vpop.f32.mrb[136].mxu0 }
 0x28d   : > { %v1456_v60 = vpop.f32.mrb[18].mxu1  ;;  %v5388_v61 = vpop.f32.mrb[137].mxu0  ;;  %5353 = vmatpush3.bf16.msra.mxu1 %v5820_v59 }
 0x28e   : > { %v5205_v36 = vpop.f32.mrb[19].mxu1  ;;  %v6900_v8 = vpop.f32.mrb[138].mxu0  ;;  %5398 = vmatprep.subr.bf16.mxu1 %v5933_v45 }
 0x28f   : > { %v5389_v29 = vpop.f32.mrb[139].mxu0 }
 0x290   : > { %5335 = vmatmul.mubr.msk.bf16.gmra.mrb[124].mxu1 %vm1375_vm2, %v6378_v57 }
 0x291   : > { %5338 = vmatprep.mubr.msk.bf16.mxu1 %vm5934_vm0, %v5933_v45 }
 0x293   : > { %v1516_v47 = vpop.f32.mrb[20].mxu1 }
 0x294   : > { %v1517_v25 = vadd.f32 %v1516_v47, %v6663_v62  ;;  %v5212_v31 = vpop.f32.mrb[21].mxu1 }
 0x295   : > { %v1519_v22 = vpop.f32.mrb[22].mxu1  ;;  %v5821_v31 = vld [vmem:[%s7651_s2 + $0x90] sm:$0xff]  }
 0x296   : > { %v1520_v32 = vadd.f32 %v1519_v22, %v6678_v19  ;;  %v5213_v16 = vpop.f32.mrb[23].mxu1 }
 0x298   : > { %5339 = vmatmul.mubr.msk.bf16.gmra.mrb[128].mxu1 %vm1375_vm2, %v6417_v15 }
 0x299   : > { %5342 = vmatprep.mubr.msk.bf16.mxu1 %vm5934_vm0, %v5933_v45 }
 0x29b   : > { %v1524_v24 = vpop.f32.mrb[24].mxu1 }
 0x29c   : > { %v1525_v57 = vadd.f32 %v1524_v24, %v6793_v14  ;;  %v5216_v33 = vpop.f32.mrb[25].mxu1 }
 0x29d   : > { %v1527_v59 = vpop.f32.mrb[26].mxu1 }
 0x29e   : > { %v1528_v10 = vadd.f32 %v1527_v59, %v6801_v6  ;;  %v5217_v60 = vpop.f32.mrb[27].mxu1 }
 0x2a0   : > { %5343 = vmatmul.mubr.msk.bf16.gmra.mrb[132].mxu1 %vm1375_vm2, %v6784_v27 }
 0x2a1   : > { %5346 = vmatprep.mubr.msk.bf16.mxu1 %vm5934_vm0, %v5933_v45 }
 0x2a3   : > { %v1532_v62 = vpop.f32.mrb[28].mxu1 }
 0x2a4   : > { %v1533_v15 = vadd.f32 %v1532_v62, %v6825_v34  ;;  %v5220_v19 = vpop.f32.mrb[29].mxu1 }
 0x2a5   : > { %v1535_v61 = vpop.f32.mrb[30].mxu1 }
 0x2a6   : > { %v1536_v36 = vadd.f32 %v1535_v61, %v6829_v41  ;;  %v5221_v29 = vpop.f32.mrb[31].mxu1  ;;  %v5822_v41 = vld [vmem:[%s7651_s2 + $0x98] sm:$0xff]  }
 0x2a8   : > { %5347 = vmatmul.mubr.msk.bf16.gmra.mrb[136].mxu1 %vm1375_vm2, %v6570_v0 }
 0x2a9   : > { %5354 = vmatprep.mubr.msk.bf16.mxu1 %vm5934_vm0, %v5933_v45 }
 0x2ab   : > { %v1540_v14 = vpop.f32.mrb[32].mxu1 }
 0x2ac   : > { %v1541_v6 = vadd.f32 %v1540_v14, %v1445_v18  ;;  %v5224_v27 = vpop.f32.mrb[33].mxu1 }
 0x2ad   : > { %v1543_v47 = vpop.f32.mrb[34].mxu1 }
 0x2ae   : > { %v1544_v34 = vadd.f32 %v1543_v47, %v1448_v63  ;;  %v5225_v22 = vpop.f32.mrb[35].mxu1  ;;  %v2855_v63 = vrot.slane %v6723_v48, 4 }
 0x2b0   : > { %5355 = vmatmul.mubr.msk.bf16.vlgmr.msra.gmra.mrb[140].mxu1 %vm1375_vm2, %v6241_v26  ;;  %v2970_v26 = vsel %vm1319_vm1, %v6698_v7, %v2855_v63 }
 0x2b1   : > { %5399 = vmatpush3.bf16.msra.mxu1 %v5821_v31  ;;  %5358 = vmatprep.mubr.msk.bf16.mxu1 %vm5934_vm0, %v5933_v45 }
 0x2b2   : > { %5400 = vmatprep.subr.bf16.mxu1 %v5933_v45  ;;  %5535 = vmatmul.mubr.msk.bf16.gmra.mrb[200].mxu0 %vm1375_vm2, %v2970_v26 }
 0x2b3   : > { %v1548_v18 = vpop.f32.mrb[36].mxu1  ;;  %5538 = vmatprep.mubr.msk.bf16.mxu0 %vm5934_vm0, %v5933_v45 }
 0x2b4   : > { %v6936_v16 = vadd.f32 %v1548_v18, %v1453_v43  ;;  %v5228_v24 = vpop.f32.mrb[37].mxu1 }
 0x2b5   : > { %v1551_v33 = vpop.f32.mrb[38].mxu1  ;;  %5401 = vmatpush3.bf16.msra.mxu1 %v5822_v41  ;;  %v6974_v41 = vsel %vm1319_vm1, %v6529_v3, %v6558_v5 }
 0x2b6   : > { %v5229_v59 = vpop.f32.mrb[39].mxu1  ;;  %5446 = vmatprep.subr.bf16.mxu1 %v5933_v45 }
 0x2b8   : > { %5359 = vmatmul.mubr.msk.bf16.gmra.mrb[144].mxu1 %vm1375_vm2, %v6367_v52 }
 0x2b9   : > { %5362 = vmatprep.mubr.msk.bf16.mxu1 %vm5934_vm0, %v5933_v45 }
 0x2ba   : > { %5539 = vmatmul.mubr.msk.bf16.gmra.mrb[204].mxu0 %vm1375_vm2, %v6742_v37 }
 0x2bb   : > { %v1624_v43 = vpop.f32.mrb[40].mxu1  ;;  %5574 = vmatprep.mubr.msk.bf16.mxu0 %vm5934_vm0, %v5933_v45 }
 0x2bc   : > { %v6951_v60 = vadd.f32 %v1624_v43, %v1517_v25  ;;  %v5236_v62 = vpop.f32.mrb[41].mxu1 }
 0x2bd   : > { %v1627_v19 = vpop.f32.mrb[42].mxu1 }
 0x2be   : > { %v6953_v61 = vadd.f32 %v1627_v19, %v1520_v32  ;;  %v5237_v29 = vpop.f32.mrb[43].mxu1 }
 0x2c0   : > { %5363 = vmatmul.mubr.msk.bf16.gmra.mrb[148].mxu1 %vm1375_vm2, %v6410_v49 }
 0x2c1   : > { %5366 = vmatprep.mubr.msk.bf16.mxu1 %vm5934_vm0, %v5933_v45 }
 0x2c3   : > { %v1632_v52 = vpop.f32.mrb[44].mxu1 }
 0x2c4   : > { %v6963_v25 = vadd.f32 %v1632_v52, %v1525_v57  ;;  %v5240_v14 = vpop.f32.mrb[45].mxu1  ;;  %v6965_v27 = vpop.f32.mrb[140].mxu0 }
 0x2c5   : > { %v1635_v32 = vpop.f32.mrb[46].mxu1  ;;  %v5392_v47 = vpop.f32.mrb[141].mxu0 }
 0x2c6   : > { %v6967_v31 = vadd.f32 %v1635_v32, %v1528_v10  ;;  %v5241_v49 = vpop.f32.mrb[47].mxu1  ;;  %v6969_v22 = vpop.f32.mrb[142].mxu0 }
 0x2c7   : > { %v5393_v18 = vpop.f32.mrb[143].mxu0 }
 0x2c8   : > { %5367 = vmatmul.mubr.msk.bf16.gmra.mrb[152].mxu1 %vm1375_vm2, %v6974_v41 }
 0x2c9   : > { %5370 = vmatprep.mubr.msk.bf16.mxu1 %vm5934_vm0, %v5933_v45 }
 0x2cb   : > { %v1640_v57 = vpop.f32.mrb[48].mxu1 }
 0x2cc   : > { %v6980_v24 = vadd.f32 %v1640_v57, %v1533_v15  ;;  %v5244_v10 = vpop.f32.mrb[49].mxu1  ;;  %v6982_v33 = vpop.f32.mrb[144].mxu0 }
 0x2cd   : > { %v1643_v59 = vpop.f32.mrb[50].mxu1  ;;  %v5396_v26 = vpop.f32.mrb[145].mxu0 }
 0x2ce   : > { %v6984_v43 = vadd.f32 %v1643_v59, %v1536_v36  ;;  %v5245_v62 = vpop.f32.mrb[51].mxu1  ;;  %v2388_v3 = vpop.f32.mrb[146].mxu0  ;;  %v5823_v36 = vld [vmem:[%s7651_s2 + $0xb0] sm:$0xff]  }
 0x2cf   : > { %v5397_v5 = vpop.f32.mrb[147].mxu0 }
 0x2d0   : > { %5371 = vmatmul.mubr.msk.bf16.gmra.mrb[156].mxu1 %vm1375_vm2, %v2170_v23 }
 0x2d1   : > { %5402 = vmatprep.mubr.msk.bf16.mxu1 %vm5934_vm0, %v5933_v45 }
 0x2d3   : > { %v1648_v19 = vpop.f32.mrb[52].mxu1 }
 0x2d4   : > { %v6991_v15 = vadd.f32 %v1648_v19, %v1541_v6  ;;  %v5248_v29 = vpop.f32.mrb[53].mxu1  ;;  %v6993_v52 = vpop.f32.mrb[148].mxu0  ;;  %v5824_v6 = vld [vmem:[%s7651_s2 + $0xb8] sm:$0xff]  }
 0x2d5   : > { %v1651_v14 = vpop.f32.mrb[54].mxu1  ;;  %v5428_v32 = vpop.f32.mrb[149].mxu0 }
 0x2d6   : > { %v6998_v47 = vadd.f32 %v1651_v14, %v1544_v34  ;;  %v5249_v49 = vpop.f32.mrb[55].mxu1  ;;  %v7000_v18 = vpop.f32.mrb[150].mxu0 }
 0x2d7   : > { %v5429_v23 = vpop.f32.mrb[151].mxu0 }
 0x2d8   : > { %5403 = vmatmul.mubr.msk.bf16.vlgmr.msra.gmra.mrb[160].mxu1 %vm1375_vm2, %v6283_v17 }
 0x2d9   : > { %5447 = vmatpush3.bf16.msra.mxu1 %v5823_v36  ;;  %5406 = vmatprep.mubr.msk.bf16.mxu1 %vm5934_vm0, %v5933_v45 }
 0x2da   : > { %5448 = vmatprep.subr.bf16.mxu1 %v5933_v45 }
 0x2db   : > { %v1656_v57 = vpop.f32.mrb[56].mxu1 }
 0x2dc   : > { %v7011_v34 = vadd.f32 %v1656_v57, %v6936_v16  ;;  %v5252_v10 = vpop.f32.mrb[57].mxu1  ;;  %v7013_v59 = vpop.f32.mrb[152].mxu0 }
 0x2dd   : > { %v1659_v26 = vpop.f32.mrb[58].mxu1  ;;  %v5432_v62 = vpop.f32.mrb[153].mxu0  ;;  %5449 = vmatpush3.bf16.msra.mxu1 %v5824_v6 }
 0x2de   : > { %v5253_v17 = vpop.f32.mrb[59].mxu1  ;;  %v7015_v3 = vpop.f32.mrb[154].mxu0  ;;  %5494 = vmatprep.subr.bf16.mxu1 %v5933_v45 }
 0x2df   : > { %v5433_v5 = vpop.f32.mrb[155].mxu0 }
 0x2e0   : > { %5407 = vmatmul.mubr.msk.bf16.gmra.mrb[164].mxu1 %vm1375_vm2, %v6426_v21 }
 0x2e1   : > { %5410 = vmatprep.mubr.msk.bf16.mxu1 %vm5934_vm0, %v5933_v45 }
 0x2e3   : > { %v1743_v16 = vpop.f32.mrb[60].mxu1 }
 0x2e4   : > { %v7023_v19 = vadd.f32 %v1743_v16, %v6951_v60  ;;  %v5260_v29 = vpop.f32.mrb[61].mxu1  ;;  %v7025_v14 = vpop.f32.mrb[156].mxu0  ;;  %v2401_v60 = vrot.slane %v6582_v12, 4 }
 0x2e5   : > { %v1746_v32 = vpop.f32.mrb[62].mxu1  ;;  %v5436_v36 = vpop.f32.mrb[157].mxu0 }
 0x2e6   : > { %v7028_v49 = vadd.f32 %v1746_v32, %v6953_v61  ;;  %v5261_v23 = vpop.f32.mrb[63].mxu1  ;;  %v7030_v6 = vpop.f32.mrb[158].mxu0 }
 0x2e7   : > { %v5437_v57 = vpop.f32.mrb[159].mxu0 }
 0x2e8   : > { %5411 = vmatmul.mubr.msk.bf16.gmra.mrb[168].mxu1 %vm1375_vm2, %v6468_v38  ;;  %v2408_v38 = vsel %vm1319_vm1, %v2401_v60, %v6601_v9 }
 0x2e9   : > { %5414 = vmatprep.mubr.msk.bf16.mxu1 %vm5934_vm0, %v5933_v45 }
 0x2eb   : > { %v1751_v21 = vpop.f32.mrb[64].mxu1 }
 0x2ec   : > { %v7038_v10 = vadd.f32 %v1751_v21, %v6963_v25  ;;  %v5264_v26 = vpop.f32.mrb[65].mxu1  ;;  %v7040_v62 = vpop.f32.mrb[160].mxu0 }
 0x2ed   : > { %v1754_v61 = vpop.f32.mrb[66].mxu1  ;;  %v5440_v17 = vpop.f32.mrb[161].mxu0 }
 0x2ee   : > { %v7043_v5 = vadd.f32 %v1754_v61, %v6967_v31  ;;  %v5265_v16 = vpop.f32.mrb[67].mxu1  ;;  %v7045_v29 = vpop.f32.mrb[162].mxu0 }
 0x2ef   : > { %v5441_v32 = vpop.f32.mrb[163].mxu0 }
 0x2f0   : > { %5415 = vmatmul.mubr.msk.bf16.gmra.mrb[172].mxu1 %vm1375_vm2, %v2408_v38 }
 0x2f1   : > { %5418 = vmatprep.mubr.msk.bf16.mxu1 %vm5934_vm0, %v5933_v45 }
 0x2f3   : > { %v1759_v12 = vpop.f32.mrb[68].mxu1 }
 0x2f4   : > { %v7053_v25 = vadd.f32 %v1759_v12, %v6980_v24  ;;  %v5268_v36 = vpop.f32.mrb[69].mxu1  ;;  %v7055_v23 = vpop.f32.mrb[164].mxu0  ;;  %v5825_v12 = vld [vmem:[%s7651_s2 + $0xd0] sm:$0xff]  }
 0x2f5   : > { %v1762_v31 = vpop.f32.mrb[70].mxu1  ;;  %v5444_v57 = vpop.f32.mrb[165].mxu0 }
 0x2f6   : > { %v7058_v21 = vadd.f32 %v1762_v31, %v6984_v43  ;;  %v5269_v26 = vpop.f32.mrb[71].mxu1  ;;  %v2614_v60 = vpop.f32.mrb[166].mxu0 }
 0x2f7   : > { %v5445_v61 = vpop.f32.mrb[167].mxu0 }
 0x2f8   : > { %5419 = vmatmul.mubr.msk.bf16.gmra.mrb[176].mxu1 %vm1375_vm2, %v2403_v20 }
 0x2f9   : > { %5450 = vmatprep.mubr.msk.bf16.mxu1 %vm5934_vm0, %v5933_v45 }
 0x2fb   : > { %v1767_v24 = vpop.f32.mrb[72].mxu1 }
 0x2fc   : > { %v7066_v17 = vadd.f32 %v1767_v24, %v6991_v15  ;;  %v5272_v16 = vpop.f32.mrb[73].mxu1  ;;  %v7068_v38 = vpop.f32.mrb[168].mxu0  ;;  %v5826_v15 = vld [vmem:[%s7651_s2 + $0xd8] sm:$0xff]  }
 0x2fd   : > { %v1770_v32 = vpop.f32.mrb[74].mxu1  ;;  %v5476_v43 = vpop.f32.mrb[169].mxu0 }
 0x2fe   : > { %v7074_v36 = vadd.f32 %v1770_v32, %v6998_v47  ;;  %v5273_v20 = vpop.f32.mrb[75].mxu1  ;;  %v7076_v31 = vpop.f32.mrb[170].mxu0 }
 0x2ff   : > { %v5477_v57 = vpop.f32.mrb[171].mxu0 }
 0x300   : > { %5451 = vmatmul.mubr.msk.bf16.vlgmr.msra.gmra.mrb[180].mxu1 %vm1375_vm2, %v6303_v42 }
 0x301   : > { %5495 = vmatpush3.bf16.msra.mxu1 %v5825_v12  ;;  %5454 = vmatprep.mubr.msk.bf16.mxu1 %vm5934_vm0, %v5933_v45 }
 0x302   : > { %5496 = vmatprep.subr.bf16.mxu1 %v5933_v45 }
 0x303   : > { %v1775_v26 = vpop.f32.mrb[76].mxu1 }
 0x304   : > { %v7087_v47 = vadd.f32 %v1775_v26, %v7011_v34  ;;  %v5276_v60 = vpop.f32.mrb[77].mxu1  ;;  %v7089_v61 = vpop.f32.mrb[172].mxu0 }
 0x305   : > { %v1778_v24 = vpop.f32.mrb[78].mxu1  ;;  %v5480_v16 = vpop.f32.mrb[173].mxu0  ;;  %5497 = vmatpush3.bf16.msra.mxu1 %v5826_v15 }
 0x306   : > { %v5277_v42 = vpop.f32.mrb[79].mxu1  ;;  %v7091_v32 = vpop.f32.mrb[174].mxu0  ;;  %5542 = vmatprep.subr.bf16.mxu1 %v5933_v45 }
 0x307   : > { %v5481_v43 = vpop.f32.mrb[175].mxu0 }
 0x308   : > { %5455 = vmatmul.mubr.msk.bf16.gmra.mrb[184].mxu1 %vm1375_vm2, %v6444_v58  ;;  %v2629_v58 = vsel %vm1319_vm1, %v6464_v55, %v6486_v51  ;;  %v2630_v51 = vsel %vm1319_vm1, %v2287_v30, %v6622_v54  ;;  %v2627_v30 = vrot.slane %v6643_v44, 4 }
 0x309   : > { %5458 = vmatprep.mubr.msk.bf16.mxu1 %vm5934_vm0, %v5933_v45 }
 0x30b   : > { %v1872_v34 = vpop.f32.mrb[80].mxu1 }
 0x30c   : > { %v7099_v12 = vadd.f32 %v1872_v34, %v7023_v19  ;;  %v5284_v20 = vpop.f32.mrb[81].mxu1  ;;  %v7101_v57 = vpop.f32.mrb[176].mxu0 }
 0x30d   : > { %v1875_v15 = vpop.f32.mrb[82].mxu1  ;;  %v5484_v26 = vpop.f32.mrb[177].mxu0 }
 0x30e   : > { %v7104_v60 = vadd.f32 %v1875_v15, %v7028_v49  ;;  %v5285_v24 = vpop.f32.mrb[83].mxu1  ;;  %v7106_v16 = vpop.f32.mrb[178].mxu0 }
 0x30f   : > { %v5485_v42 = vpop.f32.mrb[179].mxu0 }
 0x310   : > { %5459 = vmatmul.mubr.msk.bf16.gmra.mrb[188].mxu1 %vm1375_vm2, %v2629_v58 }
 0x311   : > { %5462 = vmatprep.mubr.msk.bf16.mxu1 %vm5934_vm0, %v5933_v45 }
 0x313   : > { %v1880_v19 = vpop.f32.mrb[84].mxu1 }
 0x314   : > { %v7115_v43 = vadd.f32 %v1880_v19, %v7038_v10  ;;  %v5288_v34 = vpop.f32.mrb[85].mxu1  ;;  %v7117_v49 = vpop.f32.mrb[180].mxu0 }
 0x315   : > { %v1883_v20 = vpop.f32.mrb[86].mxu1  ;;  %v5488_v15 = vpop.f32.mrb[181].mxu0 }
 0x316   : > { %v7120_v26 = vadd.f32 %v1883_v20, %v7043_v5  ;;  %v5289_v24 = vpop.f32.mrb[87].mxu1  ;;  %v7122_v55 = vpop.f32.mrb[182].mxu0 }
 0x317   : > { %v5489_v58 = vpop.f32.mrb[183].mxu0 }
 0x318   : > { %5463 = vmatmul.mubr.msk.bf16.gmra.mrb[192].mxu1 %vm1375_vm2, %v2630_v51 }
 0x319   : > { %5466 = vmatprep.mubr.msk.bf16.mxu1 %vm5934_vm0, %v5933_v45 }
 0x31b   : > { %v1888_v10 = vpop.f32.mrb[88].mxu1 }
 0x31c   : > { %v7132_v42 = vadd.f32 %v1888_v10, %v7053_v25  ;;  %v5292_v5 = vpop.f32.mrb[89].mxu1  ;;  %v7134_v19 = vpop.f32.mrb[184].mxu0 }
 0x31d   : > { %v1891_v34 = vpop.f32.mrb[90].mxu1  ;;  %v5492_v20 = vpop.f32.mrb[185].mxu0 }
 0x31e   : > { %v1915_v15 = vadd.f32 %v1891_v34, %v7058_v21  ;;  %v5293_v9 = vpop.f32.mrb[91].mxu1  ;;  %v2840_v54 = vpop.f32.mrb[186].mxu0  ;;  %v5827_v21 = vld [vmem:[%s7651_s2 + $0xf0] sm:$0xff]  }
 0x31f   : > { %v5493_v24 = vpop.f32.mrb[187].mxu0 }
 0x320   : > { %5467 = vmatmul.mubr.msk.bf16.gmra.mrb[196].mxu1 %vm1375_vm2, %v2627_v30 }
 0x321   : > { %5498 = vmatprep.mubr.msk.bf16.mxu1 %vm5934_vm0, %v5933_v45 }
 0x323   : > { %v1896_v51 = vpop.f32.mrb[92].mxu1 }
 0x324   : > { %v1916_v25 = vadd.f32 %v1896_v51, %v7066_v17  ;;  %v5296_v58 = vpop.f32.mrb[93].mxu1  ;;  %v7142_v10 = vpop.f32.mrb[188].mxu0  ;;  %v5828_v17 = vld [vmem:[%s7651_s2 + $0xf8] sm:$0xff]  }
 0x325   : > { %v1899_v5 = vpop.f32.mrb[94].mxu1  ;;  %v5524_v20 = vpop.f32.mrb[189].mxu0 }
 0x326   : > { %v1917_v44 = vadd.f32 %v1899_v5, %v7074_v36  ;;  %v5297_v34 = vpop.f32.mrb[95].mxu1  ;;  %v7148_v9 = vpop.f32.mrb[190].mxu0 }
 0x327   : > { %v5525_v30 = vpop.f32.mrb[191].mxu0 }
 0x328   : > { %5499 = vmatmul.mubr.msk.bf16.vlgmr.msra.gmra.mrb[200].mxu1 %vm1375_vm2, %v6370_v53 }
 0x329   : > { %5543 = vmatpush3.bf16.msra.mxu1 %v5827_v21  ;;  %5502 = vmatprep.mubr.msk.bf16.mxu1 %vm5934_vm0, %v5933_v45 }
 0x32a   : > { %5544 = vmatprep.subr.bf16.mxu1 %v5933_v45 }
 0x32b   : > { %v1904_v54 = vpop.f32.mrb[96].mxu1 }
 0x32c   : > { %v1918_v36 = vadd.f32 %v1904_v54, %v7087_v47  ;;  %v5300_v24 = vpop.f32.mrb[97].mxu1  ;;  %v7159_v51 = vpop.f32.mrb[192].mxu0 }
 0x32d   : > { %v1907_v58 = vpop.f32.mrb[98].mxu1  ;;  %v5528_v5 = vpop.f32.mrb[193].mxu0  ;;  %5545 = vmatpush3.bf16.msra.mxu1 %v5828_v17 }
 0x32e   : > { %v5301_v53 = vpop.f32.mrb[99].mxu1  ;;  %v7161_v20 = vpop.f32.mrb[194].mxu0  ;;  %5578 = vmatprep.subr.bf16.mxu1 %v5933_v45 }
 0x32f   : > { %v5529_v21 = vpop.f32.mrb[195].mxu0 }
 0x330   : > { %5503 = vmatmul.mubr.msk.bf16.gmra.mrb[204].mxu1 %vm1375_vm2, %v6510_v50 }
 0x331   : > { %5506 = vmatprep.mubr.msk.bf16.mxu1 %vm5934_vm0, %v5933_v45 }
 0x333   : > { %v2003_v34 = vpop.f32.mrb[100].mxu1 }
 0x334   : > { %v2041_v47 = vadd.f32 %v2003_v34, %v7099_v12  ;;  %v5308_v30 = vpop.f32.mrb[101].mxu1  ;;  %v7169_v54 = vpop.f32.mrb[196].mxu0  ;;  %v2853_v12 = vrot.slane %v6680_v40, 4 }
 0x335   : > { %v2006_v24 = vpop.f32.mrb[102].mxu1  ;;  %v5532_v17 = vpop.f32.mrb[197].mxu0 }
 0x336   : > { %v2042_v58 = vadd.f32 %v2006_v24, %v7104_v60  ;;  %v5309_v5 = vpop.f32.mrb[103].mxu1  ;;  %v7172_v53 = vpop.f32.mrb[198].mxu0  ;;  %v2860_v24 = vsel %vm1319_vm1, %v2853_v12, %v6698_v7 }
 0x337   : > { %v5533_v21 = vpop.f32.mrb[199].mxu0 }
 0x338   : > { %5507 = vmatmul.mubr.msk.bf16.gmra.mrb[208].mxu1 %vm1375_vm2, %v6974_v41 }
 0x339   : > { %5510 = vmatprep.mubr.msk.bf16.mxu1 %vm5934_vm0, %v5933_v45 }
 0x33b   : > { %v2011_v50 = vpop.f32.mrb[104].mxu1 }
 0x33c   : > { %v2043_v34 = vadd.f32 %v2011_v50, %v7115_v43  ;;  %v5312_v30 = vpop.f32.mrb[105].mxu1 }
 0x33d   : > { %v2014_v1 = vpop.f32.mrb[106].mxu1 }
 0x33e   : > { %v2044_v17 = vadd.f32 %v2014_v1, %v7120_v26  ;;  %v5313_v60 = vpop.f32.mrb[107].mxu1 }
 0x340   : > { %5511 = vmatmul.mubr.msk.bf16.gmra.mrb[212].mxu1 %vm1375_vm2, %v2860_v24 }
 0x341   : > { %5514 = vmatprep.mubr.msk.bf16.mxu1 %vm5934_vm0, %v5933_v45 }
 0x343   : > { %v2019_v41 = vpop.f32.mrb[108].mxu1 }
 0x344   : > { %v2045_v5 = vadd.f32 %v2019_v41, %v7132_v42  ;;  %v5316_v21 = vpop.f32.mrb[109].mxu1 }
 0x345   : > { %v2022_v40 = vpop.f32.mrb[110].mxu1 }
 0x346   : > { %v2046_v11 = vadd.f32 %v2022_v40, %v1915_v15  ;;  %v5317_v43 = vpop.f32.mrb[111].mxu1 }
 0x348   : > { %5515 = vmatmul.mubr.msk.bf16.gmra.mrb[216].mxu1 %vm1375_vm2, %v2855_v63 }
 0x349   : > { %5546 = vmatprep.mubr.msk.bf16.mxu1 %vm5934_vm0, %v5933_v45 }
 0x34b   : > { %v2027_v1 = vpop.f32.mrb[112].mxu1 }
 0x34c   : > { %v2047_v26 = vadd.f32 %v2027_v1, %v1916_v25  ;;  %v5320_v50 = vpop.f32.mrb[113].mxu1  ;;  %v3081_v1 = vsel %vm1319_vm1, %v6776_v56, %v6570_v0 }
 0x34d   : > { %v2030_v12 = vpop.f32.mrb[114].mxu1 }
 0x34e   : > { %v2048_v30 = vadd.f32 %v2030_v12, %v1917_v44  ;;  %v5321_v60 = vpop.f32.mrb[115].mxu1 }
 0x350   : > { %5547 = vmatmul.mubr.msk.bf16.vlgmr.msra.gmra.mrb[220].mxu1 %vm1375_vm2, %v6392_v13 }
 0x351   : > { %5550 = vmatprep.mubr.msk.bf16.mxu1 %vm5934_vm0, %v5933_v45 }
 0x353   : > { %v2035_v42 = vpop.f32.mrb[116].mxu1 }
 0x354   : > { %v2049_v15 = vadd.f32 %v2035_v42, %v1918_v36  ;;  %v5324_v24 = vpop.f32.mrb[117].mxu1 }
 0x355   : > { %v2038_v41 = vpop.f32.mrb[118].mxu1 }
 0x356   : > { %v5325_v63 = vpop.f32.mrb[119].mxu1  ;;  %v3079_v41 = vrot.slane %v6742_v37, 4 }
 0x358   : > { %5551 = vmatmul.mubr.msk.bf16.gmra.mrb[224].mxu1 %vm1375_vm2, %v6539_v35 }
 0x359   : > { %5554 = vmatprep.mubr.msk.bf16.mxu1 %vm5934_vm0, %v5933_v45 }
 0x35b   : > { %v2120_v25 = vpop.f32.mrb[120].mxu1 }
 0x35c   : > { %v2158_v44 = vadd.f32 %v2120_v25, %v2041_v47  ;;  %v5332_v21 = vpop.f32.mrb[121].mxu1  ;;  %v7660_v47 = vrot.slane %v6698_v7, 4 }
 0x35d   : > { %v2123_v40 = vpop.f32.mrb[122].mxu1 }
 0x35e   : > { %v2159_v43 = vadd.f32 %v2123_v40, %v2042_v58  ;;  %v5333_v13 = vpop.f32.mrb[123].mxu1  ;;  %v3082_v58 = vsel %vm1319_vm1, %v7660_v47, %v6723_v48 }
 0x360   : > { %5555 = vmatmul.mubr.msk.bf16.gmra.mrb[228].mxu1 %vm1375_vm2, %v3081_v1 }
 0x361   : > { %5558 = vmatprep.mubr.msk.bf16.mxu1 %vm5934_vm0, %v5933_v45 }
 0x363   : > { %v2128_v36 = vpop.f32.mrb[124].mxu1 }
 0x364   : > { %v2160_v35 = vadd.f32 %v2128_v36, %v2043_v34  ;;  %v5336_v50 = vpop.f32.mrb[125].mxu1 }
 0x365   : > { %v2131_v12 = vpop.f32.mrb[126].mxu1 }
 0x366   : > { %v2161_v60 = vadd.f32 %v2131_v12, %v2044_v17  ;;  %v5337_v42 = vpop.f32.mrb[127].mxu1 }
 0x368   : > { %5559 = vmatmul.mubr.msk.bf16.gmra.mrb[232].mxu1 %vm1375_vm2, %v3082_v58 }
 0x369   : > { %5562 = vmatprep.mubr.msk.bf16.mxu1 %vm5934_vm0, %v5933_v45 }
 0x36b   : > { %v2136_v0 = vpop.f32.mrb[128].mxu1 }
 0x36c   : > { %v2162_v56 = vadd.f32 %v2136_v0, %v2045_v5  ;;  %v5340_v24 = vpop.f32.mrb[129].mxu1 }
 0x36d   : > { %v2139_v34 = vpop.f32.mrb[130].mxu1 }
 0x36e   : > { %v2163_v63 = vadd.f32 %v2139_v34, %v2046_v11  ;;  %v5341_v25 = vpop.f32.mrb[131].mxu1 }
 0x370   : > { %5563 = vmatmul.mubr.msk.bf16.gmra.mrb[236].mxu1 %vm1375_vm2, %v3079_v41 }
 0x371   : > { %5586 = vmatprep.mubr.msk.bf16.mxu1 %vm5934_vm0, %v5933_v45 }
 0x373   : > { %v2144_v7 = vpop.f32.mrb[132].mxu1 }
 0x374   : > { %v2164_v48 = vadd.f32 %v2144_v7, %v2047_v26  ;;  %v5344_v17 = vpop.f32.mrb[133].mxu1 }
 0x375   : > { %v2147_v21 = vpop.f32.mrb[134].mxu1 }
 0x376   : > { %v2165_v40 = vadd.f32 %v2147_v21, %v2048_v30  ;;  %v5345_v13 = vpop.f32.mrb[135].mxu1 }
 0x37b   : > { %v2152_v1 = vpop.f32.mrb[136].mxu1 }
 0x37c   : > { %v2166_v36 = vadd.f32 %v2152_v1, %v2049_v15  ;;  %v5348_v5 = vpop.f32.mrb[137].mxu1  ;;  %v5829_v15 = vld [vmem:[%s7652_s3 + $0x20] sm:$0xff]  }
 0x37d   : > { %v2155_v50 = vpop.f32.mrb[138].mxu1  ;;  %5567 = vmatpush3.bf16.msra.mxu0 %v5829_v15 }
 0x37e   : > { %v5349_v12 = vpop.f32.mrb[139].mxu1  ;;  %5568 = vmatprep.subr.bf16.mxu0 %v5933_v45 }
 0x383   : > { %v2239_v37 = vpop.f32.mrb[140].mxu1 }
 0x384   : > { %v2277_v42 = vadd.f32 %v2239_v37, %v2158_v44  ;;  %v5356_v11 = vpop.f32.mrb[141].mxu1 }
 0x385   : > { %v2242_v47 = vpop.f32.mrb[142].mxu1  ;;  %v7219_v34 = vpop.f32.mrb[200].mxu0 }
 0x386   : > { %v2278_v58 = vadd.f32 %v2242_v47, %v2159_v43  ;;  %v5357_v0 = vpop.f32.mrb[143].mxu1  ;;  %v2391_v24 = vadd.f32 %v6815_v28, %v2277_v42  ;;  %v5536_v7 = vpop.f32.mrb[201].mxu0 }
 0x387   : > { %v7224_v44 = vpop.f32.mrb[202].mxu0 }
 0x388   : > { %v2392_v41 = vadd.f32 %v6817_v2, %v2278_v58  ;;  %v5537_v28 = vpop.f32.mrb[203].mxu0 }
 0x38b   : > { %v2247_v26 = vpop.f32.mrb[144].mxu1 }
 0x38c   : > { %v2279_v30 = vadd.f32 %v2247_v26, %v2160_v35  ;;  %v5360_v25 = vpop.f32.mrb[145].mxu1 }
 0x38d   : > { %v2250_v17 = vpop.f32.mrb[146].mxu1  ;;  %v7239_v47 = vpop.f32.mrb[204].mxu0 }
 0x38e   : > { %v2280_v21 = vadd.f32 %v2250_v17, %v2161_v60  ;;  %v5361_v43 = vpop.f32.mrb[147].mxu1  ;;  %v2393_v13 = vadd.f32 %v6879_v4, %v2279_v30  ;;  %v5830_v60 = vld [vmem:[%s7652_s3 + $0x28] sm:$0xff]   ;;  %v5831_v4 = vld [vmem:[%s7652_s3] sm:$0xff]   ;;  %v5540_v30 = vpop.f32.mrb[205].mxu0 }
 0x38f   : > { %5569 = vmatpush3.bf16.msra.mxu0 %v5830_v60  ;;  %5579 = vmatpush3.bf16.msra.mxu1 %v5831_v4  ;;  %v3066_v25 = vpop.f32.mrb[206].mxu0  ;;  %v5834_v60 = vld [vmem:[%s7652_s3 + $0x38] sm:$0xff]  }
 0x390   : > { %v2394_v2 = vadd.f32 %v6881_v39, %v2280_v21  ;;  %5570 = vmatprep.subr.bf16.mxu0 %v5933_v45  ;;  %5580 = vmatprep.subr.bf16.mxu1 %v5933_v45  ;;  %v5541_v15 = vpop.f32.mrb[207].mxu0 }
 0x393   : > { %v2255_v35 = vpop.f32.mrb[148].mxu1 }
 0x394   : > { %v2281_v1 = vadd.f32 %v2255_v35, %v2162_v56  ;;  %v5364_v5 = vpop.f32.mrb[149].mxu1 }
 0x395   : > { %v2258_v50 = vpop.f32.mrb[150].mxu1 }
 0x396   : > { %v2282_v12 = vadd.f32 %v2258_v50, %v2163_v63  ;;  %v5365_v37 = vpop.f32.mrb[151].mxu1  ;;  %v2395_v42 = vadd.f32 %v6898_v46, %v2281_v1  ;;  %v5836_v50 = vld [vmem:[%s7652_s3 + $0x18] sm:$0xff]  }
 0x398   : > { %v2396_v11 = vadd.f32 %v6900_v8, %v2282_v12  ;;  %v5832_v8 = vld [vmem:[%s7652_s3 + $0x30] sm:$0xff]  }
 0x399   : > { %5571 = vmatpush3.bf16.msra.mxu0 %v5832_v8 }
 0x39a   : > { %5572 = vmatprep.subr.bf16.mxu0 %v5933_v45 }
 0x39b   : > { %v2263_v39 = vpop.f32.mrb[152].mxu1 }
 0x39c   : > { %v2283_v56 = vadd.f32 %v2263_v39, %v2164_v48  ;;  %v5368_v63 = vpop.f32.mrb[153].mxu1 }
 0x39d   : > { %v2266_v46 = vpop.f32.mrb[154].mxu1  ;;  %5573 = vmatpush3.bf16.msra.mxu0 %v5834_v60 }
 0x39e   : > { %v2284_v58 = vadd.f32 %v2266_v46, %v2165_v40  ;;  %v5369_v0 = vpop.f32.mrb[155].mxu1  ;;  %v2397_v26 = vadd.f32 %v6965_v27, %v2283_v56  ;;  %v5833_v27 = vld [vmem:[%s7652_s3 + $0x8] sm:$0xff]   ;;  %5590 = vmatprep.subr.bf16.mxu0 %v5933_v45 }
 0x39f   : > { %5581 = vmatpush3.bf16.msra.mxu1 %v5833_v27 }
 0x3a0   : > { %v2398_v7 = vadd.f32 %v6969_v22, %v2284_v58  ;;  %5582 = vmatprep.subr.bf16.mxu1 %v5933_v45  ;;  %v5835_v22 = vld [vmem:[%s7652_s3 + $0x10] sm:$0xff]  }
 0x3a3   : > { %v2271_v48 = vpop.f32.mrb[156].mxu1  ;;  %5583 = vmatpush3.bf16.msra.mxu1 %v5835_v22 }
 0x3a4   : > { %v2285_v17 = vadd.f32 %v2271_v48, %v2166_v36  ;;  %v5372_v21 = vpop.f32.mrb[157].mxu1  ;;  %5584 = vmatprep.subr.bf16.mxu1 %v5933_v45 }
 0x3a5   : > { %v2274_v43 = vpop.f32.mrb[158].mxu1 }
 0x3a6   : > { %v5373_v40 = vpop.f32.mrb[159].mxu1  ;;  %v2399_v28 = vadd.f32 %v6982_v33, %v2285_v17 }
 0x3a7   : > { %5585 = vmatpush3.bf16.msra.mxu1 %v5836_v50 }
 0x3a8   : > { %5602 = vmatprep.subr.bf16.mxu1 %v5933_v45 }
 0x3ab   : > { %v2469_v35 = vpop.f32.mrb[160].mxu1 }
 0x3ac   : > { %v2507_v1 = vadd.f32 %v2469_v35, %v2391_v24  ;;  %v5404_v36 = vpop.f32.mrb[161].mxu1 }
 0x3ad   : > { %v2472_v5 = vpop.f32.mrb[162].mxu1 }
 0x3ae   : > { %v2508_v12 = vadd.f32 %v2472_v5, %v2392_v41  ;;  %v5405_v33 = vpop.f32.mrb[163].mxu1  ;;  %v2617_v37 = vadd.f32 %v6993_v52, %v2507_v1 }
 0x3b0   : > { %v2618_v4 = vadd.f32 %v7000_v18, %v2508_v12 }
 0x3b3   : > { %v2477_v24 = vpop.f32.mrb[164].mxu1 }
 0x3b4   : > { %v2509_v39 = vadd.f32 %v2477_v24, %v2393_v13  ;;  %v5408_v56 = vpop.f32.mrb[165].mxu1 }
 0x3b5   : > { %v2480_v63 = vpop.f32.mrb[166].mxu1 }
 0x3b6   : > { %v2510_v41 = vadd.f32 %v2480_v63, %v2394_v2  ;;  %v5409_v46 = vpop.f32.mrb[167].mxu1  ;;  %v2619_v52 = vadd.f32 %v7013_v59, %v2509_v39 }
 0x3b8   : > { %v2620_v58 = vadd.f32 %v7015_v3, %v2510_v41 }
 0x3bb   : > { %v2485_v0 = vpop.f32.mrb[168].mxu1 }
 0x3bc   : > { %v2511_v8 = vadd.f32 %v2485_v0, %v2395_v42  ;;  %v5412_v30 = vpop.f32.mrb[169].mxu1 }
 0x3bd   : > { %v2488_v25 = vpop.f32.mrb[170].mxu1 }
 0x3be   : > { %v2512_v18 = vadd.f32 %v2488_v25, %v2396_v11  ;;  %v5413_v15 = vpop.f32.mrb[171].mxu1  ;;  %v2621_v48 = vadd.f32 %v7025_v14, %v2511_v8 }
 0x3c0   : > { %v2622_v17 = vadd.f32 %v7030_v6, %v2512_v18 }
 0x3c3   : > { %v2493_v21 = vpop.f32.mrb[172].mxu1 }
 0x3c4   : > { %v2513_v13 = vadd.f32 %v2493_v21, %v2397_v26  ;;  %v5416_v43 = vpop.f32.mrb[173].mxu1 }
 0x3c5   : > { %v2496_v27 = vpop.f32.mrb[174].mxu1 }
 0x3c6   : > { %v2514_v2 = vadd.f32 %v2496_v27, %v2398_v7  ;;  %v5417_v40 = vpop.f32.mrb[175].mxu1  ;;  %v2623_v59 = vadd.f32 %v7040_v62, %v2513_v13 }
 0x3c8   : > { %v2624_v3 = vadd.f32 %v7045_v29, %v2514_v2 }
 0x3cb   : > { %v2501_v22 = vpop.f32.mrb[176].mxu1 }
 0x3cc   : > { %v2515_v42 = vadd.f32 %v2501_v22, %v2399_v28  ;;  %v5420_v35 = vpop.f32.mrb[177].mxu1 }
 0x3cd   : > { %v2504_v1 = vpop.f32.mrb[178].mxu1 }
 0x3ce   : > { %v5421_v11 = vpop.f32.mrb[179].mxu1  ;;  %v2625_v36 = vadd.f32 %v7055_v23, %v2515_v42 }
 0x3d3   : > { %v2691_v14 = vpop.f32.mrb[180].mxu1 }
 0x3d4   : > { %v2729_v5 = vadd.f32 %v2691_v14, %v2617_v37  ;;  %v5452_v6 = vpop.f32.mrb[181].mxu1 }
 0x3d5   : > { %v2694_v50 = vpop.f32.mrb[182].mxu1 }
 0x3d6   : > { %v2730_v26 = vadd.f32 %v2694_v50, %v2618_v4  ;;  %v5453_v12 = vpop.f32.mrb[183].mxu1  ;;  %v2843_v7 = vadd.f32 %v7068_v38, %v2729_v5 }
 0x3d8   : > { %v2844_v33 = vadd.f32 %v7076_v31, %v2730_v26 }
 0x3db   : > { %v2699_v62 = vpop.f32.mrb[184].mxu1 }
 0x3dc   : > { %v2731_v60 = vadd.f32 %v2699_v62, %v2619_v52  ;;  %v5456_v29 = vpop.f32.mrb[185].mxu1 }
 0x3dd   : > { %v2702_v24 = vpop.f32.mrb[186].mxu1 }
 0x3de   : > { %v2732_v28 = vadd.f32 %v2702_v24, %v2620_v58  ;;  %v5457_v39 = vpop.f32.mrb[187].mxu1  ;;  %v2845_v56 = vadd.f32 %v7089_v61, %v2731_v60 }
 0x3e0   : > { %v2846_v23 = vadd.f32 %v7091_v32, %v2732_v28 }
 0x3e3   : > { %v2707_v63 = vpop.f32.mrb[188].mxu1 }
 0x3e4   : > { %v2733_v37 = vadd.f32 %v2707_v63, %v2621_v48  ;;  %v5460_v41 = vpop.f32.mrb[189].mxu1 }
 0x3e5   : > { %v2710_v46 = vpop.f32.mrb[190].mxu1 }
 0x3e6   : > { %v2734_v4 = vadd.f32 %v2710_v46, %v2622_v17  ;;  %v5461_v0 = vpop.f32.mrb[191].mxu1  ;;  %v2847_v38 = vadd.f32 %v7101_v57, %v2733_v37  ;;  %v7302_v37 = vld [vmem:[%s7655_s6 + $0x3] ss:$0 sm:$0xff] }
 0x3e8   : > { %v2848_v31 = vadd.f32 %v7106_v16, %v2734_v4 }
 0x3eb   : > { %v2715_v8 = vpop.f32.mrb[192].mxu1 }
 0x3ec   : > { %v2735_v52 = vadd.f32 %v2715_v8, %v2623_v59  ;;  %v5464_v30 = vpop.f32.mrb[193].mxu1 }
 0x3ed   : > { %v2718_v25 = vpop.f32.mrb[194].mxu1  ;;  %v7315_v30 = vld [vmem:[%s7655_s6 + $0x5] ss:$0 sm:$0xff] }
 0x3ee   : > { %v2736_v58 = vadd.f32 %v2718_v25, %v2624_v3  ;;  %v5465_v18 = vpop.f32.mrb[195].mxu1  ;;  %v2849_v61 = vadd.f32 %v7117_v49, %v2735_v52 }
 0x3f0   : > { %v2850_v32 = vadd.f32 %v7122_v55, %v2736_v58 }
 0x3f3   : > { %v2723_v15 = vpop.f32.mrb[196].mxu1 }
 0x3f4   : > { %v2737_v48 = vadd.f32 %v2723_v15, %v2625_v36  ;;  %v5468_v21 = vpop.f32.mrb[197].mxu1 }
 0x3f5   : > { %v2726_v13 = vpop.f32.mrb[198].mxu1 }
 0x3f6   : > { %v5469_v17 = vpop.f32.mrb[199].mxu1  ;;  %v2851_v43 = vadd.f32 %v7134_v19, %v2737_v48 }
 0x3fb   : > { %v2921_v57 = vpop.f32.mrb[200].mxu1 }
 0x3fc   : > { %v2959_v27 = vadd.f32 %v2921_v57, %v2843_v7  ;;  %v5500_v16 = vpop.f32.mrb[201].mxu1 }
 0x3fd   : > { %v2924_v2 = vpop.f32.mrb[202].mxu1 }
 0x3fe   : > { %v2960_v40 = vadd.f32 %v2924_v2, %v2844_v33  ;;  %v5501_v59 = vpop.f32.mrb[203].mxu1  ;;  %v3069_v3 = vadd.f32 %v7142_v10, %v2959_v27  ;;  %v5838_v2 = vld [vmem:[%s7652_s3 + $0x40] sm:$0xff]  }
 0x400   : > { %v3070_v22 = vadd.f32 %v7148_v9, %v2960_v40 }
 0x403   : > { %v2929_v49 = vpop.f32.mrb[204].mxu1 }
 0x404   : > { %v2961_v42 = vadd.f32 %v2929_v49, %v2845_v56  ;;  %v5504_v55 = vpop.f32.mrb[205].mxu1  ;;  %v5839_v49 = vld [vmem:[%s7652_s3 + $0x68] sm:$0xff]  }
 0x405   : > { %v2932_v35 = vpop.f32.mrb[206].mxu1 }
 0x406   : > { %v2962_v1 = vadd.f32 %v2932_v35, %v2846_v23  ;;  %v5505_v11 = vpop.f32.mrb[207].mxu1  ;;  %v3071_v36 = vadd.f32 %v7159_v51, %v2961_v42 }
 0x407   : > { %v5840_v11 = vld [vmem:[%s7652_s3 + $0x48] sm:$0xff]  }
 0x408   : > { %v3072_v19 = vadd.f32 %v7161_v20, %v2962_v1 }
 0x40b   : > { %v2937_v14 = vpop.f32.mrb[208].mxu1 }
 0x40c   : > { %v2963_v5 = vadd.f32 %v2937_v14, %v2847_v38  ;;  %v5508_v6 = vpop.f32.mrb[209].mxu1  ;;  %v7308_v38 = vld [vmem:[%s7655_s6 + $0x4] ss:$0 sm:$0xff] }
 0x40d   : > { %v2940_v50 = vpop.f32.mrb[210].mxu1 }
 0x40e   : > { %v2964_v26 = vadd.f32 %v2940_v50, %v2848_v31  ;;  %v5509_v12 = vpop.f32.mrb[211].mxu1  ;;  %v3073_v10 = vadd.f32 %v7169_v54, %v2963_v5  ;;  %v5841_v50 = vld [vmem:[%s7652_s3 + $0x70] sm:$0xff]  }
 0x410   : > { %v7288_v9 = vadd.f32 %v7172_v53, %v2964_v26 }
 0x413   : > { %v2945_v7 = vpop.f32.mrb[212].mxu1 }
 0x414   : > { %v2965_v33 = vadd.f32 %v2945_v7, %v2849_v61  ;;  %v5512_v62 = vpop.f32.mrb[213].mxu1  ;;  %v5842_v7 = vld [vmem:[%s7652_s3 + $0x50] sm:$0xff]  }
 0x415   : > { %v2948_v60 = vpop.f32.mrb[214].mxu1 }
 0x416   : > { %v2966_v29 = vadd.f32 %v2948_v60, %v2850_v32  ;;  %v5513_v24 = vpop.f32.mrb[215].mxu1  ;;  %v7291_v51 = vadd.f32 %v7219_v34, %v2965_v33  ;;  %v5843_v60 = vld [vmem:[%s7652_s3 + $0x78] sm:$0xff]  }
 0x418   : > { %v7294_v20 = vadd.f32 %v7224_v44, %v2966_v29 }
 0x41b   : > { %v2953_v28 = vpop.f32.mrb[216].mxu1 }
 0x41c   : > { %v2967_v39 = vadd.f32 %v2953_v28, %v2851_v43  ;;  %v5516_v56 = vpop.f32.mrb[217].mxu1  ;;  %v5837_v43 = vld [vmem:[%s7652_s3 + $0x60] sm:$0xff]  }
 0x41d   : > { %v2956_v23 = vpop.f32.mrb[218].mxu1  ;;  %v5844_v56 = vld [vmem:[%s7652_s3 + $0x58] sm:$0xff]  }
 0x41e   : > { %v7297_v54 = vadd.f32 %v7239_v47, %v2967_v39  ;;  %v5517_v53 = vpop.f32.mrb[219].mxu1 }
 0x423   : > { %v3143_v63 = vpop.f32.mrb[220].mxu1 }
 0x424   : > { %v3181_v41 = vadd.f32 %v3143_v63, %v3069_v3  ;;  %v5548_v34 = vpop.f32.mrb[221].mxu1 }
 0x425   : > { %v3146_v46 = vpop.f32.mrb[222].mxu1 }
 0x426   : > { %v3191_v44 = vadd.f32 %v7302_v37, %v3181_v41  ;;  %v3182_v4 = vadd.f32 %v3146_v46, %v3070_v22  ;;  %v5549_v0 = vpop.f32.mrb[223].mxu1 }
 0x428   : > { %v3200_v47 = vmax.f32 %v3191_v44, 0.0  ;;  %v3192_v31 = vadd.f32 %v7302_v37, %v3182_v4 }
 0x42a   : > { %v3210_v8 = vmul.f32 %v7308_v38, %v3200_v47  ;;  %v3201_v52 = vmax.f32 %v3192_v31, 0.0 }
 0x42b   : > { %v3151_v25 = vpop.f32.mrb[224].mxu1 }
 0x42c   : > { %v3211_v58 = vmul.f32 %v7308_v38, %v3201_v52  ;;  %v3183_v18 = vadd.f32 %v3151_v25, %v3071_v36  ;;  %v5552_v61 = vpop.f32.mrb[225].mxu1  ;;  %v3220_v15 = vadd.f32 %v7315_v30, %v3210_v8  ;;  %v5847_v52 = vld [vmem:[%s7652_s3 + $0xa8] sm:$0xff]  }
 0x42d   : > { %v3154_v32 = vpop.f32.mrb[226].mxu1  ;;  %v5848_v61 = vld [vmem:[%s7652_s3 + $0x88] sm:$0xff]  }
 0x42e   : > { %v3221_v48 = vadd.f32 %v7315_v30, %v3211_v58  ;;  %v3193_v21 = vadd.f32 %v7302_v37, %v3183_v18  ;;  %v3184_v13 = vadd.f32 %v3154_v32, %v3072_v19  ;;  %v5553_v17 = vpop.f32.mrb[227].mxu1 }
 0x430   : > { %v3229_v57 = vpack.c.bf16 %v3221_v48, %v3220_v15  ;;  %v3202_v27 = vmax.f32 %v3193_v21, 0.0  ;;  %v3194_v16 = vadd.f32 %v7302_v37, %v3184_v13  ;;  %v5849_v13 = vld [vmem:[%s7652_s3 + $0xb0] sm:$0xff]  }
 0x432   : > { %v3252_v40 = vrot.slane %v3229_v57, 4  ;;  %v3212_v59 = vmul.f32 %v7308_v38, %v3202_v27  ;;  %v3203_v3 = vmax.f32 %v3194_v16, 0.0  ;;  %5587 = vmatmul.mubr.msk.bf16.vlgmr.msra.gmra.mrb[240].mxu1 %vm3277_vm3, %v3229_v57  ;;  %v5850_v57 = vld [vmem:[%s7652_s3 + $0x90] sm:$0xff]  }
 0x433   : > { %5603 = vmatpush3.bf16.msra.mxu1 %v5837_v43  ;;  %v3159_v22 = vpop.f32.mrb[228].mxu1  ;;  %5610 = vmatprep.mubr.msk.bf16.mxu1 %vm5934_vm0, %v5933_v45 }
 0x434   : > { %v3213_v42 = vmul.f32 %v7308_v38, %v3203_v3  ;;  %v3185_v55 = vadd.f32 %v3159_v22, %v3073_v10  ;;  %v5556_v35 = vpop.f32.mrb[229].mxu1  ;;  %5575 = vmatmul.mubr.msk.bf16.vlgmr.msra.gmra.mrb[208].mxu0 %vm3277_vm3, %v3252_v40  ;;  %5604 = vmatprep.subr.bf16.mxu1 %v5933_v45  ;;  %v3222_v36 = vadd.f32 %v7315_v30, %v3212_v59  ;;  %v5855_v59 = vld [vmem:[%s7652_s3 + $0xe8] sm:$0xff]   ;;  %v5857_v22 = vld [vmem:[%s7652_s3 + $0xf0] sm:$0xff]  }
 0x435   : > { %5591 = vmatpush3.bf16.msra.mxu0 %v5838_v2  ;;  %v3162_v1 = vpop.f32.mrb[230].mxu1  ;;  %5598 = vmatprep.mubr.msk.bf16.mxu0 %vm5934_vm0, %v5933_v45  ;;  %v5852_v2 = vld [vmem:[%s7652_s3 + $0x98] sm:$0xff]   ;;  %v5856_v3 = vld [vmem:[%s7652_s3 + $0xc8] sm:$0xff]  }
 0x436   : > { %v3223_v19 = vadd.f32 %v7315_v30, %v3213_v42  ;;  %v3195_v14 = vadd.f32 %v7302_v37, %v3185_v55  ;;  %v3186_v5 = vadd.f32 %v3162_v1, %v7288_v9  ;;  %v5557_v6 = vpop.f32.mrb[231].mxu1  ;;  %5592 = vmatprep.subr.bf16.mxu0 %v5933_v45  ;;  %v5859_v42 = vld [vmem:[%s7652_s3 + $0xf8] sm:$0xff]   ;;  %v5861_v1 = vld [vmem:[%s7652_s3 + $0x100] sm:$0xff]  }
 0x437   : > { %5605 = vmatpush3.bf16.msra.mxu1 %v5839_v49  ;;  %v5858_v49 = vld [vmem:[%s7652_s3 + $0xd0] sm:$0xff]   ;;  %v5860_v55 = vld [vmem:[%s7652_s3 + $0xd8] sm:$0xff]  }
 0x438   : > { %v3230_v26 = vpack.c.bf16 %v3223_v19, %v3222_v36  ;;  %v3204_v12 = vmax.f32 %v3195_v14, 0.0  ;;  %v3196_v10 = vadd.f32 %v7302_v37, %v3186_v5  ;;  %5606 = vmatprep.subr.bf16.mxu1 %v5933_v45  ;;  %v5862_v36 = vld [vmem:[%s7652_s3 + $0x108] sm:$0xff]   ;;  %v5863_v19 = vld [vmem:[%s7652_s3 + $0x110] sm:$0xff]   ;;  %v5864_v14 = vld [vmem:[%s7652_s3 + $0x118] sm:$0xff]  }
 0x439   : > { %5593 = vmatpush3.bf16.msra.mxu0 %v5840_v11  ;;  %v7661_v11 = vmov 0   ;;  %v5865_v6 = vld [vmem:[%s7653_s4] ss:$16 sps:$4 sm:$0xff]  }
 0x43a   : > { %v3214_v9 = vmul.f32 %v7308_v38, %v3204_v12  ;;  %v3205_v33 = vmax.f32 %v3196_v10, 0.0  ;;  %5594 = vmatprep.subr.bf16.mxu0 %v5933_v45  ;;  %v3475_v46 = vrot.slane %v3230_v26, 4  ;;  %v5873_v12 = vld [vmem:[%s7653_s4 + $0x24] ss:$16 sps:$4 sm:$0xff]   ;;  %v5876_v10 = vld [vmem:[%s7653_s4 + $0x2c] ss:$16 sps:$4 sm:$0xff]  }
 0x43b   : > { %5607 = vmatpush3.bf16.msra.mxu1 %v5841_v50  ;;  %v3167_v62 = vpop.f32.mrb[232].mxu1  ;;  %v5867_v50 = vld [vmem:[%s7653_s4 + $0x4] ss:$16 sps:$4 sm:$0xff]  }
 0x43c   : > { %v3215_v29 = vmul.f32 %v7308_v38, %v3205_v33  ;;  %v3187_v24 = vadd.f32 %v3167_v62, %v7291_v51  ;;  %v5560_v28 = vpop.f32.mrb[233].mxu1  ;;  %5608 = vmatprep.subr.bf16.mxu1 %v5933_v45  ;;  %v3224_v23 = vadd.f32 %v7315_v30, %v3214_v9  ;;  %v5845_v51 = vld [vmem:[%s7652_s3 + $0xa0] sm:$0xff]   ;;  %v5874_v9 = vld [vmem:[%s7653_s4 + $0x28] ss:$16 sps:$4 sm:$0xff]   ;;  %v5882_v62 = vld [vmem:[%s7653_s4 + $0x4c] ss:$16 sps:$4 sm:$0xff]  }
 0x43d   : > { %5595 = vmatpush3.bf16.msra.mxu0 %v5842_v7  ;;  %v3170_v39 = vpop.f32.mrb[234].mxu1  ;;  %v5871_v7 = vld [vmem:[%s7653_s4 + $0x20] ss:$16 sps:$4 sm:$0xff]   ;;  %v5879_v33 = vld [vmem:[%s7653_s4 + $0x44] ss:$16 sps:$4 sm:$0xff]  }
 0x43e   : > { %v3225_v53 = vadd.f32 %v7315_v30, %v3215_v29  ;;  %v3197_v63 = vadd.f32 %v7302_v37, %v3187_v24  ;;  %v3188_v41 = vadd.f32 %v3170_v39, %v7294_v20  ;;  %v5561_v34 = vpop.f32.mrb[235].mxu1  ;;  %5596 = vmatprep.subr.bf16.mxu0 %v5933_v45  ;;  %v5846_v20 = vld [vmem:[%s7652_s3 + $0x80] sm:$0xff]   ;;  %v5880_v29 = vld [vmem:[%s7653_s4 + $0x48] ss:$16 sps:$4 sm:$0xff]   ;;  %v5888_v28 = vld [vmem:[%s7653_s4 + $0x6c] ss:$16 sps:$4 sm:$0xff]  }
 0x43f   : > { %5609 = vmatpush3.bf16.msra.mxu1 %v5843_v60  ;;  %v5877_v60 = vld [vmem:[%s7653_s4 + $0x40] ss:$16 sps:$4 sm:$0xff]   ;;  %v5885_v24 = vld [vmem:[%s7653_s4 + $0x64] ss:$16 sps:$4 sm:$0xff]  }
 0x440   : > { %v3231_v44 = vpack.c.bf16 %v3225_v53, %v3224_v23  ;;  %v3206_v4 = vmax.f32 %v3197_v63, 0.0  ;;  %v3198_v0 = vadd.f32 %v7302_v37, %v3188_v41  ;;  %5626 = vmatprep.subr.bf16.mxu1 %v5933_v45  ;;  %v5883_v39 = vld [vmem:[%s7653_s4 + $0x60] ss:$16 sps:$4 sm:$0xff]  }
 0x441   : > { %5597 = vmatpush3.bf16.msra.mxu0 %v5844_v56  ;;  %v5886_v56 = vld [vmem:[%s7653_s4 + $0x68] ss:$16 sps:$4 sm:$0xff]   ;;  %v5889_v23 = vld [vmem:[%s7654_s5 + $0x40] sm:$0xff]  }
 0x442   : > { %v3216_v47 = vmul.f32 %v7308_v38, %v3206_v4  ;;  %v3207_v31 = vmax.f32 %v3198_v0, 0.0  ;;  %5611 = vmatmul.mubr.msk.bf16.vlgmr.msra.gmra.mrb[244].mxu1 %vm3277_vm3, %v3475_v46  ;;  %5614 = vmatprep.subr.bf16.mxu0 %v5933_v45  ;;  %v3631_v40 = vrot.slane %v3231_v44, 4  ;;  %v5890_v53 = vld [vmem:[%s7654_s5 + $0xc0] sm:$0xff]  }
 0x443   : > { %5627 = vmatpush3.bf16.msra.mxu1 %v5845_v51  ;;  %v3175_v8 = vpop.f32.mrb[236].mxu1  ;;  %5634 = vmatprep.mubr.msk.bf16.mxu1 %vm5934_vm0, %v5933_v45 }
 0x444   : > { %v3217_v25 = vmul.f32 %v7308_v38, %v3207_v31  ;;  %v3189_v58 = vadd.f32 %v3175_v8, %v7297_v54  ;;  %5599 = vmatmul.mubr.msk.bf16.vlgmr.msra.gmra.mrb[212].mxu0 %vm3277_vm3, %v3230_v26  ;;  %5628 = vmatprep.subr.bf16.mxu1 %v5933_v45  ;;  %v5564_v18 = vpop.f32.mrb[237].mxu1  ;;  %v3226_v15 = vadd.f32 %v7315_v30, %v3216_v47  ;;  %v5868_v26 = vld [vmem:[%s7653_s4 + $0x8] ss:$16 sps:$4 sm:$0xff]  }
 0x445   : > { %5615 = vmatpush3.bf16.msra.mxu0 %v5846_v20  ;;  %5622 = vmatprep.mubr.msk.bf16.mxu0 %vm5934_vm0, %v5933_v45  ;;  %v3178_v32 = vpop.f32.mrb[238].mxu1 }
 0x446   : > { %v3227_v48 = vadd.f32 %v7315_v30, %v3217_v25  ;;  %v3199_v54 = vadd.f32 %v7302_v37, %v3189_v58  ;;  %5616 = vmatprep.subr.bf16.mxu0 %v5933_v45  ;;  %v5565_v21 = vpop.f32.mrb[239].mxu1  ;;  %v5851_v37 = vld [vmem:[%s7652_s3 + $0xb8] sm:$0xff]  }
 0x447   : > { %5629 = vmatpush3.bf16.msra.mxu1 %v5847_v52 }
 0x448   : > { %v3232_v17 = vpack.c.bf16 %v3227_v48, %v3226_v15  ;;  %v3208_v43 = vmax.f32 %v3199_v54, 0.0  ;;  %5630 = vmatprep.subr.bf16.mxu1 %v5933_v45 }
 0x449   : > { %5617 = vmatpush3.bf16.msra.mxu0 %v5848_v61 }
 0x44a   : > { %v3218_v27 = vmul.f32 %v7308_v38, %v3208_v43  ;;  %5618 = vmatprep.subr.bf16.mxu0 %v5933_v45  ;;  %v5853_v38 = vld [vmem:[%s7652_s3 + $0xe0] sm:$0xff]   ;;  %v3787_v35 = vrot.slane %v3232_v17, 4 }
 0x44b   : > { %5631 = vmatpush3.bf16.msra.mxu1 %v5849_v13 }
 0x44c   : > { %v3228_v16 = vadd.f32 %v7315_v30, %v3218_v27  ;;  %5632 = vmatprep.subr.bf16.mxu1 %v5933_v45  ;;  %v5854_v30 = vld [vmem:[%s7652_s3 + $0xc0] sm:$0xff]  }
 0x44d   : > { %5619 = vmatpush3.bf16.msra.mxu0 %v5850_v57 }
 0x44e   : > { %5620 = vmatprep.subr.bf16.mxu0 %v5933_v45  ;;  %v3233_v5 = vpack.c.bf16 %v3228_v16, %v3228_v16 }
 0x44f   : > { %5633 = vmatpush3.bf16.msra.mxu1 %v5851_v37 }
 0x450   : > { %5650 = vmatprep.subr.bf16.mxu1 %v5933_v45 }
 0x451   : > { %5621 = vmatpush3.bf16.msra.mxu0 %v5852_v2 }
 0x452   : > { %5635 = vmatmul.mubr.msk.bf16.vlgmr.msra.gmra.mrb[248].mxu1 %vm3277_vm3, %v3631_v40  ;;  %5638 = vmatprep.subr.bf16.mxu0 %v5933_v45 }
 0x453   : > { %5651 = vmatpush3.bf16.msra.mxu1 %v5853_v38  ;;  %5658 = vmatprep.mubr.msk.bf16.mxu1 %vm5934_vm0, %v5933_v45 }
 0x454   : > { %5623 = vmatmul.mubr.msk.bf16.vlgmr.msra.gmra.mrb[216].mxu0 %vm3277_vm3, %v3231_v44  ;;  %5652 = vmatprep.subr.bf16.mxu1 %v5933_v45 }
 0x455   : > { %5639 = vmatpush3.bf16.msra.mxu0 %v5854_v30  ;;  %5646 = vmatprep.mubr.msk.bf16.mxu0 %vm5934_vm0, %v5933_v45 }
 0x456   : > { %5640 = vmatprep.subr.bf16.mxu0 %v5933_v45 }
 0x457   : > { %5653 = vmatpush3.bf16.msra.mxu1 %v5855_v59 }
 0x458   : > { %5654 = vmatprep.subr.bf16.mxu1 %v5933_v45 }
 0x459   : > { %5641 = vmatpush3.bf16.msra.mxu0 %v5856_v3 }
 0x45a   : > { %5642 = vmatprep.subr.bf16.mxu0 %v5933_v45 }
 0x45b   : > { %5655 = vmatpush3.bf16.msra.mxu1 %v5857_v22 }
 0x45c   : > { %5656 = vmatprep.subr.bf16.mxu1 %v5933_v45 }
 0x45d   : > { %5643 = vmatpush3.bf16.msra.mxu0 %v5858_v49 }
 0x45e   : > { %5644 = vmatprep.subr.bf16.mxu0 %v5933_v45 }
 0x45f   : > { %5657 = vmatpush3.bf16.msra.mxu1 %v5859_v42 }
 0x460   : > { %4063 = vmatprep.subr.bf16.mxu1 %v5867_v50 }
 0x461   : > { %5645 = vmatpush3.bf16.msra.mxu0 %v5860_v55 }
 0x462   : > { %5659 = vmatmul.mubr.msk.bf16.vlgmr.msra.gmra.mrb[252].mxu1 %vm3277_vm3, %v3787_v35  ;;  %5662 = vmatprep.subr.bf16.mxu0 %v5933_v45 }
 0x463   : > { %4095 = vmatprep.mubr.bf16.mxu1 %v7661_v11  ;;  %4064 = vmatpush1.bf16.msra.mxu1 %v5865_v6  ;;  %v3936_v6 = vld [vmem:[%s7655_s6 + $0x7] ss:$0 sm:$0xff] }
 0x464   : > { %5647 = vmatmul.mubr.msk.bf16.vlgmr.msra.gmra.mrb[220].mxu0 %vm3277_vm3, %v3232_v17  ;;  %4065 = vmatprep.subr.bf16.mxu1 %v5873_v12 }
 0x465   : > { %5663 = vmatpush3.bf16.msra.mxu0 %v5861_v1  ;;  %5670 = vmatprep.mubr.msk.bf16.mxu0 %vm5934_vm0, %v5933_v45  ;;  %v3933_v1 = vld [vmem:[%s7655_s6 + $0x6] ss:$0 sm:$0xff] }
 0x466   : > { %5664 = vmatprep.subr.bf16.mxu0 %v5933_v45 }
 0x467   : > { %4066 = vmatpush1.bf16.msra.mxu1 %v5871_v7  ;;  %v5892_v7 = vld [vmem:[%s7654_s5 + $0x80] sm:$0xff]  }
 0x468   : > { %4067 = vmatprep.subr.bf16.mxu1 %v5879_v33  ;;  %v5893_v33 = vld [vmem:[%s7654_s5 + $0x48] sm:$0xff]  }
 0x469   : > { %5665 = vmatpush3.bf16.msra.mxu0 %v5862_v36 }
 0x46a   : > { %5666 = vmatprep.subr.bf16.mxu0 %v5933_v45 }
 0x46b   : > { %4068 = vmatpush1.bf16.msra.mxu1 %v5877_v60  ;;  %v5895_v60 = vld [vmem:[%s7654_s5 + $0x8] sm:$0xff]  }
 0x46c   : > { %4069 = vmatprep.subr.bf16.mxu1 %v5885_v24  ;;  %v5897_v24 = vld [vmem:[%s7654_s5 + $0x50] sm:$0xff]  }
 0x46d   : > { %5667 = vmatpush3.bf16.msra.mxu0 %v5863_v19 }
 0x46e   : > { %5668 = vmatprep.subr.bf16.mxu0 %v5933_v45  ;;  %v5870_v45 = vld [vmem:[%s7653_s4 + $0xc] ss:$16 sps:$4 sm:$0xff]  }
 0x46f   : > { %4070 = vmatpush1.bf16.msra.mxu1 %v5883_v39  ;;  %v5899_v39 = vld [vmem:[%s7654_s5 + $0x10] sm:$0xff]  }
 0x470   : > { %5138 = vmatprep.subr.bf16.mxu1 %v5889_v23  ;;  %v5901_v23 = vld [vmem:[%s7654_s5 + $0x58] sm:$0xff]  }
 0x471   : > { %5669 = vmatpush3.bf16.msra.mxu0 %v5864_v14 }
 0x472   : > { %4104 = vmatprep.subr.bf16.mxu0 %v5870_v45 }
 0x474   : > { %5671 = vmatmul.mubr.msk.bf16.vlgmr.msra.gmra.mrb[224].mxu0 %vm3277_vm3, %v3233_v5 }
 0x475   : > { %4136 = vmatprep.mubr.bf16.mxu0 %v7661_v11  ;;  %4105 = vmatpush1.bf16.msra.mxu0 %v5868_v26  ;;  %v3938_v26 = vld [vmem:[%s7655_s6 + $0x20] ss:$0 sm:$0xff] }
 0x476   : > { %4106 = vmatprep.subr.bf16.mxu0 %v5876_v10  ;;  %v5891_v10 = vld [vmem:[%s7654_s5] sm:$0xff]  }
 0x479   : > { %4107 = vmatpush1.bf16.msra.mxu0 %v5874_v9 }
 0x47a   : > { %4108 = vmatprep.subr.bf16.mxu0 %v5882_v62  ;;  %v5894_v62 = vld [vmem:[%s7654_s5 + $0xc8] sm:$0xff]  }
 0x47d   : > { %4109 = vmatpush1.bf16.msra.mxu0 %v5880_v29  ;;  %v5896_v29 = vld [vmem:[%s7654_s5 + $0x88] sm:$0xff]  }
 0x47e   : > { %4110 = vmatprep.subr.bf16.mxu0 %v5888_v28  ;;  %v5898_v28 = vld [vmem:[%s7654_s5 + $0xd0] sm:$0xff]  }
 0x481   : > { %4111 = vmatpush1.bf16.msra.mxu0 %v5886_v56  ;;  %v5900_v56 = vld [vmem:[%s7654_s5 + $0x90] sm:$0xff]  }
 0x482   : > { %5160 = vmatprep.subr.bf16.mxu0 %v5890_v53  ;;  %v5902_v53 = vld [vmem:[%s7654_s5 + $0xd8] sm:$0xff]  }
 0x505   : > { %v3382_v63 = vpop.f32.mrb[240].mxu1 }
 0x506   : > { %v5588_v41 = vpop.f32.mrb[241].mxu1 }
 0x507   : > { %v3315_v34 = vpop.f32.mrb[208].mxu0  ;;  %v3385_v51 = vpop.f32.mrb[242].mxu1  ;;  %v5904_v41 = vld [vmem:[%s7654_s5 + $0x98] sm:$0xff]  }
 0x508   : > { %v3383_v46 = vadd.f32 %v3382_v63, %v3315_v34  ;;  %v5576_v44 = vpop.f32.mrb[209].mxu0  ;;  %v5589_v4 = vpop.f32.mrb[243].mxu1  ;;  %v5903_v63 = vld [vmem:[%s7654_s5 + $0x18] sm:$0xff]   ;;  %v5905_v34 = vld [vmem:[%s7654_s5 + $0x60] sm:$0xff]  }
 0x509   : > { %v3318_v0 = vpop.f32.mrb[210].mxu0  ;;  %v5906_v51 = vld [vmem:[%s7654_s5 + $0xe0] sm:$0xff]   ;;  %v5909_v4 = vld [vmem:[%s7654_s5 + $0x68] sm:$0xff]  }
 0x50a   : > { %v5577_v20 = vpop.f32.mrb[211].mxu0  ;;  %v5908_v44 = vld [vmem:[%s7654_s5 + $0xa0] sm:$0xff]   ;;  %v5910_v0 = vld [vmem:[%s7654_s5 + $0xe8] sm:$0xff]  }
 0x50b   : > { %v5911_v20 = vld [vmem:[%s7654_s5 + $0x28] sm:$0xff]  }
 0x515   : > { %v3537_v47 = vpop.f32.mrb[244].mxu1 }
 0x516   : > { %v5612_v31 = vpop.f32.mrb[245].mxu1 }
 0x517   : > { %v3458_v8 = vpop.f32.mrb[212].mxu0  ;;  %v3540_v52 = vpop.f32.mrb[246].mxu1  ;;  %v5913_v31 = vld [vmem:[%s7654_s5 + $0x70] sm:$0xff]  }
 0x518   : > { %v3464_v25 = vadd.f32 %v3458_v8, %v3383_v46  ;;  %v5600_v58 = vpop.f32.mrb[213].mxu0  ;;  %v5613_v18 = vpop.f32.mrb[247].mxu1  ;;  %v5907_v46 = vld [vmem:[%s7654_s5 + $0x20] sm:$0xff]   ;;  %v5914_v8 = vld [vmem:[%s7654_s5 + $0xf0] sm:$0xff]  }
 0x519   : > { %v3461_v61 = vpop.f32.mrb[214].mxu0  ;;  %v5915_v52 = vld [vmem:[%s7654_s5 + $0x30] sm:$0xff]   ;;  %v5917_v58 = vld [vmem:[%s7654_s5 + $0x78] sm:$0xff]  }
 0x51a   : > { %v5601_v32 = vpop.f32.mrb[215].mxu0  ;;  %v3543_v15 = vadd.f32 %v3537_v47, %v3464_v25  ;;  %v5912_v47 = vld [vmem:[%s7654_s5 + $0xa8] sm:$0xff]   ;;  %v5916_v25 = vld [vmem:[%s7654_s5 + $0xb0] sm:$0xff]   ;;  %v5918_v18 = vld [vmem:[%s7654_s5 + $0xf8] sm:$0xff]  }
 0x51b   : > { %v5919_v61 = vld [vmem:[%s7654_s5 + $0x38] sm:$0xff]  }
 0x51c   : > { %v5920_v32 = vld [vmem:[%s7654_s5 + $0xb8] sm:$0xff]  }
 0x525   : > { %v3693_v48 = vpop.f32.mrb[248].mxu1 }
 0x526   : > { %v5636_v54 = vpop.f32.mrb[249].mxu1 }
 0x527   : > { %v3614_v21 = vpop.f32.mrb[216].mxu0  ;;  %v3696_v13 = vpop.f32.mrb[250].mxu1 }
 0x528   : > { %v3620_v17 = vadd.f32 %v3614_v21, %v3543_v15  ;;  %v5624_v43 = vpop.f32.mrb[217].mxu0  ;;  %v5637_v57 = vpop.f32.mrb[251].mxu1  ;;  %v3960_v15 = vlaneseq  ;;  %v4927_v13 = vld [vmem:[%s7655_s6 + $0x21] ss:$8 sm:$0xf] }
 0x529   : > { %v3617_v27 = vpop.f32.mrb[218].mxu0 }
 0x52a   : > { %v5625_v37 = vpop.f32.mrb[219].mxu0  ;;  %v3699_v16 = vadd.f32 %v3693_v48, %v3620_v17  ;;  %v3961_v48 = vshrl.u32 %v3960_v15, 7 }
 0x52c   : > { %v3962_v54 = vsub.s32 0, %v3961_v48  ;;  %v3970_v21 = vsub.s32 2, %v3961_v48  ;;  %v3966_v17 = vsub.s32 1, %v3961_v48  ;;  %v3974_v43 = vsub.s32 3, %v3961_v48 }
 0x52e   : > { %v3963_v57 = vrot.slane %v4927_v13, %v3962_v54  ;;  %v3971_v27 = vrot.slane %v4927_v13, %v3970_v21  ;;  %v3967_v37 = vrot.slane %v4927_v13, %v3966_v17 }
 0x535   : > { %v3849_v2 = vpop.f32.mrb[252].mxu1 }
 0x536   : > { %v5660_v38 = vpop.f32.mrb[253].mxu1 }
 0x537   : > { %v3770_v40 = vpop.f32.mrb[220].mxu0  ;;  %v3852_v30 = vpop.f32.mrb[254].mxu1 }
 0x538   : > { %v3776_v59 = vadd.f32 %v3770_v40, %v3699_v16  ;;  %v5648_v3 = vpop.f32.mrb[221].mxu0  ;;  %v5661_v22 = vpop.f32.mrb[255].mxu1  ;;  %v3975_v16 = vrot.slane %v4927_v13, %v3974_v43 }
 0x539   : > { %v3773_v49 = vpop.f32.mrb[222].mxu0 }
 0x53a   : > { %v5649_v42 = vpop.f32.mrb[223].mxu0  ;;  %v3855_v55 = vadd.f32 %v3849_v2, %v3776_v59 }
 0x547   : > { %v3926_v35 = vpop.f32.mrb[224].mxu0 }
 0x548   : > { %v3932_v11 = vadd.f32 %v3926_v35, %v3855_v55  ;;  %v5672_v36 = vpop.f32.mrb[225].mxu0 }
 0x549   : > { %v3929_v19 = vpop.f32.mrb[226].mxu0 }
 0x54a   : > { %v3934_v14 = vadd.f32 %v3933_v1, %v3932_v11  ;;  %v5673_v5 = vpop.f32.mrb[227].mxu0 }
 0x54c   : > { %v3935_v50 = vmax.f32 %v3934_v14, 0.0 }
 0x54e   : > { %v3937_v45 = vmul.f32 %v3936_v6, %v3935_v50 }
 0x550   : > { %v3939_v12 = vadd.f32 %v3938_v26, %v3937_v45 }
 0x552   : > { %v3940_v9 = vpack.c.bf16 %v3939_v12, %v3939_v12 }
 0x554   : > { %4944 = vmatmul.mubr.msk.bf16.vlgmr.msra.gmra.mrb[0].mxu1 %vm3277_vm3, %v3940_v9  ;;  %4945 = vmatmul.mubr.msk.bf16.vlgmr.msra.gmra.mrb[228].mxu0 %vm3277_vm3, %v3940_v9 }
 0x555   : > { %5139 = vmatpush3.bf16.msra.mxu1 %v5891_v10  ;;  %5161 = vmatpush3.bf16.msra.mxu0 %v5892_v7  ;;  %v4217_v10 = vld [vmem:[%s7655_s6 + $0x22] ss:$0 sm:$0xff] }
 0x556   : > { %5140 = vmatprep.subr.bf16.mxu1 %v5893_v33  ;;  %5162 = vmatprep.subr.bf16.mxu0 %v5894_v62  ;;  %v4491_v33 = vand.u32 127, %v3960_v15 }
 0x558   : > { %vm4492_vm4 = vcmp.lt.s32.totalorder %v4491_v33, 6  ;;  %vm4497_vm5 = vcmp.eq.s32.totalorder %v4491_v33, 6 }
 0x559   : > { %5141 = vmatpush3.bf16.msra.mxu1 %v5895_v60  ;;  %5163 = vmatpush3.bf16.msra.mxu0 %v5896_v29 }
 0x55a   : > { %5142 = vmatprep.subr.bf16.mxu1 %v5897_v24  ;;  %5164 = vmatprep.subr.bf16.mxu0 %v5898_v28 }
 0x55d   : > { %5143 = vmatpush3.bf16.msra.mxu1 %v5899_v39  ;;  %5165 = vmatpush3.bf16.msra.mxu0 %v5900_v56 }
 0x55e   : > { %5144 = vmatprep.subr.bf16.mxu1 %v5901_v23  ;;  %5166 = vmatprep.subr.bf16.mxu0 %v5902_v53 }
 0x561   : > { %5145 = vmatpush3.bf16.msra.mxu1 %v5903_v63  ;;  %5167 = vmatpush3.bf16.msra.mxu0 %v5904_v41 }
 0x562   : > { %5146 = vmatprep.subr.bf16.mxu1 %v5905_v34  ;;  %5168 = vmatprep.subr.bf16.mxu0 %v5906_v51 }
 0x565   : > { %5147 = vmatpush3.bf16.msra.mxu1 %v5907_v46  ;;  %5169 = vmatpush3.bf16.msra.mxu0 %v5908_v44 }
 0x566   : > { %5148 = vmatprep.subr.bf16.mxu1 %v5909_v4  ;;  %5170 = vmatprep.subr.bf16.mxu0 %v5910_v0 }
 0x569   : > { %5149 = vmatpush3.bf16.msra.mxu1 %v5911_v20  ;;  %5171 = vmatpush3.bf16.msra.mxu0 %v5912_v47 }
 0x56a   : > { %5150 = vmatprep.subr.bf16.mxu1 %v5913_v31  ;;  %5172 = vmatprep.subr.bf16.mxu0 %v5914_v8 }
 0x56d   : > { %5151 = vmatpush3.bf16.msra.mxu1 %v5915_v52  ;;  %5173 = vmatpush3.bf16.msra.mxu0 %v5916_v25 }
 0x56e   : > { %5152 = vmatprep.subr.bf16.mxu1 %v5917_v58  ;;  %5174 = vmatprep.subr.bf16.mxu0 %v5918_v18 }
 0x571   : > { %5153 = vmatpush3.bf16.msra.mxu1 %v5919_v61  ;;  %5175 = vmatpush3.bf16.msra.mxu0 %v5920_v32 }
 0x627   : > { %v4097_v2 = vpop.f32.mrb[0].mxu1  ;;  %v4138_v38 = vpop.f32.mrb[228].mxu0 }
 0x628   : > { %v4098_v40 = vadd.f32 %v4097_v2, %v3963_v57  ;;  %v4139_v30 = vadd.f32 %v4138_v38, %v3971_v27  ;;  %v4099_v59 = vpop.f32.mrb[1].mxu1  ;;  %v4140_v3 = vpop.f32.mrb[229].mxu0 }
 0x629   : > { %v4100_v22 = vadd.f32 %v4099_v59, %v3967_v37  ;;  %v4141_v49 = vadd.f32 %v4140_v3, %v3975_v16  ;;  %v4101_v42 = vpop.f32.mrb[2].mxu1  ;;  %v4142_v55 = vpop.f32.mrb[230].mxu0 }
 0x62a   : > { %v4145_v35 = vmax.f32 %v4098_v40, 0.0  ;;  %v4147_v1 = vmax.f32 %v4139_v30, 0.0  ;;  %v4102_v11 = vpop.f32.mrb[3].mxu1  ;;  %v4143_v36 = vpop.f32.mrb[231].mxu0 }
 0x62b   : > { %v4146_v19 = vmax.f32 %v4100_v22, 0.0  ;;  %v4148_v14 = vmax.f32 %v4141_v49, 0.0 }
 0x62c   : > { %v4149_v50 = vpack.c.bf16 %v4145_v35, %v4145_v35  ;;  %v4151_v26 = vpack.c.bf16 %v4147_v1, %v4147_v1 }
 0x62d   : > { %v4150_v5 = vpack.c.bf16 %v4146_v19, %v4146_v19  ;;  %v4152_v6 = vpack.c.bf16 %v4148_v14, %v4148_v14 }
 0x62f   : > { %4442 = vmatprep.mubr.bf16.mxu1 %v4150_v5  ;;  %4482 = vmatprep.mubr.bf16.mxu0 %v4152_v6 }
 0x630   : > { %4443 = vmatmul.mubr.bf16.vlgmr.msra.gmra.mrb[4].mxu1 %v4149_v50  ;;  %4483 = vmatmul.mubr.bf16.vlgmr.msra.gmra.mrb[232].mxu0 %v4151_v26 }
 0x703   : > { %v5154_v45 = vpop.f32.mrb[4].mxu1  ;;  %v5176_v12 = vpop.f32.mrb[232].mxu0 }
 0x704   : > { %v5155_v7 = vpop.f32.mrb[5].mxu1  ;;  %v5177_v9 = vpop.f32.mrb[233].mxu0 }
 0x705   : > { %v5156_v62 = vadd.f32 %v5155_v7, %v5154_v45  ;;  %v5178_v60 = vadd.f32 %v5177_v9, %v5176_v12  ;;  %v5157_v29 = vpop.f32.mrb[6].mxu1  ;;  %v5179_v24 = vpop.f32.mrb[234].mxu0 }
 0x706   : > { %v5158_v28 = vpop.f32.mrb[7].mxu1  ;;  %v5180_v39 = vpop.f32.mrb[235].mxu0 }
 0x707   : > { %v4445_v56 = vadd.f32 %v5156_v62, %v4217_v10 }
 0x709   : > { %v4485_v23 = vadd.f32 %v5178_v60, %v4445_v56 }
 0x70b   : > { %v4493_v53 = vsel %vm4492_vm4, %v4485_v23, 0.0  ;;  %v4498_v63 = vsel %vm4497_vm5, %v4485_v23, 0.0 }
 0x70c   : > { %4494 = vadd.xlane.f32.xlu0 %v4493_v53 }
 0x710   : > { %4499 = vadd.xlane.f32.xlu0 %v4498_v63 }
 0x799   : > { %v4495_v41 = vpop.xlane.xlu0 %4494 }
 0x79a   : > { %v4496_v34 = vmul.f32 0.16666667, %v4495_v41 }
 0x79d   : > { %v4500_v51 = vpop.xlane.xlu0 %4499 }
 0x79e   : > { %v4501_v46 = vsub.f32 %v4500_v51, %v4496_v34 }
 0x7a0   : > { %v4502_v44 = vadd.f32 %v4501_v46, %v4485_v23 }
 0x7a2   : > { %4503 = vst [vmem:[%s281_s10] sm:$0xff] %v4502_v44 }
 0x7a3 PF: > { %s17_s24 = sadd.s32 1, %s5930_s24  }
 0x7a4   : > { %p14_p5 = scmp.ge.s32.totalorder %s17_s24, 4  }
 0x7a6   :  { %16 = sbr.rel (!%p14_p5) target bundleno = 1 (0x1), region = 102 }

</bundles_post_ra>
